<compile_context>
chip_gen: v5e
topology: v5e:2x2
jax: 0.10.0
libtpu: 0.0.40
codegen_flags: <defaults>
</compile_context>

<pallas_src>
import functools

import jax
import jax.numpy as jnp
from jax.experimental import pallas as pl
from jax.experimental.pallas import tpu as pltpu

_LANE = 128
_NODE_PAD = 512                        # node dim padded to a multiple of this
_TM_CAP = 512                          # output row tile cap
_TK_CAP = 2048                         # Ahat contraction tile cap
_TKF_CAP = 2048                        # feature-dim contraction tile cap (v7x VMEM guard)
_Z_RESIDENT_BYTES = 12 * 1024 * 1024   # resident-Z cap (x2 buffers worst case stays << VMEM)
_VMEM_LIMIT = 48 * 1024 * 1024         # safe on v7x (64 MiB phys) and v5e/v6e (128 MiB)


# ----------------------------------------------------------------------------
# helpers
# ----------------------------------------------------------------------------
def _round_up(n, m):
    return ((n + m - 1) // m) * m


def _pick_tile(n, cap, base=_LANE):
    """Largest multiple of `base` that divides n and is <= cap."""
    for cand in range(min(cap, n), base - 1, -base):
        if cand % base == 0 and n % cand == 0:
            return cand
    return base


def _pad2(x, rows, cols):
    r, c = x.shape
    return jnp.pad(x, ((0, rows - r), (0, cols - c)))


def _spec(shape, index_map, buffers=None):
    """BlockSpec; optionally single-buffered (resident) when pipeline_mode exists."""
    if buffers is not None and hasattr(pl, "Buffered"):
        try:
            return pl.BlockSpec(shape, index_map, pipeline_mode=pl.Buffered(buffers))
        except TypeError:
            pass
    return pl.BlockSpec(shape, index_map)


# ----------------------------------------------------------------------------
# kernels
# ----------------------------------------------------------------------------
def feature_transform_kernel(x_ref, w_ref, out_ref, acc_ref):
    """K-tiled Z = X @ W  (bf16 operands, f32 VMEM accumulator, bf16 out)."""
    k = pl.program_id(1)

    @pl.when(k == 0)
    def _():
        acc_ref[...] = jnp.zeros_like(acc_ref)

    acc_ref[...] += jnp.dot(x_ref[...], w_ref[...],
                            preferred_element_type=jnp.float32)

    @pl.when(k == pl.num_programs(1) - 1)
    def _():
        out_ref[...] = acc_ref[...].astype(out_ref.dtype)


def aggregate_epilogue_kernel(adj_ref, z_ref, b_ref, wn_ref, bn_ref,
                              out_ref, acc_ref, *, relu, tk, z_resident):
    """K-tiled acc += Ahat_tile @ Z_tile; finalize: out = act(acc+b) @ Wn + bn."""
    k = pl.program_id(1)

    @pl.when(k == 0)
    def _():
        acc_ref[...] = jnp.zeros_like(acc_ref)

    if z_resident:
        # Z is fully resident in VMEM (DMA'd once); slice the K rows in-kernel.
        zk = z_ref[pl.ds(pl.multiple_of(k * tk, _LANE), tk), :]
    else:
        zk = z_ref[...]

    acc_ref[...] += jnp.dot(adj_ref[...], zk, preferred_element_type=jnp.float32)

    @pl.when(k == pl.num_programs(1) - 1)
    def _():
        h = acc_ref[...] + b_ref[...]          # bias only once, in the epilogue
        if relu:
            h = jnp.maximum(h, 0.0)
        y = jnp.dot(h.astype(jnp.bfloat16), wn_ref[...],
                    preferred_element_type=jnp.float32) + bn_ref[...]
        out_ref[...] = y.astype(out_ref.dtype)


# ----------------------------------------------------------------------------
# pallas_call wrappers
# ----------------------------------------------------------------------------
def _feature_transform(x, w, tm, tkf):
    npad, fpad = x.shape
    hpad = w.shape[1]
    return pl.pallas_call(
        feature_transform_kernel,
        out_shape=jax.ShapeDtypeStruct((npad, hpad), jnp.bfloat16),
        grid_spec=pltpu.PrefetchScalarGridSpec(
            num_scalar_prefetch=0,
            grid=(npad // tm, fpad // tkf),
            in_specs=[
                pl.BlockSpec((tm, tkf), lambda i, k: (i, k)),    # X row x K tile
                pl.BlockSpec((tkf, hpad), lambda i, k: (k, 0)),  # W1 K block
            ],
            out_specs=pl.BlockSpec((tm, hpad), lambda i, k: (i, 0)),
            scratch_shapes=[pltpu.VMEM((tm, hpad), jnp.float32)],
        ),
        compiler_params=pltpu.CompilerParams(
            dimension_semantics=("parallel", "arbitrary"),
            vmem_limit_bytes=_VMEM_LIMIT,
        ),
    )(x, w)


def _aggregate(adj, z, b, wn, bn, out_dtype, relu, tm, tk):
    npad = adj.shape[0]
    hpad = z.shape[1]
    cpad = wn.shape[1]

    # Keep Z resident in VMEM when it fits comfortably (v7x: 64 MiB phys VMEM);
    # otherwise fall back to streaming the (tk, hpad) K-block per grid step.
    z_resident = npad * hpad * z.dtype.itemsize <= _Z_RESIDENT_BYTES
    if z_resident:
        z_spec = _spec((npad, hpad), lambda i, k: (0, 0), buffers=1)
    else:
        z_spec = pl.BlockSpec((tk, hpad), lambda i, k: (k, 0))

    kernel = functools.partial(aggregate_epilogue_kernel, relu=relu, tk=tk,
                               z_resident=z_resident)
    return pl.pallas_call(
        kernel,
        out_shape=jax.ShapeDtypeStruct((npad, cpad), out_dtype),
        grid_spec=pltpu.PrefetchScalarGridSpec(
            num_scalar_prefetch=0,
            grid=(npad // tm, npad // tk),
            in_specs=[
                pl.BlockSpec((tm, tk), lambda i, k: (i, k)),         # Ahat tile (bf16)
                z_spec,                                              # Z (resident or K-block)
                _spec((1, hpad), lambda i, k: (0, 0), buffers=1),    # layer bias (resident)
                _spec((hpad, cpad), lambda i, k: (0, 0), buffers=1), # next-layer W (resident)
                _spec((1, cpad), lambda i, k: (0, 0), buffers=1),    # next-layer bias
            ],
            out_specs=pl.BlockSpec((tm, cpad), lambda i, k: (i, 0)),
            scratch_shapes=[pltpu.VMEM((tm, hpad), jnp.float32)],    # f32 accumulator
        ),
        compiler_params=pltpu.CompilerParams(
            dimension_semantics=("parallel", "arbitrary"),
            vmem_limit_bytes=_VMEM_LIMIT,
        ),
    )(adj, z, b, wn, bn)


# ----------------------------------------------------------------------------
# forward pass
# ----------------------------------------------------------------------------
@jax.jit
def gcn_encoder_forward(adj_p, x, w1, b1, w2, b2, wfc, bfc):
    """adj_p must already be padded to (npad, npad) and cast to bf16
    (see prepare_adjacency) -- hoisted out of the per-call path."""
    n, nfeat = x.shape
    nhid = w1.shape[1]
    nclass = wfc.shape[1]
    npad = adj_p.shape[0]

    fpad = _round_up(nfeat, _LANE)
    if fpad > _TKF_CAP:                      # wide features: K-tile at 2048 (v7x VMEM guard)
        fpad = _round_up(nfeat, _TKF_CAP)
        tkf = _TKF_CAP
    else:
        tkf = fpad
    hpad = _round_up(nhid, _LANE)
    cpad = _round_up(nclass, _LANE)

    # Small operands padded / cast inside the jit (cheap); Ahat handled outside.
    x_p = _pad2(x, npad, fpad).astype(jnp.bfloat16)
    w1_p = _pad2(w1, fpad, hpad).astype(jnp.bfloat16)
    b1_p = _pad2(b1, 1, hpad).astype(jnp.float32)
    w2_p = _pad2(w2, hpad, hpad).astype(jnp.bfloat16)
    b2_p = _pad2(b2, 1, hpad).astype(jnp.float32)
    wfc_p = _pad2(wfc, hpad, cpad).astype(jnp.bfloat16)
    bfc_p = _pad2(bfc, 1, cpad).astype(jnp.float32)

    # npad is a multiple of 512, so tm is always >= 256 and tk >= 512.
    tm = _pick_tile(npad, _TM_CAP)
    if npad // tm < 2 and tm > _LANE:
        tm //= 2                              # keep >= 2 row tiles for v7x megacore
    tk = _pick_tile(npad, _TK_CAP)

    # Layer 1 feature transform: Z1 = X @ W1
    z1 = _feature_transform(x_p, w1_p, tm, tkf)

    # Layer 1 aggregation + bias + ReLU, fused with layer-2 feature transform:
    #   Z2 = relu(Ahat @ Z1 + b1) @ W2     (dropout == identity at inference)
    zero_h = jnp.zeros((1, hpad), jnp.float32)
    z2 = _aggregate(adj_p, z1, b1_p, w2_p, zero_h,
                    out_dtype=jnp.bfloat16, relu=True, tm=tm, tk=tk)

    # Layer 2 aggregation + bias, fused with fc: Out = (Ahat @ Z2 + b2) @ Wfc + bfc
    out = _aggregate(adj_p, z2, b2_p, wfc_p, bfc_p,
                     out_dtype=jnp.float32, relu=False, tm=tm, tk=tk)

    return out[:n, :nclass]


# ----------------------------------------------------------------------------
# graph / parameter glue (plain JAX)
# ----------------------------------------------------------------------------
def normalized_adjacency(edge_index, num_nodes):
    """Dense D^-1/2 (A + I) D^-1/2 from a [2, E] edge_index (PyG GCNConv norm)."""
    src, dst = edge_index[0], edge_index[1]
    adj = jnp.zeros((num_nodes, num_nodes), jnp.float32)
    adj = adj.at[dst, src].set(1.0)                             # message src -> dst
    adj = adj + jnp.eye(num_nodes, dtype=jnp.float32)           # self loops
    adj = jnp.minimum(adj, 1.0)                                 # dedup multi-edges
    deg = adj.sum(axis=1)
    dinv_sqrt = jnp.where(deg > 0, 1.0 / jnp.sqrt(deg), 0.0)
    return dinv_sqrt[:, None] * adj * dinv_sqrt[None, :]


def prepare_adjacency(adj, npad):
    """Pad + bf16-cast Ahat ONCE per graph (hoisted out of the jitted forward,
    so the dominant N^2 operand is not re-read/re-cast every call).
    Note: bf16 Ahat is the dominant precision loss vs. the f32 reference;
    keep f32 here if accuracy regressions appear (doubles the HBM stream)."""
    return _pad2(adj, npad, npad).astype(jnp.bfloat16)


def init_params(key, nfeat, nhid, nclass):
    k1, k2, k3 = jax.random.split(key, 3)

    def glorot(k, fan_in, fan_out):
        limit = jnp.sqrt(6.0 / (fan_in + fan_out))
        return jax.random.uniform(k, (fan_in, fan_out), jnp.float32, -limit, limit)

    w1 = glorot(k1, nfeat, nhid)
    b1 = jnp.zeros((1, nhid), jnp.float32)
    w2 = glorot(k2, nhid, nhid)
    b2 = jnp.zeros((1, nhid), jnp.float32)
    wfc = glorot(k3, nhid, nclass)          # stored as Linear.weight.T
    bfc = jnp.zeros((1, nclass), jnp.float32)
    return w1, b1, w2, b2, wfc, bfc


def reference_forward(adj, x, w1, b1, w2, b2, wfc, bfc):
    h1 = jnp.maximum(adj @ (x @ w1) + b1, 0.0)
    h2 = adj @ (h1 @ w2) + b2
    return h2 @ wfc + bfc


if __name__ == "__main__":
    key = jax.random.PRNGKey(0)
    k_x, k_e, k_p = jax.random.split(key, 3)

    num_nodes = 16
    nfeat, nhid, nclass = 8, 16, 4
    num_edges = 32

    x = jax.random.normal(k_x, (num_nodes, nfeat), jnp.float32)
    edge_index = jax.random.randint(k_e, (2, num_edges), 0, num_nodes, jnp.int32)

    adj = normalized_adjacency(edge_index, num_nodes)
    w1, b1, w2, b2, wfc, bfc = init_params(k_p, nfeat, nhid, nclass)

    # Once-per-graph preprocessing (outside the jitted forward).
    npad = _round_up(num_nodes, _NODE_PAD)
    adj_p = jax.block_until_ready(prepare_adjacency(adj, npad))

    out = gcn_encoder_forward(adj_p, x, w1, b1, w2, b2, wfc, bfc)
    out = jax.block_until_ready(out)

    ref = reference_forward(adj, x, w1, b1, w2, b2, wfc, bfc)

    assert out.shape == (num_nodes, nclass)
    assert jnp.all(jnp.isfinite(out))
    # bf16 streaming with f32 accumulation: loose tolerance vs f32 reference.
    assert jnp.allclose(out, ref, rtol=1e-1, atol=1e-1), (
        f"max abs err {jnp.max(jnp.abs(out - ref))}")
    print("KERNEL_OK")
</pallas_src>

<mosaic_0001>
module attributes {stable_mosaic.version = 11 : i64} {
  func.func @feature_transform_kernel(%arg0: i32, %arg1: i32, %arg2: memref<256x128xbf16, #tpu.memory_space<vmem>>, %arg3: memref<128x128xbf16, #tpu.memory_space<vmem>>, %arg4: memref<256x128xbf16, #tpu.memory_space<vmem>>, %arg5: memref<256x128xf32, #tpu.memory_space<vmem>>) attributes {dimension_semantics = [#tpu.dimension_semantics<parallel>, #tpu.dimension_semantics<arbitrary>], iteration_bounds = array<i64: 2, 1>, scalar_prefetch = 0 : i64, scratch_operands = 1 : i64, tpu.core_type = #tpu.core_type<tc>, window_params = [{transform_indices = @transform_0, window_bounds = array<i64: 256, 128>}, {transform_indices = @transform_1, window_bounds = array<i64: 128, 128>}, {transform_indices = @transform_2, window_bounds = array<i64: 256, 128>}]} {
    %c0_i32 = arith.constant 0 : i32
    %0 = arith.cmpi eq, %arg1, %c0_i32 : i32
    %1 = arith.extui %0 : i1 to i32
    %c0_i32_0 = arith.constant 0 : i32
    %2 = arith.cmpi ne, %1, %c0_i32_0 : i32
    scf.if %2 {
      %cst_10 = arith.constant 0.000000e+00 : f32
      %12 = vector.broadcast %cst_10 : f32 to vector<256x128xf32>
      %c0_11 = arith.constant 0 : index
      %c0_12 = arith.constant 0 : index
      %13 = vector.load %arg5[%c0_11, %c0_12] : memref<256x128xf32, #tpu.memory_space<vmem>>, vector<256x128xf32>
      tpu.vector_store %arg5[%c0_11, %c0_12], %12 {strides = array<i32>} : memref<256x128xf32, #tpu.memory_space<vmem>>, vector<256x128xf32>,
    } else {
    }
    %c0 = arith.constant 0 : index
    %c0_1 = arith.constant 0 : index
    %3 = vector.load %arg5[%c0, %c0_1] : memref<256x128xf32, #tpu.memory_space<vmem>>, vector<256x128xf32>
    %c0_2 = arith.constant 0 : index
    %c0_3 = arith.constant 0 : index
    %4 = vector.load %arg2[%c0_2, %c0_3] : memref<256x128xbf16, #tpu.memory_space<vmem>>, vector<256x128xbf16>
    %c0_4 = arith.constant 0 : index
    %c0_5 = arith.constant 0 : index
    %5 = vector.load %arg3[%c0_4, %c0_5] : memref<128x128xbf16, #tpu.memory_space<vmem>>, vector<128x128xbf16>
    %cst = arith.constant dense<0.000000e+00> : vector<256x128xf32>
    %6 = tpu.matmul %4, %5, %cst {dimension_numbers = #tpu.dot_dimension_numbers<[1], [0], [0], [1], [0, 0, 1, 1], [], []>} : vector<256x128xbf16>, vector<128x128xbf16>, vector<256x128xf32> -> vector<256x128xf32>
    %7 = arith.addf %3, %6 : vector<256x128xf32>
    %c0_6 = arith.constant 0 : index
    %c0_7 = arith.constant 0 : index
    %8 = vector.load %arg5[%c0_6, %c0_7] : memref<256x128xf32, #tpu.memory_space<vmem>>, vector<256x128xf32>
    tpu.vector_store %arg5[%c0_6, %c0_7], %7 {strides = array<i32>} : memref<256x128xf32, #tpu.memory_space<vmem>>, vector<256x128xf32>,
    %c0_i32_8 = arith.constant 0 : i32
    %9 = arith.cmpi eq, %arg1, %c0_i32_8 : i32
    %10 = arith.extui %9 : i1 to i32
    %c0_i32_9 = arith.constant 0 : i32
    %11 = arith.cmpi ne, %10, %c0_i32_9 : i32
    scf.if %11 {
      %c0_10 = arith.constant 0 : index
      %c0_11 = arith.constant 0 : index
      %12 = vector.load %arg5[%c0_10, %c0_11] : memref<256x128xf32, #tpu.memory_space<vmem>>, vector<256x128xf32>
      %13 = arith.truncf %12 : vector<256x128xf32> to vector<256x128xbf16>
      %c0_12 = arith.constant 0 : index
      %c0_13 = arith.constant 0 : index
      %14 = vector.load %arg4[%c0_12, %c0_13] : memref<256x128xbf16, #tpu.memory_space<vmem>>, vector<256x128xbf16>
      tpu.vector_store %arg4[%c0_12, %c0_13], %13 {strides = array<i32>} : memref<256x128xbf16, #tpu.memory_space<vmem>>, vector<256x128xbf16>,
    } else {
    }
    return
  }
  func.func @transform_0(%arg0: i32, %arg1: i32) -> (i32, i32) {
    %c0_i32 = arith.constant 0 : i32
    return %arg0, %arg1 : i32, i32
  }
  func.func @transform_1(%arg0: i32, %arg1: i32) -> (i32, i32) {
    %c0_i32 = arith.constant 0 : i32
    %c0_i32_0 = arith.constant 0 : i32
    return %arg1, %c0_i32 : i32, i32
  }
  func.func @transform_2(%arg0: i32, %arg1: i32) -> (i32, i32) {
    %c0_i32 = arith.constant 0 : i32
    %c0_i32_0 = arith.constant 0 : i32
    return %arg0, %c0_i32 : i32, i32
  }
}

module attributes {stable_mosaic.version = 11 : i64} {
  func.func @aggregate_epilogue_kernel(%arg0: i32, %arg1: i32, %arg2: memref<256x512xbf16, #tpu.memory_space<vmem>>, %arg3: memref<512x128xbf16, #tpu.memory_space<vmem>>, %arg4: memref<1x128xf32, #tpu.memory_space<vmem>>, %arg5: memref<128x128xbf16, #tpu.memory_space<vmem>>, %arg6: memref<1x128xf32, #tpu.memory_space<vmem>>, %arg7: memref<256x128xf32, #tpu.memory_space<vmem>>, %arg8: memref<256x128xf32, #tpu.memory_space<vmem>>) attributes {dimension_semantics = [#tpu.dimension_semantics<parallel>, #tpu.dimension_semantics<arbitrary>], iteration_bounds = array<i64: 2, 1>, scalar_prefetch = 0 : i64, scratch_operands = 1 : i64, tpu.core_type = #tpu.core_type<tc>, window_params = [{transform_indices = @transform_0, window_bounds = array<i64: 256, 512>}, {pipeline_mode = #tpu.pipeline_mode<synchronous>, transform_indices = @transform_1, window_bounds = array<i64: 512, 128>}, {pipeline_mode = #tpu.pipeline_mode<synchronous>, transform_indices = @transform_2, window_bounds = array<i64: 1, 128>}, {pipeline_mode = #tpu.pipeline_mode<synchronous>, transform_indices = @transform_3, window_bounds = array<i64: 128, 128>}, {pipeline_mode = #tpu.pipeline_mode<synchronous>, transform_indices = @transform_4, window_bounds = array<i64: 1, 128>}, {transform_indices = @transform_5, window_bounds = array<i64: 256, 128>}]} {
    %c0_i32 = arith.constant 0 : i32
    %0 = arith.cmpi eq, %arg1, %c0_i32 : i32
    %1 = arith.extui %0 : i1 to i32
    %c0_i32_0 = arith.constant 0 : i32
    %2 = arith.cmpi ne, %1, %c0_i32_0 : i32
    scf.if %2 {
      %cst_9 = arith.constant 0.000000e+00 : f32
      %15 = vector.broadcast %cst_9 : f32 to vector<256x128xf32>
      %c0_10 = arith.constant 0 : index
      %c0_11 = arith.constant 0 : index
      %16 = vector.load %arg8[%c0_10, %c0_11] : memref<256x128xf32, #tpu.memory_space<vmem>>, vector<256x128xf32>
      tpu.vector_store %arg8[%c0_10, %c0_11], %15 {strides = array<i32>} : memref<256x128xf32, #tpu.memory_space<vmem>>, vector<256x128xf32>,
    } else {
    }
    %c512_i32 = arith.constant 512 : i32
    %3 = arith.muli %arg1, %c512_i32 : i32
    %4 = tpu.assume_multiple %3, 128 : i32
    %5 = arith.index_cast %4 : i32 to index
    %c0 = arith.constant 0 : index
    %6 = vector.load %arg3[%5, %c0] : memref<512x128xbf16, #tpu.memory_space<vmem>>, vector<512x128xbf16>
    %c0_1 = arith.constant 0 : index
    %c0_2 = arith.constant 0 : index
    %7 = vector.load %arg8[%c0_1, %c0_2] : memref<256x128xf32, #tpu.memory_space<vmem>>, vector<256x128xf32>
    %c0_3 = arith.constant 0 : index
    %c0_4 = arith.constant 0 : index
    %8 = vector.load %arg2[%c0_3, %c0_4] : memref<256x512xbf16, #tpu.memory_space<vmem>>, vector<256x512xbf16>
    %cst = arith.constant dense<0.000000e+00> : vector<256x128xf32>
    %9 = tpu.matmul %8, %6, %cst {dimension_numbers = #tpu.dot_dimension_numbers<[1], [0], [0], [1], [0, 0, 1, 1], [], []>} : vector<256x512xbf16>, vector<512x128xbf16>, vector<256x128xf32> -> vector<256x128xf32>
    %10 = arith.addf %7, %9 : vector<256x128xf32>
    %c0_5 = arith.constant 0 : index
    %c0_6 = arith.constant 0 : index
    %11 = vector.load %arg8[%c0_5, %c0_6] : memref<256x128xf32, #tpu.memory_space<vmem>>, vector<256x128xf32>
    tpu.vector_store %arg8[%c0_5, %c0_6], %10 {strides = array<i32>} : memref<256x128xf32, #tpu.memory_space<vmem>>, vector<256x128xf32>,
    %c0_i32_7 = arith.constant 0 : i32
    %12 = arith.cmpi eq, %arg1, %c0_i32_7 : i32
    %13 = arith.extui %12 : i1 to i32
    %c0_i32_8 = arith.constant 0 : i32
    %14 = arith.cmpi ne, %13, %c0_i32_8 : i32
    scf.if %14 {
      %c0_9 = arith.constant 0 : index
      %c0_10 = arith.constant 0 : index
      %15 = vector.load %arg8[%c0_9, %c0_10] : memref<256x128xf32, #tpu.memory_space<vmem>>, vector<256x128xf32>
      %c0_11 = arith.constant 0 : index
      %c0_12 = arith.constant 0 : index
      %16 = vector.load %arg4[%c0_11, %c0_12] : memref<1x128xf32, #tpu.memory_space<vmem>>, vector<1x128xf32>
      %17 = vector.broadcast %16 : vector<1x128xf32> to vector<256x128xf32>
      %18 = arith.addf %15, %17 : vector<256x128xf32>
      %19 = arith.truncf %18 : vector<256x128xf32> to vector<256x128xbf16>
      %c0_13 = arith.constant 0 : index
      %c0_14 = arith.constant 0 : index
      %20 = vector.load %arg5[%c0_13, %c0_14] : memref<128x128xbf16, #tpu.memory_space<vmem>>, vector<128x128xbf16>
      %cst_15 = arith.constant dense<0.000000e+00> : vector<256x128xf32>
      %21 = tpu.matmul %19, %20, %cst_15 {dimension_numbers = #tpu.dot_dimension_numbers<[1], [0], [0], [1], [0, 0, 1, 1], [], []>} : vector<256x128xbf16>, vector<128x128xbf16>, vector<256x128xf32> -> vector<256x128xf32>
      %c0_16 = arith.constant 0 : index
      %c0_17 = arith.constant 0 : index
      %22 = vector.load %arg6[%c0_16, %c0_17] : memref<1x128xf32, #tpu.memory_space<vmem>>, vector<1x128xf32>
      %23 = vector.broadcast %22 : vector<1x128xf32> to vector<256x128xf32>
      %24 = arith.addf %21, %23 : vector<256x128xf32>
      %c0_18 = arith.constant 0 : index
      %c0_19 = arith.constant 0 : index
      %25 = vector.load %arg7[%c0_18, %c0_19] : memref<256x128xf32, #tpu.memory_space<vmem>>, vector<256x128xf32>
      tpu.vector_store %arg7[%c0_18, %c0_19], %24 {strides = array<i32>} : memref<256x128xf32, #tpu.memory_space<vmem>>, vector<256x128xf32>,
    } else {
    }
    return
  }
  func.func @transform_0(%arg0: i32, %arg1: i32) -> (i32, i32) {
    %c0_i32 = arith.constant 0 : i32
    return %arg0, %arg1 : i32, i32
  }
  func.func @transform_1(%arg0: i32, %arg1: i32) -> (i32, i32) {
    %c0_i32 = arith.constant 0 : i32
    %c0_i32_0 = arith.constant 0 : i32
    %c0_i32_1 = arith.constant 0 : i32
    return %c0_i32, %c0_i32_0 : i32, i32
  }
  func.func @transform_2(%arg0: i32, %arg1: i32) -> (i32, i32) {
    %c0_i32 = arith.constant 0 : i32
    %c0_i32_0 = arith.constant 0 : i32
    %c0_i32_1 = arith.constant 0 : i32
    return %c0_i32, %c0_i32_0 : i32, i32
  }
  func.func @transform_3(%arg0: i32, %arg1: i32) -> (i32, i32) {
    %c0_i32 = arith.constant 0 : i32
    %c0_i32_0 = arith.constant 0 : i32
    %c0_i32_1 = arith.constant 0 : i32
    return %c0_i32, %c0_i32_0 : i32, i32
  }
  func.func @transform_4(%arg0: i32, %arg1: i32) -> (i32, i32) {
    %c0_i32 = arith.constant 0 : i32
    %c0_i32_0 = arith.constant 0 : i32
    %c0_i32_1 = arith.constant 0 : i32
    return %c0_i32, %c0_i32_0 : i32, i32
  }
  func.func @transform_5(%arg0: i32, %arg1: i32) -> (i32, i32) {
    %c0_i32 = arith.constant 0 : i32
    %c0_i32_0 = arith.constant 0 : i32
    return %arg0, %c0_i32 : i32, i32
  }
}

module attributes {stable_mosaic.version = 11 : i64} {
  func.func @aggregate_epilogue_kernel(%arg0: i32, %arg1: i32, %arg2: memref<256x512xbf16, #tpu.memory_space<vmem>>, %arg3: memref<512x128xbf16, #tpu.memory_space<vmem>>, %arg4: memref<1x128xf32, #tpu.memory_space<vmem>>, %arg5: memref<128x128xbf16, #tpu.memory_space<vmem>>, %arg6: memref<1x128xf32, #tpu.memory_space<vmem>>, %arg7: memref<256x128xbf16, #tpu.memory_space<vmem>>, %arg8: memref<256x128xf32, #tpu.memory_space<vmem>>) attributes {dimension_semantics = [#tpu.dimension_semantics<parallel>, #tpu.dimension_semantics<arbitrary>], iteration_bounds = array<i64: 2, 1>, scalar_prefetch = 0 : i64, scratch_operands = 1 : i64, tpu.core_type = #tpu.core_type<tc>, window_params = [{transform_indices = @transform_0, window_bounds = array<i64: 256, 512>}, {pipeline_mode = #tpu.pipeline_mode<synchronous>, transform_indices = @transform_1, window_bounds = array<i64: 512, 128>}, {pipeline_mode = #tpu.pipeline_mode<synchronous>, transform_indices = @transform_2, window_bounds = array<i64: 1, 128>}, {pipeline_mode = #tpu.pipeline_mode<synchronous>, transform_indices = @transform_3, window_bounds = array<i64: 128, 128>}, {pipeline_mode = #tpu.pipeline_mode<synchronous>, transform_indices = @transform_4, window_bounds = array<i64: 1, 128>}, {transform_indices = @transform_5, window_bounds = array<i64: 256, 128>}]} {
    %c0_i32 = arith.constant 0 : i32
    %0 = arith.cmpi eq, %arg1, %c0_i32 : i32
    %1 = arith.extui %0 : i1 to i32
    %c0_i32_0 = arith.constant 0 : i32
    %2 = arith.cmpi ne, %1, %c0_i32_0 : i32
    scf.if %2 {
      %cst_9 = arith.constant 0.000000e+00 : f32
      %15 = vector.broadcast %cst_9 : f32 to vector<256x128xf32>
      %c0_10 = arith.constant 0 : index
      %c0_11 = arith.constant 0 : index
      %16 = vector.load %arg8[%c0_10, %c0_11] : memref<256x128xf32, #tpu.memory_space<vmem>>, vector<256x128xf32>
      tpu.vector_store %arg8[%c0_10, %c0_11], %15 {strides = array<i32>} : memref<256x128xf32, #tpu.memory_space<vmem>>, vector<256x128xf32>,
    } else {
    }
    %c512_i32 = arith.constant 512 : i32
    %3 = arith.muli %arg1, %c512_i32 : i32
    %4 = tpu.assume_multiple %3, 128 : i32
    %5 = arith.index_cast %4 : i32 to index
    %c0 = arith.constant 0 : index
    %6 = vector.load %arg3[%5, %c0] : memref<512x128xbf16, #tpu.memory_space<vmem>>, vector<512x128xbf16>
    %c0_1 = arith.constant 0 : index
    %c0_2 = arith.constant 0 : index
    %7 = vector.load %arg8[%c0_1, %c0_2] : memref<256x128xf32, #tpu.memory_space<vmem>>, vector<256x128xf32>
    %c0_3 = arith.constant 0 : index
    %c0_4 = arith.constant 0 : index
    %8 = vector.load %arg2[%c0_3, %c0_4] : memref<256x512xbf16, #tpu.memory_space<vmem>>, vector<256x512xbf16>
    %cst = arith.constant dense<0.000000e+00> : vector<256x128xf32>
    %9 = tpu.matmul %8, %6, %cst {dimension_numbers = #tpu.dot_dimension_numbers<[1], [0], [0], [1], [0, 0, 1, 1], [], []>} : vector<256x512xbf16>, vector<512x128xbf16>, vector<256x128xf32> -> vector<256x128xf32>
    %10 = arith.addf %7, %9 : vector<256x128xf32>
    %c0_5 = arith.constant 0 : index
    %c0_6 = arith.constant 0 : index
    %11 = vector.load %arg8[%c0_5, %c0_6] : memref<256x128xf32, #tpu.memory_space<vmem>>, vector<256x128xf32>
    tpu.vector_store %arg8[%c0_5, %c0_6], %10 {strides = array<i32>} : memref<256x128xf32, #tpu.memory_space<vmem>>, vector<256x128xf32>,
    %c0_i32_7 = arith.constant 0 : i32
    %12 = arith.cmpi eq, %arg1, %c0_i32_7 : i32
    %13 = arith.extui %12 : i1 to i32
    %c0_i32_8 = arith.constant 0 : i32
    %14 = arith.cmpi ne, %13, %c0_i32_8 : i32
    scf.if %14 {
      %c0_9 = arith.constant 0 : index
      %c0_10 = arith.constant 0 : index
      %15 = vector.load %arg8[%c0_9, %c0_10] : memref<256x128xf32, #tpu.memory_space<vmem>>, vector<256x128xf32>
      %c0_11 = arith.constant 0 : index
      %c0_12 = arith.constant 0 : index
      %16 = vector.load %arg4[%c0_11, %c0_12] : memref<1x128xf32, #tpu.memory_space<vmem>>, vector<1x128xf32>
      %17 = vector.broadcast %16 : vector<1x128xf32> to vector<256x128xf32>
      %18 = arith.addf %15, %17 : vector<256x128xf32>
      %cst_13 = arith.constant 0.000000e+00 : f32
      %19 = vector.broadcast %cst_13 : f32 to vector<256x128xf32>
      %20 = arith.maximumf %18, %19 : vector<256x128xf32>
      %21 = arith.truncf %20 : vector<256x128xf32> to vector<256x128xbf16>
      %c0_14 = arith.constant 0 : index
      %c0_15 = arith.constant 0 : index
      %22 = vector.load %arg5[%c0_14, %c0_15] : memref<128x128xbf16, #tpu.memory_space<vmem>>, vector<128x128xbf16>
      %cst_16 = arith.constant dense<0.000000e+00> : vector<256x128xf32>
      %23 = tpu.matmul %21, %22, %cst_16 {dimension_numbers = #tpu.dot_dimension_numbers<[1], [0], [0], [1], [0, 0, 1, 1], [], []>} : vector<256x128xbf16>, vector<128x128xbf16>, vector<256x128xf32> -> vector<256x128xf32>
      %c0_17 = arith.constant 0 : index
      %c0_18 = arith.constant 0 : index
      %24 = vector.load %arg6[%c0_17, %c0_18] : memref<1x128xf32, #tpu.memory_space<vmem>>, vector<1x128xf32>
      %25 = vector.broadcast %24 : vector<1x128xf32> to vector<256x128xf32>
      %26 = arith.addf %23, %25 : vector<256x128xf32>
      %27 = arith.truncf %26 : vector<256x128xf32> to vector<256x128xbf16>
      %c0_19 = arith.constant 0 : index
      %c0_20 = arith.constant 0 : index
      %28 = vector.load %arg7[%c0_19, %c0_20] : memref<256x128xbf16, #tpu.memory_space<vmem>>, vector<256x128xbf16>
      tpu.vector_store %arg7[%c0_19, %c0_20], %27 {strides = array<i32>} : memref<256x128xbf16, #tpu.memory_space<vmem>>, vector<256x128xbf16>,
    } else {
    }
    return
  }
  func.func @transform_0(%arg0: i32, %arg1: i32) -> (i32, i32) {
    %c0_i32 = arith.constant 0 : i32
    return %arg0, %arg1 : i32, i32
  }
  func.func @transform_1(%arg0: i32, %arg1: i32) -> (i32, i32) {
    %c0_i32 = arith.constant 0 : i32
    %c0_i32_0 = arith.constant 0 : i32
    %c0_i32_1 = arith.constant 0 : i32
    return %c0_i32, %c0_i32_0 : i32, i32
  }
  func.func @transform_2(%arg0: i32, %arg1: i32) -> (i32, i32) {
    %c0_i32 = arith.constant 0 : i32
    %c0_i32_0 = arith.constant 0 : i32
    %c0_i32_1 = arith.constant 0 : i32
    return %c0_i32, %c0_i32_0 : i32, i32
  }
  func.func @transform_3(%arg0: i32, %arg1: i32) -> (i32, i32) {
    %c0_i32 = arith.constant 0 : i32
    %c0_i32_0 = arith.constant 0 : i32
    %c0_i32_1 = arith.constant 0 : i32
    return %c0_i32, %c0_i32_0 : i32, i32
  }
  func.func @transform_4(%arg0: i32, %arg1: i32) -> (i32, i32) {
    %c0_i32 = arith.constant 0 : i32
    %c0_i32_0 = arith.constant 0 : i32
    %c0_i32_1 = arith.constant 0 : i32
    return %c0_i32, %c0_i32_0 : i32, i32
  }
  func.func @transform_5(%arg0: i32, %arg1: i32) -> (i32, i32) {
    %c0_i32 = arith.constant 0 : i32
    %c0_i32_0 = arith.constant 0 : i32
    return %arg0, %c0_i32 : i32, i32
  }
}

</mosaic_0001>

<bundles_post_ra>
// kernel: gcn_encoder_forward.3
= control target key start
LH: loop header
LB: loop body
LE: loop exit
PB: predicated region body
PF: predicated region fallthrough
CT: control target
= control target key end

     0   :  { %s1101_s9 = smov 0   ;;  %s1103_s10 = smov 0   ;;  %s1204_s0 = inlined_call_operand.vmem [shape: bf16[512,128], index: 0, kind: input, shape index: {}]   ;;  %s1205_s1 = inlined_call_operand.vmem [shape: bf16[128,128], index: 1, kind: input, shape index: {}]   ;;  %s1206_s2 = inlined_call_operand.vmem [shape: bf16[512,128], index: 2, kind: output, shape index: {}]  }
   0x1   :  { %s1105_s11 = smov 0  }
   0x2 LB: > { %s24_s12 = sadd.s32 1, %s1080_s10  ;;  %p792_p0 = scmp.ge.s32.totalorder %s1084_s11, 1  ;;  %s1084_s11 = sphi %s1105_s11, %s12_s11   ;;  %s1080_s10 = sphi %s1103_s10, %s1208_s10   ;;  %s1076_s9 = sphi %s1101_s9, %s1207_s9  }
   0x3   : > { %p26_p1 = scmp.ge.s32.totalorder %s24_s12, 2  ;;  %p141_p2 = scmp.lt.s32.totalorder %s1084_s11, 3 }
   0x5   : > { %s1210_s12 = smov (%p26_p1, %s24_s12), 0  ;;  %p142_p3 = pnand %p792_p0, %p141_p2 }
   0x6   : > { %s793_s21 = sshll.u32 (!%p142_p3), %s1076_s9, 5 }
   0x7   : > { %145 = sbr.rel (%p142_p3) target bundleno = 237 (0xed), region = 28  ;;  %p172_p4 = scmp.lt.s32.totalorder (!%p142_p3), %s793_s21, 63 }
   0xc   : > { %v918_v0 = vld [vmem:[%s1205_s1 + $0x38] sm:$0xff]  ;;  %v917_v1 = vld [vmem:[%s1205_s1 + $0x30] sm:$0xff]  ;;  %v916_v2 = vld [vmem:[%s1205_s1 + $0x28] sm:$0xff]  ;;  %s1212_s21 = smov (!%p172_p4, %s793_s21), 63 }
   0xd   : > { %452 = vmatpush.bf16.msra.mxu0 %v918_v0  ;;  %1014 = vmatpush.bf16.msra.mxu1 %v918_v0  ;;  %v915_v3 = vld [vmem:[%s1205_s1 + $0x20] sm:$0xff]  ;;  %v914_v4 = vld [vmem:[%s1205_s1 + $0x18] sm:$0xff]  ;;  %v913_v5 = vld [vmem:[%s1205_s1 + $0x10] sm:$0xff]  ;;  %s794_s28 = sshll.u32 %s1212_s21, 2 }
   0xe   : > { %1015 = vmatpush.bf16.msra.mxu2 %v918_v0  ;;  %1016 = vmatpush.bf16.msra.mxu3 %v918_v0  ;;  %v912_v6 = vld [vmem:[%s1205_s1 + $0x8] sm:$0xff]  ;;  %v911_v7 = vld [vmem:[%s1205_s1] sm:$0xff]  ;;  %s1154_s5 = scalar_lea.vmem %s1204_s0, %s794_s28  ;;  %s1177_s8 = scalar_lea.vmem %s1206_s2, %s794_s28 }
   0xf   : > { %v895_v8 = vld [vmem:[%s1154_s5] sm:$0xff]  ;;  %v896_v12 = vld [vmem:[%s1154_s5 + $0x8] sm:$0xff]  ;;  %v897_v16 = vld [vmem:[%s1154_s5 + $0x10] sm:$0xff] }
  0x10   : > { %v899_v9 = vld [vmem:[%s1154_s5 + $0x20] sm:$0xff]  ;;  %v900_v13 = vld [vmem:[%s1154_s5 + $0x28] sm:$0xff]  ;;  %v901_v17 = vld [vmem:[%s1154_s5 + $0x30] sm:$0xff] }
  0x11   : > { %453 = vmatpush.bf16.msra.mxu0 %v917_v1  ;;  %1017 = vmatpush.bf16.msra.mxu1 %v917_v1  ;;  %v903_v10 = vld [vmem:[%s1154_s5 + $0x40] sm:$0xff]  ;;  %v904_v14 = vld [vmem:[%s1154_s5 + $0x48] sm:$0xff]  ;;  %v905_v18 = vld [vmem:[%s1154_s5 + $0x50] sm:$0xff] }
  0x12   : > { %1018 = vmatpush.bf16.msra.mxu2 %v917_v1  ;;  %1019 = vmatpush.bf16.msra.mxu3 %v917_v1  ;;  %v907_v11 = vld [vmem:[%s1154_s5 + $0x60] sm:$0xff]  ;;  %v908_v15 = vld [vmem:[%s1154_s5 + $0x68] sm:$0xff]  ;;  %v909_v19 = vld [vmem:[%s1154_s5 + $0x70] sm:$0xff] }
  0x13   : > { %v898_v20 = vld [vmem:[%s1154_s5 + $0x18] sm:$0xff] }
  0x14   : > { %v902_v21 = vld [vmem:[%s1154_s5 + $0x38] sm:$0xff] }
  0x15   : > { %454 = vmatpush.bf16.msra.mxu0 %v916_v2  ;;  %1020 = vmatpush.bf16.msra.mxu1 %v916_v2  ;;  %v906_v22 = vld [vmem:[%s1154_s5 + $0x58] sm:$0xff] }
  0x16   : > { %1021 = vmatpush.bf16.msra.mxu2 %v916_v2  ;;  %1022 = vmatpush.bf16.msra.mxu3 %v916_v2  ;;  %v910_v23 = vld [vmem:[%s1154_s5 + $0x78] sm:$0xff] }
  0x19   : > { %455 = vmatpush.bf16.msra.mxu0 %v915_v3  ;;  %1023 = vmatpush.bf16.msra.mxu1 %v915_v3 }
  0x1a   : > { %1024 = vmatpush.bf16.msra.mxu2 %v915_v3  ;;  %1025 = vmatpush.bf16.msra.mxu3 %v915_v3 }
  0x1d   : > { %456 = vmatpush.bf16.msra.mxu0 %v914_v4  ;;  %1026 = vmatpush.bf16.msra.mxu1 %v914_v4 }
  0x1e   : > { %1027 = vmatpush.bf16.msra.mxu2 %v914_v4  ;;  %1028 = vmatpush.bf16.msra.mxu3 %v914_v4 }
  0x21   : > { %457 = vmatpush.bf16.msra.mxu0 %v913_v5  ;;  %1029 = vmatpush.bf16.msra.mxu1 %v913_v5 }
  0x22   : > { %1030 = vmatpush.bf16.msra.mxu2 %v913_v5  ;;  %1031 = vmatpush.bf16.msra.mxu3 %v913_v5 }
  0x25   : > { %458 = vmatpush.bf16.msra.mxu0 %v912_v6  ;;  %1032 = vmatpush.bf16.msra.mxu1 %v912_v6 }
  0x26   : > { %1033 = vmatpush.bf16.msra.mxu2 %v912_v6  ;;  %1034 = vmatpush.bf16.msra.mxu3 %v912_v6 }
  0x29   : > { %459 = vmatpush.bf16.msra.mxu0 %v911_v7  ;;  %1035 = vmatpush.bf16.msra.mxu1 %v911_v7 }
  0x2a   : > { %1036 = vmatpush.bf16.msra.mxu2 %v911_v7  ;;  %1037 = vmatpush.bf16.msra.mxu3 %v911_v7 }
  0x2c   : > { %460 = vmatmul.bf16.vlgmr.msra.gmra.mxu0 %v895_v8  ;;  %480 = vmatmul.bf16.vlgmr.msra.gmra.mxu1 %v899_v9 }
  0x2d   : > { %500 = vmatmul.bf16.vlgmr.msra.gmra.mxu2 %v903_v10  ;;  %520 = vmatmul.bf16.vlgmr.msra.gmra.mxu3 %v907_v11 }
  0x3c   : > { %465 = vmatmul.bf16.gmra.mxu0 %v896_v12  ;;  %485 = vmatmul.bf16.gmra.mxu1 %v900_v13 }
  0x3d   : > { %505 = vmatmul.bf16.gmra.mxu2 %v904_v14  ;;  %525 = vmatmul.bf16.gmra.mxu3 %v908_v15 }
  0x4c   : > { %470 = vmatmul.bf16.gmra.mxu0 %v897_v16  ;;  %490 = vmatmul.bf16.gmra.mxu1 %v901_v17 }
  0x4d   : > { %510 = vmatmul.bf16.gmra.mxu2 %v905_v18  ;;  %530 = vmatmul.bf16.gmra.mxu3 %v909_v19 }
  0x5c   : > { %475 = vmatmul.bf16.gmra.mxu0 %v898_v20  ;;  %495 = vmatmul.bf16.gmra.mxu1 %v902_v21 }
  0x5d   : > { %515 = vmatmul.bf16.gmra.mxu2 %v906_v22  ;;  %535 = vmatmul.bf16.gmra.mxu3 %v910_v23 }
  0xa9   : > { %v461_v24 = vpop.f32.mrf.mxu0  ;;  %v481_v25 = vpop.f32.mrf.mxu1 }
  0xb0   : > { %v501_v26 = vpop.f32.mrf.mxu2  ;;  %v521_v27 = vpop.f32.mrf.mxu3 }
  0xb1   : > { %v463_v28 = vpop.f32.mrf.mxu0  ;;  %v483_v29 = vpop.f32.mrf.mxu1 }
  0xb2   : > { %v922_v30 = vpack.c.bf16 %v463_v28, %v461_v24  ;;  %v942_v31 = vpack.c.bf16 %v483_v29, %v481_v25 }
  0xb4   : > { %923 = vst [vmem:[%s1177_s8] sm:$0xff] %v922_v30  }
  0xb5   : > { %1002 = vst [vmem:[%s1177_s8 + $0x20] sm:$0xff] %v942_v31  }
  0xb8   : > { %v503_v32 = vpop.f32.mrf.mxu2  ;;  %v523_v33 = vpop.f32.mrf.mxu3 }
  0xb9   : > { %v962_v34 = vpack.c.bf16 %v503_v32, %v501_v26  ;;  %v982_v35 = vpack.c.bf16 %v523_v33, %v521_v27  ;;  %v466_v36 = vpop.f32.mrf.mxu0  ;;  %v486_v37 = vpop.f32.mrf.mxu1 }
  0xbb   : > { %1006 = vst [vmem:[%s1177_s8 + $0x40] sm:$0xff] %v962_v34  }
  0xbc   : > { %1010 = vst [vmem:[%s1177_s8 + $0x60] sm:$0xff] %v982_v35  }
  0xc0   : > { %v506_v38 = vpop.f32.mrf.mxu2  ;;  %v526_v39 = vpop.f32.mrf.mxu3 }
  0xc1   : > { %v468_v40 = vpop.f32.mrf.mxu0  ;;  %v488_v41 = vpop.f32.mrf.mxu1 }
  0xc2   : > { %v927_v42 = vpack.c.bf16 %v468_v40, %v466_v36  ;;  %v947_v43 = vpack.c.bf16 %v488_v41, %v486_v37 }
  0xc4   : > { %999 = vst [vmem:[%s1177_s8 + $0x8] sm:$0xff] %v927_v42  }
  0xc5   : > { %1003 = vst [vmem:[%s1177_s8 + $0x28] sm:$0xff] %v947_v43  }
  0xc8   : > { %v508_v44 = vpop.f32.mrf.mxu2  ;;  %v528_v45 = vpop.f32.mrf.mxu3 }
  0xc9   : > { %v967_v46 = vpack.c.bf16 %v508_v44, %v506_v38  ;;  %v987_v47 = vpack.c.bf16 %v528_v45, %v526_v39  ;;  %v471_v48 = vpop.f32.mrf.mxu0  ;;  %v491_v49 = vpop.f32.mrf.mxu1 }
  0xcb   : > { %1007 = vst [vmem:[%s1177_s8 + $0x48] sm:$0xff] %v967_v46  }
  0xcc   : > { %1011 = vst [vmem:[%s1177_s8 + $0x68] sm:$0xff] %v987_v47  }
  0xd0   : > { %v511_v50 = vpop.f32.mrf.mxu2  ;;  %v531_v51 = vpop.f32.mrf.mxu3 }
  0xd1   : > { %v473_v52 = vpop.f32.mrf.mxu0  ;;  %v493_v53 = vpop.f32.mrf.mxu1 }
  0xd2   : > { %v932_v54 = vpack.c.bf16 %v473_v52, %v471_v48  ;;  %v952_v55 = vpack.c.bf16 %v493_v53, %v491_v49 }
  0xd4   : > { %1000 = vst [vmem:[%s1177_s8 + $0x10] sm:$0xff] %v932_v54  }
  0xd5   : > { %1004 = vst [vmem:[%s1177_s8 + $0x30] sm:$0xff] %v952_v55  }
  0xd8   : > { %v513_v56 = vpop.f32.mrf.mxu2  ;;  %v533_v57 = vpop.f32.mrf.mxu3 }
  0xd9   : > { %v972_v58 = vpack.c.bf16 %v513_v56, %v511_v50  ;;  %v992_v59 = vpack.c.bf16 %v533_v57, %v531_v51  ;;  %v476_v60 = vpop.f32.mrf.mxu0  ;;  %v496_v61 = vpop.f32.mrf.mxu1 }
  0xdb   : > { %1008 = vst [vmem:[%s1177_s8 + $0x50] sm:$0xff] %v972_v58  }
  0xdc   : > { %1012 = vst [vmem:[%s1177_s8 + $0x70] sm:$0xff] %v992_v59  }
  0xe0   : > { %v516_v62 = vpop.f32.mrf.mxu2  ;;  %v536_v63 = vpop.f32.mrf.mxu3 }
  0xe1   : > { %v478_v0 = vpop.f32.mrf.mxu0  ;;  %v498_v1 = vpop.f32.mrf.mxu1 }
  0xe2   : > { %v937_v2 = vpack.c.bf16 %v478_v0, %v476_v60  ;;  %v957_v3 = vpack.c.bf16 %v498_v1, %v496_v61 }
  0xe4   : > { %1001 = vst [vmem:[%s1177_s8 + $0x18] sm:$0xff] %v937_v2  }
  0xe5   : > { %1005 = vst [vmem:[%s1177_s8 + $0x38] sm:$0xff] %v957_v3  }
  0xe8   : > { %v518_v4 = vpop.f32.mrf.mxu2  ;;  %v538_v5 = vpop.f32.mrf.mxu3 }
  0xe9   : > { %v977_v6 = vpack.c.bf16 %v518_v4, %v516_v62  ;;  %v997_v7 = vpack.c.bf16 %v538_v5, %v536_v63 }
  0xeb   : > { %1009 = vst [vmem:[%s1177_s8 + $0x58] sm:$0xff] %v977_v6  }
  0xec   : > { %1013 = vst [vmem:[%s1177_s8 + $0x78] sm:$0xff] %v997_v7  }
  0xed PF: > { %s12_s11 = sadd.s32 1, %s1084_s11   ;;  %s1207_s9 = smov %s1080_s10 }
  0xee   : > { %p9_p5 = scmp.ge.s32.totalorder %s12_s11, 4   ;;  %s1208_s10 = smov %s1210_s12 }
  0xf0   :  { %11 = sbr.rel (!%p9_p5) target bundleno = 2 (0x2), region = 69 }

// kernel: gcn_encoder_forward.5
= control target key start
LH: loop header
LB: loop body
LE: loop exit
PB: predicated region body
PF: predicated region fallthrough
CT: control target
= control target key end

     0   :  { %10 = vsyncpa [#allocation4], 0  ;;  %s3007_s0 = inlined_call_operand.hbm [shape: bf16[512,512], index: 0, kind: input, shape index: {}]   ;;  %s3008_s1 = inlined_call_operand.vmem [shape: bf16[512,128], index: 1, kind: input, shape index: {}]   ;;  %s3009_s2 = inlined_call_operand.vmem [shape: f32[1,128], index: 2, kind: input, shape index: {}]   ;;  %s3010_s3 = inlined_call_operand.vmem [shape: bf16[128,128], index: 3, kind: input, shape index: {}]   ;;  %s3011_s4 = inlined_call_operand.vmem [shape: f32[1,128], index: 4, kind: input, shape index: {}]   ;;  %s3012_s5 = inlined_call_operand.vmem [shape: f32[512,128], index: 5, kind: output, shape index: {}]  }
   0x1   :  { %12 = vsyncpa [#allocation4 + $0x1], 0  ;;  %s2490_s18 = smov 0   ;;  %s2492_s19 = smov 0  }
   0x2   :  { %s2494_s20 = smov 0   ;;  %s2496_s21 = smov 0  }
   0x3   :  { %s2498_s22 = smov 0   ;;  %s2500_s23 = smov 0  }
   0x4 LB: > { %s1757_s24 = sadd.s32 4294967295, %s2456_s23   ;;  %s30_s25 = sadd.s32 1, %s2452_s22  ;;  %s2456_s23 = sphi %s2500_s23, %s18_s23   ;;  %s2452_s22 = sphi %s2498_s22, %s3019_s22   ;;  %s2448_s21 = sphi %s2496_s21, %s3018_s21   ;;  %s2444_s20 = sphi %s2494_s20, %s3017_s20   ;;  %s2440_s19 = sphi %s2492_s19, %s3016_s19   ;;  %s2436_s18 = sphi %s2490_s18, %s3015_s18  }
   0x5   : > { %p32_p0 = scmp.ge.s32.totalorder %s30_s25, 2  ;;  %s39_s26 = sadd.s32 1, %s2444_s20 }
   0x6   : > { %p46_p1 = scmp.ne.s32.totalorder %s2444_s20, %s2440_s19  ;;  %p47_p2 = scmp.eq.s32.totalorder %s2456_s23, 0 }
   0x7   : > { %s3021_s25 = smov (%p32_p0, %s30_s25), 0  ;;  %p52_p4 = scmp.ne.s32.totalorder %s2440_s19, %s2436_s18 }
   0x8   : > { %p2526_p3 = por %p47_p2, %p46_p1  ;;  %s34_s28 = ssub.s32 %s2452_s22, %s3021_s25 }
   0x9   : > { %p53_p5 = scmp.eq.s32.totalorder %s1757_s24, 0  ;;  %p37_p6 = scmp.eq.s32.totalorder %s34_s28, 0 }
   0xa   : > { %p2323_p8 = scmp.lt.s32.totalorder %s2456_s23, 2  ;;  %s198_s6 = sand.u32 1, %s2444_s20  }
   0xb   : > { %p2533_p7 = por %p53_p5, %p52_p4  ;;  %s2188_s7 = sshll.u32 %s2452_s22, 9 }
   0xc   : > { %s2539_s30 = scalar_select %p37_p6, %s2444_s20, %s39_s26  }
   0xd   : > { %s1761_s8 = sshll.u32 %s198_s6, 9  ;;  %s210_s11 = scalar_lea.hbm %s3007_s0, %s2188_s7 }
   0xe   : > { %s211_s12 = sshll.u32 %s210_s11, 4  ;;  %s202_s13 = scalar_lea.vmem [#allocation3], %s1761_s8  ;;  %s212_s12 = int_to_ptr.hbm [resolvable:$true] %s211_s12 }
   0xf   : > { %s213_s14 = sshll.u32 %s202_s13, 4  ;;  %p2320_p9 = pnand %p2323_p8, %p2526_p3  ;;  %s214_s14 = int_to_ptr.vmem [resolvable:$true] %s213_s14 }
  0x10   : > { %p1765_p10 = scmp.ge.s32.totalorder %s2456_s23, 1  ;;  %p221_p11 = scmp.lt.s32.totalorder %s2456_s23, 3 }
  0x11   : > { %s199_s15 = scalar_lea.sflag [#allocation4], %s198_s6  ;;  %s2458_s16 = smov 256  }
  0x12   : > { %s2459_s17 = smov 16   ;;  %p222_p12 = pnand %p1765_p10, %p221_p11 }
  0x13   : > { %2322 = dma.hbm_to_vmem [thread:$0]  (!%p2320_p9), %s212_s12, 8192, %s214_s14, %s199_s15, %s2458_s16, %s2458_s16, %s2459_s17  }
  0x14   : > { %225 = sbr.rel (%p222_p12) target bundleno = 648 (0x288), region = 40  ;;  %s227_s18 = sand.u32 (!%p222_p12), 1, %s2440_s19  }
  0x15   : > { %s1766_s24 = sshll.u32 (!%p222_p12), %s227_s18, 9  ;;  %s228_s26 = scalar_lea.sflag (!%p222_p12), [#allocation4], %s227_s18 }
  0x16   : > { %s2551_s28 = scalar_lea.vmem (!%p222_p12), [#allocation3], %s1766_s24 }
  0x19   : > { %2431 = dma.done.wait (%p2533_p7), %s228_s26, 8192  }
  0x1a   : > { %2433 = vsyncadd (%p2533_p7), %s228_s26, 4294959104  ;;  %v2196_v0 = vld [vmem:[%s3008_s1 + $0x38] sm:$0xff]  ;;  %v2195_v1 = vld [vmem:[%s3008_s1 + $0x30] sm:$0xff] }
  0x1b   : > { %2293 = vmatpush.bf16.msra.mxu1 %v2196_v0  ;;  %2294 = vmatpush.bf16.msra.mxu2 %v2196_v0  ;;  %v2194_v2 = vld [vmem:[%s3008_s1 + $0x28] sm:$0xff]  ;;  %v2193_v3 = vld [vmem:[%s3008_s1 + $0x20] sm:$0xff]  ;;  %v2192_v4 = vld [vmem:[%s3008_s1 + $0x18] sm:$0xff] }
  0x1c   : > { %2295 = vmatpush.bf16.msra.mxu3 %v2196_v0  ;;  %980 = vmatpush.bf16.msra.mxu0 %v2196_v0  ;;  %v2191_v5 = vld [vmem:[%s3008_s1 + $0x10] sm:$0xff]  ;;  %v2190_v6 = vld [vmem:[%s3008_s1 + $0x8] sm:$0xff]  ;;  %v2189_v7 = vld [vmem:[%s3008_s1] sm:$0xff] }
  0x1d   : > { %v1835_v8 = vld [vmem:[%s2551_s28 + $0x80] sm:$0xf]  ;;  %v2239_v9 = vld [vmem:[%s2551_s28 + $0x8c] sm:$0xf0]  ;;  %v2212_v14 = vld [vmem:[%s3008_s1 + $0xb8] sm:$0xff] }
  0x1e   : > { %v1899_v10 = vld [vmem:[%s2551_s28 + $0x100] sm:$0xf]  ;;  %v2255_v11 = vld [vmem:[%s2551_s28 + $0x10c] sm:$0xf0]  ;;  %v2220_v15 = vld [vmem:[%s3008_s1 + $0xf8] sm:$0xff]  ;;  %v1836_v17 = vor.u32 %v2239_v9, %v1835_v8 }
  0x1f   : > { %2296 = vmatpush.bf16.msra.mxu1 %v2195_v1  ;;  %2297 = vmatpush.bf16.msra.mxu2 %v2195_v1  ;;  %v1963_v12 = vld [vmem:[%s2551_s28 + $0x180] sm:$0xf]  ;;  %v2271_v13 = vld [vmem:[%s2551_s28 + $0x18c] sm:$0xf0]  ;;  %v2204_v16 = vld [vmem:[%s3008_s1 + $0x78] sm:$0xff]  ;;  %v1900_v18 = vor.u32 %v2255_v11, %v1899_v10 }
  0x20   : > { %2298 = vmatpush.bf16.msra.mxu3 %v2195_v1  ;;  %981 = vmatpush.bf16.msra.mxu0 %v2195_v1  ;;  %v1964_v19 = vor.u32 %v2271_v13, %v1963_v12  ;;  %v2211_v20 = vld [vmem:[%s3008_s1 + $0xb0] sm:$0xff]  ;;  %v2210_v23 = vld [vmem:[%s3008_s1 + $0xa8] sm:$0xff]  ;;  %v2209_v26 = vld [vmem:[%s3008_s1 + $0xa0] sm:$0xff] }
  0x21   : > { %v2219_v21 = vld [vmem:[%s3008_s1 + $0xf0] sm:$0xff]  ;;  %v2218_v24 = vld [vmem:[%s3008_s1 + $0xe8] sm:$0xff]  ;;  %v2217_v27 = vld [vmem:[%s3008_s1 + $0xe0] sm:$0xff] }
  0x22   : > { %v2203_v22 = vld [vmem:[%s3008_s1 + $0x70] sm:$0xff]  ;;  %v2202_v25 = vld [vmem:[%s3008_s1 + $0x68] sm:$0xff]  ;;  %v2201_v28 = vld [vmem:[%s3008_s1 + $0x60] sm:$0xff] }
  0x23   : > { %2299 = vmatpush.bf16.msra.mxu1 %v2194_v2  ;;  %2300 = vmatpush.bf16.msra.mxu2 %v2194_v2  ;;  %v1851_v29 = vld [vmem:[%s2551_s28 + $0xa0] sm:$0xf]  ;;  %v2243_v30 = vld [vmem:[%s2551_s28 + $0xac] sm:$0xf0]  ;;  %v2208_v35 = vld [vmem:[%s3008_s1 + $0x98] sm:$0xff] }
  0x24   : > { %2301 = vmatpush.bf16.msra.mxu3 %v2194_v2  ;;  %982 = vmatpush.bf16.msra.mxu0 %v2194_v2  ;;  %v1915_v31 = vld [vmem:[%s2551_s28 + $0x120] sm:$0xf]  ;;  %v2259_v32 = vld [vmem:[%s2551_s28 + $0x12c] sm:$0xf0]  ;;  %v2216_v36 = vld [vmem:[%s3008_s1 + $0xd8] sm:$0xff]  ;;  %v1852_v38 = vor.u32 %v2243_v30, %v1851_v29 }
  0x25   : > { %v1979_v33 = vld [vmem:[%s2551_s28 + $0x1a0] sm:$0xf]  ;;  %v2275_v34 = vld [vmem:[%s2551_s28 + $0x1ac] sm:$0xf0]  ;;  %v2200_v37 = vld [vmem:[%s3008_s1 + $0x58] sm:$0xff]  ;;  %v1916_v39 = vor.u32 %v2259_v32, %v1915_v31 }
  0x26   : > { %v1980_v40 = vor.u32 %v2275_v34, %v1979_v33  ;;  %v2207_v41 = vld [vmem:[%s3008_s1 + $0x90] sm:$0xff]  ;;  %v2206_v44 = vld [vmem:[%s3008_s1 + $0x88] sm:$0xff]  ;;  %v1771_v45 = vld [vmem:[%s2551_s28] sm:$0xf] }
  0x27   : > { %2302 = vmatpush.bf16.msra.mxu1 %v2193_v3  ;;  %2303 = vmatpush.bf16.msra.mxu2 %v2193_v3  ;;  %v2215_v42 = vld [vmem:[%s3008_s1 + $0xd0] sm:$0xff]  ;;  %v2214_v46 = vld [vmem:[%s3008_s1 + $0xc8] sm:$0xff]  ;;  %v2205_v50 = vld [vmem:[%s3008_s1 + $0x80] sm:$0xff] }
  0x28   : > { %2304 = vmatpush.bf16.msra.mxu3 %v2193_v3  ;;  %983 = vmatpush.bf16.msra.mxu0 %v2193_v3  ;;  %v2199_v43 = vld [vmem:[%s3008_s1 + $0x50] sm:$0xff]  ;;  %v2198_v47 = vld [vmem:[%s3008_s1 + $0x48] sm:$0xff]  ;;  %v2213_v51 = vld [vmem:[%s3008_s1 + $0xc0] sm:$0xff] }
  0x29   : > { %v2223_v48 = vld [vmem:[%s2551_s28 + $0xc] sm:$0xf0]  ;;  %v2197_v52 = vld [vmem:[%s3008_s1 + $0x40] sm:$0xff]  ;;  %v2226_v29 = vld [vmem:[%s2551_s28 + $0x2c] sm:$0xf] }
  0x2a   : > { %v1772_v49 = vor.u32 %v2223_v48, %v1771_v45  ;;  %v1867_v53 = vld [vmem:[%s2551_s28 + $0xc0] sm:$0xf]  ;;  %v2247_v54 = vld [vmem:[%s2551_s28 + $0xcc] sm:$0xf0]  ;;  %v2221_v13 = vld [vmem:[%s2551_s28 + $0x4] sm:$0xf] }
  0x2b   : > { %2305 = vmatpush.bf16.msra.mxu1 %v2192_v4  ;;  %2306 = vmatpush.bf16.msra.mxu2 %v2192_v4  ;;  %v1931_v55 = vld [vmem:[%s2551_s28 + $0x140] sm:$0xf]  ;;  %v2263_v56 = vld [vmem:[%s2551_s28 + $0x14c] sm:$0xf0]  ;;  %v1868_v59 = vor.u32 %v2247_v54, %v1867_v53  ;;  %v1797_v30 = vld [vmem:[%s2551_s28 + $0x38] sm:$0xf0] }
  0x2c   : > { %2307 = vmatpush.bf16.msra.mxu3 %v2192_v4  ;;  %984 = vmatpush.bf16.msra.mxu0 %v2192_v4  ;;  %v1995_v57 = vld [vmem:[%s2551_s28 + $0x1c0] sm:$0xf]  ;;  %v2279_v58 = vld [vmem:[%s2551_s28 + $0x1cc] sm:$0xf0]  ;;  %v1932_v60 = vor.u32 %v2263_v56, %v1931_v55  ;;  %v1800_v33 = vor.u32 %v2226_v29, %v1797_v30  ;;  %v2229_v34 = vld [vmem:[%s2551_s28 + $0x44] sm:$0xf] }
  0x2d   : > { %v1996_v61 = vor.u32 %v2279_v58, %v1995_v57  ;;  %v1787_v62 = vld [vmem:[%s2551_s28 + $0x20] sm:$0xf]  ;;  %v2227_v63 = vld [vmem:[%s2551_s28 + $0x2c] sm:$0xf0]  ;;  %v1827_v45 = vld [vmem:[%s2551_s28 + $0x68] sm:$0xf] }
  0x2e   : > { %v1788_v0 = vor.u32 %v2227_v63, %v1787_v62  ;;  %v1883_v1 = vld [vmem:[%s2551_s28 + $0xe0] sm:$0xf]  ;;  %v2251_v2 = vld [vmem:[%s2551_s28 + $0xec] sm:$0xf0]  ;;  %v1829_v48 = vld [vmem:[%s2551_s28 + $0x78] sm:$0xf0] }
  0x2f   : > { %2308 = vmatpush.bf16.msra.mxu1 %v2191_v5  ;;  %2309 = vmatpush.bf16.msra.mxu2 %v2191_v5  ;;  %v1947_v3 = vld [vmem:[%s2551_s28 + $0x160] sm:$0xf]  ;;  %v2267_v4 = vld [vmem:[%s2551_s28 + $0x16c] sm:$0xf0]  ;;  %v2237_v53 = vld [vmem:[%s2551_s28 + $0x84] sm:$0xf] }
  0x30   : > { %2310 = vmatpush.bf16.msra.mxu3 %v2191_v5  ;;  %985 = vmatpush.bf16.msra.mxu0 %v2191_v5  ;;  %v2011_v5 = vld [vmem:[%s2551_s28 + $0x1e0] sm:$0xf]  ;;  %v1948_v8 = vor.u32 %v2267_v4, %v1947_v3  ;;  %v2231_v11 = vld [vmem:[%s2551_s28 + $0x4c] sm:$0xf0]  ;;  %v1837_v54 = vld [vmem:[%s2551_s28 + $0x90] sm:$0xf0] }
  0x31   : > { %v1803_v10 = vld [vmem:[%s2551_s28 + $0x40] sm:$0xf]  ;;  %v1843_v55 = vld [vmem:[%s2551_s28 + $0x88] sm:$0xf]  ;;  %v2240_v56 = vld [vmem:[%s2551_s28 + $0x94] sm:$0xf0] }
  0x32   : > { %v1804_v12 = vor.u32 %v2231_v11, %v1803_v10  ;;  %v2238_v57 = vld [vmem:[%s2551_s28 + $0x8c] sm:$0xf]  ;;  %v1845_v58 = vld [vmem:[%s2551_s28 + $0x98] sm:$0xf0]  ;;  %v2241_v4 = vld [vmem:[%s2551_s28 + $0xa4] sm:$0xf] }
  0x33   : > { %2311 = vmatpush.bf16.msra.mxu1 %v2190_v6  ;;  %2312 = vmatpush.bf16.msra.mxu2 %v2190_v6  ;;  %v1848_v63 = vor.u32 %v2238_v57, %v1845_v58  ;;  %v1907_v57 = vld [vmem:[%s2551_s28 + $0x108] sm:$0xf]  ;;  %v2256_v58 = vld [vmem:[%s2551_s28 + $0x114] sm:$0xf0] }
  0x34   : > { %2313 = vmatpush.bf16.msra.mxu3 %v2190_v6  ;;  %986 = vmatpush.bf16.msra.mxu0 %v2190_v6  ;;  %v2283_v6 = vld [vmem:[%s2551_s28 + $0x1ec] sm:$0xf0] }
  0x35   : > { %v2012_v9 = vor.u32 %v2283_v6, %v2011_v5  ;;  %v1853_v5 = vld [vmem:[%s2551_s28 + $0xb0] sm:$0xf0]  ;;  %v1859_v6 = vld [vmem:[%s2551_s28 + $0xa8] sm:$0xf] }
  0x37   : > { %2314 = vmatpush.bf16.msra.mxu1 %v2189_v7  ;;  %2315 = vmatpush.bf16.msra.mxu2 %v2189_v7 }
  0x38   : > { %2316 = vmatpush.bf16.msra.mxu3 %v2189_v7  ;;  %987 = vmatpush.bf16.msra.mxu0 %v2189_v7  ;;  %v1884_v7 = vor.u32 %v2251_v2, %v1883_v1  ;;  %v2290_v2 = vld [vmem:[%s3010_s3 + $0x28] sm:$0xff] }
  0x3a   : > { %1008 = vmatmul.bf16.vlgmr.msra.gmra.mxu1 %v1836_v17  ;;  %1028 = vmatmul.bf16.vlgmr.msra.gmra.mxu2 %v1900_v18  ;;  %v2222_v17 = vld [vmem:[%s2551_s28 + $0xc] sm:$0xf]  ;;  %v1781_v18 = vld [vmem:[%s2551_s28 + $0x18] sm:$0xf0] }
  0x3b   : > { %1158 = vmatpush.bf16.msrb.mxu2 %v2212_v14  ;;  %1069 = vmatpush.bf16.msrb.mxu1 %v2204_v16  ;;  %v1773_v14 = vld [vmem:[%s2551_s28 + $0x10] sm:$0xf0]  ;;  %v2224_v16 = vld [vmem:[%s2551_s28 + $0x14] sm:$0xf0] }
  0x3c   : > { %1247 = vmatpush.bf16.msrb.mxu3 %v2220_v15  ;;  %988 = vmatmul.bf16.vlgmr.msra.gmra.mxu0 %v1772_v49  ;;  %v1779_v15 = vld [vmem:[%s2551_s28 + $0x8] sm:$0xf] }
  0x3d   : > { %1048 = vmatmul.bf16.vlgmr.msra.gmra.mxu3 %v1964_v19  ;;  %v1776_v19 = vor.u32 %v2221_v13, %v1773_v14  ;;  %v2289_v14 = vld [vmem:[%s3010_s3 + $0x20] sm:$0xff] }
  0x3f   : > { %1159 = vmatpush.bf16.msrb.mxu2 %v2211_v20  ;;  %1070 = vmatpush.bf16.msrb.mxu1 %v2203_v22  ;;  %v1780_v20 = vor.u32 %v2224_v16, %v1779_v15  ;;  %v1819_v22 = vld [vmem:[%s2551_s28 + $0x60] sm:$0xf] }
  0x40   : > { %1248 = vmatpush.bf16.msrb.mxu3 %v2219_v21  ;;  %v1784_v21 = vor.u32 %v2222_v17, %v1781_v18 }
  0x43   : > { %1160 = vmatpush.bf16.msrb.mxu2 %v2210_v23  ;;  %1071 = vmatpush.bf16.msrb.mxu1 %v2202_v25  ;;  %v2235_v23 = vld [vmem:[%s2551_s28 + $0x6c] sm:$0xf0]  ;;  %v2225_v25 = vld [vmem:[%s2551_s28 + $0x24] sm:$0xf] }
  0x44   : > { %1249 = vmatpush.bf16.msrb.mxu3 %v2218_v24  ;;  %v1820_v24 = vor.u32 %v2235_v23, %v1819_v22  ;;  %v1869_v22 = vld [vmem:[%s2551_s28 + $0xd0] sm:$0xf0]  ;;  %v1875_v23 = vld [vmem:[%s2551_s28 + $0xc8] sm:$0xf] }
  0x47   : > { %1161 = vmatpush.bf16.msrb.mxu2 %v2209_v26  ;;  %1072 = vmatpush.bf16.msrb.mxu1 %v2201_v28  ;;  %v1789_v26 = vld [vmem:[%s2551_s28 + $0x30] sm:$0xf0]  ;;  %v2228_v28 = vld [vmem:[%s2551_s28 + $0x34] sm:$0xf0] }
  0x48   : > { %1250 = vmatpush.bf16.msrb.mxu3 %v2217_v27  ;;  %v1795_v27 = vld [vmem:[%s2551_s28 + $0x28] sm:$0xf]  ;;  %v1792_v31 = vor.u32 %v2225_v25, %v1789_v26  ;;  %v2246_v25 = vld [vmem:[%s2551_s28 + $0xcc] sm:$0xf]  ;;  %v1877_v26 = vld [vmem:[%s2551_s28 + $0xd8] sm:$0xf0] }
  0x49   : > { %v1796_v32 = vor.u32 %v2228_v28, %v1795_v27 }
  0x4a   : > { %1013 = vmatmul.bf16.gmra.mxu1 %v1852_v38  ;;  %1033 = vmatmul.bf16.gmra.mxu2 %v1916_v39  ;;  %v2230_v38 = vld [vmem:[%s2551_s28 + $0x4c] sm:$0xf]  ;;  %v1813_v39 = vld [vmem:[%s2551_s28 + $0x58] sm:$0xf0] }
  0x4b   : > { %1162 = vmatpush.bf16.msrb.mxu2 %v2208_v35  ;;  %1073 = vmatpush.bf16.msrb.mxu1 %v2200_v37  ;;  %v1805_v35 = vld [vmem:[%s2551_s28 + $0x50] sm:$0xf0]  ;;  %v2232_v37 = vld [vmem:[%s2551_s28 + $0x54] sm:$0xf0] }
  0x4c   : > { %1251 = vmatpush.bf16.msrb.mxu3 %v2216_v36  ;;  %993 = vmatmul.bf16.gmra.mxu0 %v1788_v0  ;;  %v1811_v36 = vld [vmem:[%s2551_s28 + $0x48] sm:$0xf] }
  0x4d   : > { %1053 = vmatmul.bf16.gmra.mxu3 %v1980_v40  ;;  %v1808_v40 = vor.u32 %v2229_v34, %v1805_v35 }
  0x4f   : > { %1163 = vmatpush.bf16.msrb.mxu2 %v2207_v41  ;;  %1074 = vmatpush.bf16.msrb.mxu1 %v2199_v43  ;;  %v1812_v41 = vor.u32 %v2232_v37, %v1811_v36  ;;  %v2233_v43 = vld [vmem:[%s2551_s28 + $0x64] sm:$0xf] }
  0x50   : > { %1252 = vmatpush.bf16.msrb.mxu3 %v2215_v42  ;;  %v1816_v42 = vor.u32 %v2230_v38, %v1813_v39  ;;  %v2249_v37 = vld [vmem:[%s2551_s28 + $0xe4] sm:$0xf]  ;;  %v2286_v38 = vld [vmem:[%s3010_s3 + $0x8] sm:$0xff]  ;;  %v1885_v39 = vld [vmem:[%s2551_s28 + $0xf0] sm:$0xf0] }
  0x53   : > { %1164 = vmatpush.bf16.msrb.mxu2 %v2206_v44  ;;  %1075 = vmatpush.bf16.msrb.mxu1 %v2198_v47  ;;  %v1821_v44 = vld [vmem:[%s2551_s28 + $0x70] sm:$0xf0]  ;;  %v2234_v47 = vld [vmem:[%s2551_s28 + $0x6c] sm:$0xf] }
  0x54   : > { %1253 = vmatpush.bf16.msrb.mxu3 %v2214_v46  ;;  %v2236_v46 = vld [vmem:[%s2551_s28 + $0x74] sm:$0xf0]  ;;  %v1824_v49 = vor.u32 %v2233_v43, %v1821_v44  ;;  %v1893_v43 = vld [vmem:[%s2551_s28 + $0xf8] sm:$0xf0] }
  0x57   : > { %1165 = vmatpush.bf16.msrb.mxu2 %v2205_v50  ;;  %1076 = vmatpush.bf16.msrb.mxu1 %v2197_v52  ;;  %v1828_v50 = vor.u32 %v2236_v46, %v1827_v45  ;;  %v2292_v52 = vld [vmem:[%s3010_s3 + $0x38] sm:$0xff]  ;;  %v1888_v46 = vor.u32 %v2249_v37, %v1885_v39 }
  0x58   : > { %1254 = vmatpush.bf16.msrb.mxu3 %v2213_v51  ;;  %v1832_v51 = vor.u32 %v2234_v47, %v1829_v48  ;;  %1555 = vmatpush.bf16.msrb.mxu0 %v2292_v52 }
  0x5a   : > { %1018 = vmatmul.bf16.gmra.mxu1 %v1868_v59  ;;  %1038 = vmatmul.bf16.gmra.mxu2 %v1932_v60  ;;  %v1840_v59 = vor.u32 %v2237_v53, %v1837_v54  ;;  %v1844_v60 = vor.u32 %v2240_v56, %v1843_v55  ;;  %v2253_v55 = vld [vmem:[%s2551_s28 + $0x104] sm:$0xf]  ;;  %v1901_v56 = vld [vmem:[%s2551_s28 + $0x110] sm:$0xf0] }
  0x5c   : > { %998 = vmatmul.bf16.gmra.mxu0 %v1804_v12  ;;  %v1856_v12 = vor.u32 %v2241_v4, %v1853_v5  ;;  %v1908_v4 = vor.u32 %v2256_v58, %v1907_v57  ;;  %v2261_v58 = vld [vmem:[%s2551_s28 + $0x144] sm:$0xf] }
  0x5d   : > { %1058 = vmatmul.bf16.gmra.mxu3 %v1996_v61  ;;  %v2291_v61 = vld [vmem:[%s3010_s3 + $0x30] sm:$0xff] }
  0x5e   : > { %1556 = vmatpush.bf16.msrb.mxu0 %v2291_v61 }
  0x62   : > { %1557 = vmatpush.bf16.msrb.mxu0 %v2290_v2  ;;  %v1904_v2 = vor.u32 %v2253_v55, %v1901_v56 }
  0x66   : > { %1558 = vmatpush.bf16.msrb.mxu0 %v2289_v14 }
  0x6a   : > { %1023 = vmatmul.bf16.gmra.mxu1 %v1884_v7  ;;  %1043 = vmatmul.bf16.gmra.mxu2 %v1948_v8  ;;  %v2244_v7 = vld [vmem:[%s2551_s28 + $0xb4] sm:$0xf0]  ;;  %v2242_v8 = vld [vmem:[%s2551_s28 + $0xac] sm:$0xf] }
  0x6b   : > { %v1860_v13 = vor.u32 %v2244_v7, %v1859_v6 }
  0x6c   : > { %1003 = vmatmul.bf16.gmra.mxu0 %v1820_v24  ;;  %v2248_v24 = vld [vmem:[%s2551_s28 + $0xd4] sm:$0xf0] }
  0x6d   : > { %1063 = vmatmul.bf16.gmra.mxu3 %v2012_v9  ;;  %v1861_v9 = vld [vmem:[%s2551_s28 + $0xb8] sm:$0xf0]  ;;  %v1876_v30 = vor.u32 %v2248_v24, %v1875_v23  ;;  %v2260_v23 = vld [vmem:[%s2551_s28 + $0x134] sm:$0xf0] }
  0x6e   : > { %v1864_v16 = vor.u32 %v2242_v8, %v1861_v9 }
  0x7a   : > { %1077 = vmatmul.bf16.vlgmr.msrb.gmra.mxu1 %v1776_v19  ;;  %1166 = vmatmul.bf16.vlgmr.msrb.gmra.mxu2 %v1780_v20  ;;  %v2288_v19 = vld [vmem:[%s3010_s3 + $0x18] sm:$0xff] }
  0x7b   : > { %1559 = vmatpush.bf16.msrb.mxu0 %v2288_v19  ;;  %v2257_v19 = vld [vmem:[%s2551_s28 + $0x124] sm:$0xf] }
  0x7d   : > { %1255 = vmatmul.bf16.vlgmr.msrb.gmra.mxu3 %v1784_v21  ;;  %v2245_v21 = vld [vmem:[%s2551_s28 + $0xc4] sm:$0xf] }
  0x7e   : > { %v1872_v29 = vor.u32 %v2245_v21, %v1869_v22  ;;  %v1917_v21 = vld [vmem:[%s2551_s28 + $0x130] sm:$0xf0]  ;;  %v1923_v22 = vld [vmem:[%s2551_s28 + $0x128] sm:$0xf] }
  0x7f   : > { %v1924_v39 = vor.u32 %v2260_v23, %v1923_v22 }
  0x8a   : > { %1082 = vmatmul.bf16.gmra.mxu1 %v1792_v31  ;;  %1171 = vmatmul.bf16.gmra.mxu2 %v1796_v32  ;;  %v2287_v31 = vld [vmem:[%s3010_s3 + $0x10] sm:$0xff] }
  0x8b   : > { %1560 = vmatpush.bf16.msrb.mxu0 %v2287_v31  ;;  %v2820_v31 = vld [vmem:[%s3009_s2] ss:$0 sm:$0xff] }
  0x8d   : > { %1260 = vmatmul.bf16.gmra.mxu3 %v1800_v33  ;;  %v1880_v33 = vor.u32 %v2246_v25, %v1877_v26  ;;  %v2258_v25 = vld [vmem:[%s2551_s28 + $0x12c] sm:$0xf]  ;;  %v1925_v26 = vld [vmem:[%s2551_s28 + $0x138] sm:$0xf0] }
  0x8f   : > { %1561 = vmatpush.bf16.msrb.mxu0 %v2286_v38  ;;  %v1920_v38 = vor.u32 %v2257_v19, %v1917_v21 }
  0x9a   : > { %1087 = vmatmul.bf16.gmra.mxu1 %v1808_v40  ;;  %1176 = vmatmul.bf16.gmra.mxu2 %v1812_v41  ;;  %v1891_v40 = vld [vmem:[%s2551_s28 + $0xe8] sm:$0xf]  ;;  %v2252_v41 = vld [vmem:[%s2551_s28 + $0xf4] sm:$0xf0] }
  0x9b   : > { %v1892_v47 = vor.u32 %v2252_v41, %v1891_v40  ;;  %v1928_v41 = vor.u32 %v2258_v25, %v1925_v26 }
  0x9d   : > { %1265 = vmatmul.bf16.gmra.mxu3 %v1816_v42  ;;  %v2250_v42 = vld [vmem:[%s2551_s28 + $0xec] sm:$0xf] }
  0xaa   : > { %1092 = vmatmul.bf16.gmra.mxu1 %v1824_v49  ;;  %1181 = vmatmul.bf16.gmra.mxu2 %v1828_v50  ;;  %v1896_v49 = vor.u32 %v2250_v42, %v1893_v43  ;;  %v2285_v50 = vld [vmem:[%s3010_s3] sm:$0xff] }
  0xab   : > { %1562 = vmatpush.bf16.msrb.mxu0 %v2285_v50 }
  0xad   : > { %1270 = vmatmul.bf16.gmra.mxu3 %v1832_v51 }
  0xb7   : > { %v2721_v62 = vpop.f32.mrf.mxu1 }
  0xb9   : > { %v989_v52 = vpop.f32.mrf.mxu0 }
  0xba   : > { %1097 = vmatmul.bf16.gmra.mxu1 %v1840_v59  ;;  %1186 = vmatmul.bf16.gmra.mxu2 %v1844_v60  ;;  %v2254_v59 = vld [vmem:[%s2551_s28 + $0x10c] sm:$0xf]  ;;  %v1909_v60 = vld [vmem:[%s2551_s28 + $0x118] sm:$0xf0] }
  0xbb   : > { %v1912_v6 = vor.u32 %v2254_v59, %v1909_v60  ;;  %v1933_v59 = vld [vmem:[%s2551_s28 + $0x150] sm:$0xf0]  ;;  %v1939_v60 = vld [vmem:[%s2551_s28 + $0x148] sm:$0xf] }
  0xbd   : > { %1275 = vmatmul.bf16.gmra.mxu3 %v1848_v63  ;;  %v2723_v0 = vpop.f32.mrf.mxu2 }
  0xbf   : > { %v2730_v3 = vpop.f32.mrf.mxu1 }
  0xc0   : > { %v2725_v1 = vpop.f32.mrf.mxu3 }
  0xc1   : > { %v991_v7 = vpop.f32.mrf.mxu0 }
  0xc5   : > { %v2738_v10 = vpop.f32.mrf.mxu2 }
  0xc7   : > { %v2745_v15 = vpop.f32.mrf.mxu1 }
  0xc8   : > { %v2740_v11 = vpop.f32.mrf.mxu3 }
  0xc9   : > { %v994_v14 = vpop.f32.mrf.mxu0 }
  0xca   : > { %1102 = vmatmul.bf16.gmra.mxu1 %v1856_v12  ;;  %1191 = vmatmul.bf16.gmra.mxu2 %v1860_v13 }
  0xcd   : > { %1280 = vmatmul.bf16.gmra.mxu3 %v1864_v16  ;;  %v2747_v17 = vpop.f32.mrf.mxu2 }
  0xcf   : > { %v2754_v20 = vpop.f32.mrf.mxu1 }
  0xd0   : > { %v2749_v18 = vpop.f32.mrf.mxu3 }
  0xd5   : > { %v2762_v27 = vpop.f32.mrf.mxu2 }
  0xd7   : > { %v2769_v32 = vpop.f32.mrf.mxu1 }
  0xd8   : > { %v2764_v28 = vpop.f32.mrf.mxu3 }
  0xda   : > { %1107 = vmatmul.bf16.gmra.mxu1 %v1872_v29  ;;  %1196 = vmatmul.bf16.gmra.mxu2 %v1876_v30 }
  0xdd   : > { %1285 = vmatmul.bf16.gmra.mxu3 %v1880_v33  ;;  %v2771_v34 = vpop.f32.mrf.mxu2 }
  0xdf   : > { %v2775_v36 = vpop.f32.mrf.mxu1 }
  0xe0   : > { %v2773_v35 = vpop.f32.mrf.mxu3 }
  0xe5   : > { %v2786_v44 = vpop.f32.mrf.mxu2 }
  0xe7   : > { %v2790_v48 = vpop.f32.mrf.mxu1 }
  0xe8   : > { %v2788_v45 = vpop.f32.mrf.mxu3 }
  0xea   : > { %1112 = vmatmul.bf16.gmra.mxu1 %v1888_v46  ;;  %1201 = vmatmul.bf16.gmra.mxu2 %v1892_v47  ;;  %v996_v47 = vpop.f32.mrf.mxu0 }
  0xed   : > { %1290 = vmatmul.bf16.gmra.mxu3 %v1896_v49  ;;  %v2795_v51 = vpop.f32.mrf.mxu2 }
  0xef   : > { %v2799_v54 = vpop.f32.mrf.mxu1 }
  0xf0   : > { %v2797_v53 = vpop.f32.mrf.mxu3 }
  0xf5   : > { %v2807_v61 = vpop.f32.mrf.mxu2 }
  0xf7   : > { %v1078_v5 = vpop.f32.mrf.mxu1 }
  0xf8   : > { %v2809_v63 = vpop.f32.mrf.mxu3  ;;  %v1079_v9 = vadd.f32 %v1078_v5, %v989_v52  ;;  %v2262_v5 = vld [vmem:[%s2551_s28 + $0x14c] sm:$0xf] }
  0xfa   : > { %1117 = vmatmul.bf16.gmra.mxu1 %v1904_v2  ;;  %1206 = vmatmul.bf16.gmra.mxu2 %v1908_v4  ;;  %v2264_v2 = vld [vmem:[%s2551_s28 + $0x154] sm:$0xf0] }
  0xfb   : > { %v1940_v19 = vor.u32 %v2264_v2, %v1939_v60 }
  0xfd   : > { %1295 = vmatmul.bf16.gmra.mxu3 %v1912_v6  ;;  %v1167_v8 = vpop.f32.mrf.mxu2  ;;  %v1941_v6 = vld [vmem:[%s2551_s28 + $0x158] sm:$0xf0] }
  0xfe   : > { %v1168_v16 = vadd.f32 %v1167_v8, %v1079_v9 }
  0xff   : > { %v1080_v13 = vpop.f32.mrf.mxu1 }
 0x100   : > { %v1256_v12 = vpop.f32.mrf.mxu3  ;;  %v1081_v24 = vadd.f32 %v1080_v13, %v991_v7  ;;  %v999_v7 = vpop.f32.mrf.mxu0 }
 0x101   : > { %v1257_v30 = vadd.f32 %v1256_v12, %v1168_v16  ;;  %v1936_v16 = vor.u32 %v2261_v58, %v1933_v59 }
 0x103   : > { %v1439_v43 = vadd.f32 %v2820_v31, %v1257_v30 }
 0x105   : > { %v1169_v29 = vpop.f32.mrf.mxu2 }
 0x106   : > { %v1170_v33 = vadd.f32 %v1169_v29, %v1081_v24 }
 0x107   : > { %v1083_v40 = vpop.f32.mrf.mxu1 }
 0x108   : > { %v1258_v37 = vpop.f32.mrf.mxu3  ;;  %v1084_v52 = vadd.f32 %v1083_v40, %v994_v14  ;;  %v1944_v14 = vor.u32 %v2262_v5, %v1941_v6  ;;  %v1949_v40 = vld [vmem:[%s2551_s28 + $0x170] sm:$0xf0] }
 0x109   : > { %v1259_v42 = vadd.f32 %v1258_v37, %v1170_v33  ;;  %v1001_v33 = vpop.f32.mrf.mxu0 }
 0x10a   : > { %1122 = vmatmul.bf16.gmra.mxu1 %v1920_v38  ;;  %1211 = vmatmul.bf16.gmra.mxu2 %v1924_v39  ;;  %v2265_v39 = vld [vmem:[%s2551_s28 + $0x164] sm:$0xf] }
 0x10b   : > { %v1440_v46 = vadd.f32 %v2820_v31, %v1259_v42  ;;  %v2268_v42 = vld [vmem:[%s2551_s28 + $0x174] sm:$0xf0] }
 0x10d   : > { %1300 = vmatmul.bf16.gmra.mxu3 %v1928_v41  ;;  %v1471_v49 = vpack.c.bf16 %v1440_v46, %v1439_v43  ;;  %v1172_v50 = vpop.f32.mrf.mxu2  ;;  %v1955_v41 = vld [vmem:[%s2551_s28 + $0x168] sm:$0xf]  ;;  %v2266_v46 = vld [vmem:[%s2551_s28 + $0x16c] sm:$0xf] }
 0x10e   : > { %v1173_v57 = vadd.f32 %v1172_v50, %v1084_v52 }
 0x10f   : > { %1563 = vmatmul.bf16.vlgmr.msrb.gmra.mxu0 %v1471_v49  ;;  %v1085_v56 = vpop.f32.mrf.mxu1 }
 0x110   : > { %v1261_v55 = vpop.f32.mrf.mxu3  ;;  %v1086_v4 = vadd.f32 %v1085_v56, %v996_v47  ;;  %v1957_v47 = vld [vmem:[%s2551_s28 + $0x178] sm:$0xf0]  ;;  %v1952_v56 = vor.u32 %v2265_v39, %v1949_v40 }
 0x111   : > { %v1262_v9 = vadd.f32 %v1261_v55, %v1173_v57  ;;  %v1956_v57 = vor.u32 %v2268_v42, %v1955_v41  ;;  %v1960_v59 = vor.u32 %v2266_v46, %v1957_v47  ;;  %v1004_v2 = vpop.f32.mrf.mxu0 }
 0x113   : > { %v1441_v23 = vadd.f32 %v2820_v31, %v1262_v9 }
 0x115   : > { %v1174_v8 = vpop.f32.mrf.mxu2 }
 0x116   : > { %v1175_v12 = vadd.f32 %v1174_v8, %v1086_v4 }
 0x117   : > { %v1088_v21 = vpop.f32.mrf.mxu1 }
 0x118   : > { %v1263_v13 = vpop.f32.mrf.mxu3  ;;  %v1089_v29 = vadd.f32 %v1088_v21, %v999_v7  ;;  %v1965_v21 = vld [vmem:[%s2551_s28 + $0x190] sm:$0xf0] }
 0x119   : > { %v1264_v22 = vadd.f32 %v1263_v13, %v1175_v12 }
 0x11a   : > { %1127 = vmatmul.bf16.gmra.mxu1 %v1936_v16  ;;  %1216 = vmatmul.bf16.gmra.mxu2 %v1940_v19  ;;  %v2269_v16 = vld [vmem:[%s2551_s28 + $0x184] sm:$0xf]  ;;  %v1006_v19 = vpop.f32.mrf.mxu0 }
 0x11b   : > { %v1442_v24 = vadd.f32 %v2820_v31, %v1264_v22  ;;  %v2272_v22 = vld [vmem:[%s2551_s28 + $0x194] sm:$0xf0] }
 0x11d   : > { %1305 = vmatmul.bf16.gmra.mxu3 %v1944_v14  ;;  %v1472_v25 = vpack.c.bf16 %v1442_v24, %v1441_v23  ;;  %v1177_v26 = vpop.f32.mrf.mxu2  ;;  %v1971_v14 = vld [vmem:[%s2551_s28 + $0x188] sm:$0xf]  ;;  %v2270_v24 = vld [vmem:[%s2551_s28 + $0x18c] sm:$0xf] }
 0x11e   : > { %v1178_v38 = vadd.f32 %v1177_v26, %v1089_v29 }
 0x11f   : > { %1568 = vmatmul.bf16.gmra.mxu0 %v1472_v25  ;;  %v1090_v37 = vpop.f32.mrf.mxu1  ;;  %v1973_v25 = vld [vmem:[%s2551_s28 + $0x198] sm:$0xf0] }
 0x120   : > { %v1266_v30 = vpop.f32.mrf.mxu3  ;;  %v1091_v43 = vadd.f32 %v1090_v37, %v1001_v33  ;;  %v1968_v37 = vor.u32 %v2269_v16, %v1965_v21  ;;  %v1976_v40 = vor.u32 %v2270_v24, %v1973_v25 }
 0x121   : > { %v1267_v50 = vadd.f32 %v1266_v30, %v1178_v38  ;;  %v1972_v38 = vor.u32 %v2272_v22, %v1971_v14 }
 0x123   : > { %v1443_v4 = vadd.f32 %v2820_v31, %v1267_v50 }
 0x125   : > { %v1179_v49 = vpop.f32.mrf.mxu2 }
 0x126   : > { %v1180_v52 = vadd.f32 %v1179_v49, %v1091_v43 }
 0x127   : > { %v1093_v58 = vpop.f32.mrf.mxu1 }
 0x128   : > { %v1268_v55 = vpop.f32.mrf.mxu3  ;;  %v1094_v8 = vadd.f32 %v1093_v58, %v1004_v2  ;;  %v1987_v58 = vld [vmem:[%s2551_s28 + $0x1a8] sm:$0xf]  ;;  %v2274_v2 = vld [vmem:[%s2551_s28 + $0x1ac] sm:$0xf] }
 0x129   : > { %v1269_v60 = vadd.f32 %v1268_v55, %v1180_v52 }
 0x12a   : > { %1132 = vmatmul.bf16.gmra.mxu1 %v1952_v56  ;;  %1221 = vmatmul.bf16.gmra.mxu2 %v1956_v57  ;;  %v2273_v56 = vld [vmem:[%s2551_s28 + $0x1a4] sm:$0xf]  ;;  %v1981_v57 = vld [vmem:[%s2551_s28 + $0x1b0] sm:$0xf0] }
 0x12b   : > { %v1444_v5 = vadd.f32 %v2820_v31, %v1269_v60 }
 0x12d   : > { %1310 = vmatmul.bf16.gmra.mxu3 %v1960_v59  ;;  %v1473_v6 = vpack.c.bf16 %v1444_v5, %v1443_v4  ;;  %v1182_v7 = vpop.f32.mrf.mxu2  ;;  %v2276_v59 = vld [vmem:[%s2551_s28 + $0x1b4] sm:$0xf0]  ;;  %v1989_v4 = vld [vmem:[%s2551_s28 + $0x1b8] sm:$0xf0] }
 0x12e   : > { %v1183_v13 = vadd.f32 %v1182_v7, %v1094_v8  ;;  %v1992_v16 = vor.u32 %v2274_v2, %v1989_v4  ;;  %v2281_v2 = vld [vmem:[%s2551_s28 + $0x1e4] sm:$0xf]  ;;  %v2013_v4 = vld [vmem:[%s2551_s28 + $0x1f0] sm:$0xf0] }
 0x12f   : > { %1573 = vmatmul.bf16.gmra.mxu0 %v1473_v6  ;;  %v1095_v12 = vpop.f32.mrf.mxu1 }
 0x130   : > { %v1271_v9 = vpop.f32.mrf.mxu3  ;;  %v1096_v23 = vadd.f32 %v1095_v12, %v1006_v19  ;;  %v1988_v12 = vor.u32 %v2276_v59, %v1987_v58 }
 0x131   : > { %v1272_v29 = vadd.f32 %v1271_v9, %v1183_v13  ;;  %v1984_v9 = vor.u32 %v2273_v56, %v1981_v57 }
 0x133   : > { %v1445_v42 = vadd.f32 %v2820_v31, %v1272_v29  ;;  %v1997_v29 = vld [vmem:[%s2551_s28 + $0x1d0] sm:$0xf0] }
 0x135   : > { %v1184_v26 = vpop.f32.mrf.mxu2 }
 0x136   : > { %v1185_v30 = vadd.f32 %v1184_v26, %v1096_v23  ;;  %v2277_v26 = vld [vmem:[%s2551_s28 + $0x1c4] sm:$0xf] }
 0x137   : > { %v1098_v39 = vpop.f32.mrf.mxu1 }
 0x138   : > { %v1273_v33 = vpop.f32.mrf.mxu3  ;;  %v1099_v52 = vadd.f32 %v1098_v39, %v2721_v62  ;;  %v2005_v39 = vld [vmem:[%s2551_s28 + $0x1d8] sm:$0xf0] }
 0x139   : > { %v1274_v41 = vadd.f32 %v1273_v33, %v1185_v30  ;;  %v2003_v30 = vld [vmem:[%s2551_s28 + $0x1c8] sm:$0xf]  ;;  %v2280_v33 = vld [vmem:[%s2551_s28 + $0x1d4] sm:$0xf0] }
 0x13a   : > { %1137 = vmatmul.bf16.gmra.mxu1 %v1968_v37  ;;  %1226 = vmatmul.bf16.gmra.mxu2 %v1972_v38  ;;  %v2278_v38 = vld [vmem:[%s2551_s28 + $0x1cc] sm:$0xf] }
 0x13b   : > { %v1446_v43 = vadd.f32 %v2820_v31, %v1274_v41 }
 0x13d   : > { %1315 = vmatmul.bf16.gmra.mxu3 %v1976_v40  ;;  %v1474_v46 = vpack.c.bf16 %v1446_v43, %v1445_v42  ;;  %v1187_v47 = vpop.f32.mrf.mxu2 }
 0x13e   : > { %v1188_v55 = vadd.f32 %v1187_v47, %v1099_v52  ;;  %v2004_v47 = vor.u32 %v2280_v33, %v2003_v30 }
 0x13f   : > { %1578 = vmatmul.bf16.gmra.mxu0 %v1474_v46  ;;  %v1100_v50 = vpop.f32.mrf.mxu1  ;;  %v2000_v46 = vor.u32 %v2277_v26, %v1997_v29 }
 0x140   : > { %v1276_v49 = vpop.f32.mrf.mxu3  ;;  %v1101_v60 = vadd.f32 %v1100_v50, %v2730_v3  ;;  %v2008_v50 = vor.u32 %v2278_v38, %v2005_v39 }
 0x141   : > { %v1277_v6 = vadd.f32 %v1276_v49, %v1188_v55 }
 0x143   : > { %v1447_v19 = vadd.f32 %v2820_v31, %v1277_v6  ;;  %v2284_v6 = vld [vmem:[%s2551_s28 + $0x1f4] sm:$0xf0] }
 0x145   : > { %v1189_v5 = vpop.f32.mrf.mxu2 }
 0x146   : > { %v1190_v7 = vadd.f32 %v1189_v5, %v1101_v60  ;;  %v2019_v5 = vld [vmem:[%s2551_s28 + $0x1e8] sm:$0xf] }
 0x147   : > { %v1103_v13 = vpop.f32.mrf.mxu1 }
 0x148   : > { %v1278_v8 = vpop.f32.mrf.mxu3  ;;  %v1104_v24 = vadd.f32 %v1103_v13, %v2745_v15 }
 0x149   : > { %v1279_v62 = vadd.f32 %v1278_v8, %v1190_v7  ;;  %v2282_v8 = vld [vmem:[%s2551_s28 + $0x1ec] sm:$0xf] }
 0x14a   : > { %1142 = vmatmul.bf16.gmra.mxu1 %v1984_v9  ;;  %1231 = vmatmul.bf16.gmra.mxu2 %v1988_v12  ;;  %v2021_v9 = vld [vmem:[%s2551_s28 + $0x1f8] sm:$0xf0]  ;;  %s1767_s28 = sshll.u32 %s2448_s21, 5 }
 0x14b   : > { %v1448_v21 = vadd.f32 %v2820_v31, %v1279_v62  ;;  %p262_p13 = scmp.lt.s32.totalorder %s1767_s28, 63 }
 0x14d   : > { %1320 = vmatmul.bf16.gmra.mxu3 %v1992_v16  ;;  %v1475_v3 = vpack.c.bf16 %v1448_v21, %v1447_v19  ;;  %v1192_v14 = vpop.f32.mrf.mxu2  ;;  %v2016_v19 = vor.u32 %v2281_v2, %v2013_v4  ;;  %v2020_v21 = vor.u32 %v2284_v6, %v2019_v5  ;;  %s3023_s28 = smov (!%p262_p13, %s1767_s28), 63 }
 0x14e   : > { %v1193_v25 = vadd.f32 %v1192_v14, %v1104_v24  ;;  %v2024_v14 = vor.u32 %v2282_v8, %v2021_v9  ;;  %s1768_s18 = sshll.u32 %s3023_s28, 3 }
 0x14f   : > { %1583 = vmatmul.bf16.gmra.mxu0 %v1475_v3  ;;  %v1105_v23 = vpop.f32.mrf.mxu1  ;;  %s2895_s7 = scalar_lea.vmem %s3012_s5, %s1768_s18 }
 0x150   : > { %v1281_v22 = vpop.f32.mrf.mxu3  ;;  %v1106_v37 = vadd.f32 %v1105_v23, %v2754_v20 }
 0x151   : > { %v1282_v41 = vadd.f32 %v1281_v22, %v1193_v25 }
 0x153   : > { %v1449_v52 = vadd.f32 %v2820_v31, %v1282_v41 }
 0x155   : > { %v1194_v40 = vpop.f32.mrf.mxu2 }
 0x156   : > { %v1195_v42 = vadd.f32 %v1194_v40, %v1106_v37 }
 0x157   : > { %v1108_v49 = vpop.f32.mrf.mxu1 }
 0x158   : > { %v1283_v43 = vpop.f32.mrf.mxu3  ;;  %v1109_v59 = vadd.f32 %v1108_v49, %v2769_v32 }
 0x159   : > { %v1284_v15 = vadd.f32 %v1283_v43, %v1195_v42 }
 0x15a   : > { %1147 = vmatmul.bf16.gmra.mxu1 %v2000_v46  ;;  %1236 = vmatmul.bf16.gmra.mxu2 %v2004_v47 }
 0x15b   : > { %v1450_v55 = vadd.f32 %v2820_v31, %v1284_v15 }
 0x15d   : > { %1325 = vmatmul.bf16.gmra.mxu3 %v2008_v50  ;;  %v1476_v20 = vpack.c.bf16 %v1450_v55, %v1449_v52  ;;  %v1197_v56 = vpop.f32.mrf.mxu2 }
 0x15e   : > { %v1198_v60 = vadd.f32 %v1197_v56, %v1109_v59 }
 0x15f   : > { %1588 = vmatmul.bf16.gmra.mxu0 %v1476_v20  ;;  %v1110_v58 = vpop.f32.mrf.mxu1 }
 0x160   : > { %v1286_v57 = vpop.f32.mrf.mxu3  ;;  %v1111_v7 = vadd.f32 %v1110_v58, %v2775_v36 }
 0x161   : > { %v1287_v13 = vadd.f32 %v1286_v57, %v1198_v60  ;;  %v2888_v60 = vld [vmem:[%s3011_s4] ss:$0 sm:$0xff] }
 0x163   : > { %v1451_v32 = vadd.f32 %v2820_v31, %v1287_v13 }
 0x165   : > { %v1199_v12 = vpop.f32.mrf.mxu2 }
 0x166   : > { %v1200_v16 = vadd.f32 %v1199_v12, %v1111_v7 }
 0x167   : > { %v1113_v3 = vpop.f32.mrf.mxu1 }
 0x168   : > { %v1288_v62 = vpop.f32.mrf.mxu3  ;;  %v1114_v29 = vadd.f32 %v1113_v3, %v2790_v48 }
 0x169   : > { %v1289_v22 = vadd.f32 %v1288_v62, %v1200_v16 }
 0x16a   : > { %1152 = vmatmul.bf16.gmra.mxu1 %v2016_v19  ;;  %1241 = vmatmul.bf16.gmra.mxu2 %v2020_v21 }
 0x16b   : > { %v1452_v23 = vadd.f32 %v2820_v31, %v1289_v22 }
 0x16d   : > { %1330 = vmatmul.bf16.gmra.mxu3 %v2024_v14  ;;  %v1477_v24 = vpack.c.bf16 %v1452_v23, %v1451_v32  ;;  %v1202_v36 = vpop.f32.mrf.mxu2 }
 0x16e   : > { %v1203_v30 = vadd.f32 %v1202_v36, %v1114_v29 }
 0x16f   : > { %1593 = vmatmul.bf16.gmra.mxu0 %v1477_v24  ;;  %v1115_v26 = vpop.f32.mrf.mxu1 }
 0x170   : > { %v1291_v25 = vpop.f32.mrf.mxu3  ;;  %v1116_v33 = vadd.f32 %v1115_v26, %v2799_v54 }
 0x171   : > { %v1292_v38 = vadd.f32 %v1291_v25, %v1203_v30 }
 0x173   : > { %v1453_v43 = vadd.f32 %v2820_v31, %v1292_v38 }
 0x175   : > { %v1204_v37 = vpop.f32.mrf.mxu2 }
 0x176   : > { %v1205_v39 = vadd.f32 %v1204_v37, %v1116_v33 }
 0x177   : > { %v1118_v41 = vpop.f32.mrf.mxu1 }
 0x178   : > { %v1293_v40 = vpop.f32.mrf.mxu3  ;;  %v1119_v48 = vadd.f32 %v1118_v41, %v2723_v0 }
 0x179   : > { %v1294_v42 = vadd.f32 %v1293_v40, %v1205_v39 }
 0x17b   : > { %v1454_v46 = vadd.f32 %v2820_v31, %v1294_v42 }
 0x17d   : > { %v1478_v47 = vpack.c.bf16 %v1454_v46, %v1453_v43  ;;  %v1207_v49 = vpop.f32.mrf.mxu2 }
 0x17e   : > { %v1208_v54 = vadd.f32 %v1207_v49, %v1119_v48 }
 0x17f   : > { %1598 = vmatmul.bf16.gmra.mxu0 %v1478_v47  ;;  %v1120_v15 = vpop.f32.mrf.mxu1 }
 0x180   : > { %v1296_v50 = vpop.f32.mrf.mxu3  ;;  %v1121_v52 = vadd.f32 %v1120_v15, %v2738_v10 }
 0x181   : > { %v1297_v20 = vadd.f32 %v1296_v50, %v1208_v54 }
 0x183   : > { %v1455_v2 = vadd.f32 %v2820_v31, %v1297_v20 }
 0x185   : > { %v1209_v55 = vpop.f32.mrf.mxu2 }
 0x186   : > { %v1210_v56 = vadd.f32 %v1209_v55, %v1121_v52 }
 0x187   : > { %v1123_v58 = vpop.f32.mrf.mxu1 }
 0x188   : > { %v1298_v57 = vpop.f32.mrf.mxu3  ;;  %v1124_v9 = vadd.f32 %v1123_v58, %v2747_v17 }
 0x189   : > { %v1299_v59 = vadd.f32 %v1298_v57, %v1210_v56 }
 0x18b   : > { %v1456_v0 = vadd.f32 %v2820_v31, %v1299_v59 }
 0x18c   : > { %v1564_v10 = vpop.f32.mrf.mxu0 }
 0x18d   : > { %v1565_v4 = vadd.f32 %v2888_v60, %v1564_v10  ;;  %v1479_v5 = vpack.c.bf16 %v1456_v0, %v1455_v2  ;;  %v1212_v6 = vpop.f32.mrf.mxu2 }
 0x18e   : > { %v1213_v12 = vadd.f32 %v1212_v6, %v1124_v9 }
 0x18f   : > { %1644 = vst [vmem:[%s2895_s7] sm:$0xff] %v1565_v4  ;;  %1603 = vmatmul.bf16.gmra.mxu0 %v1479_v5  ;;  %v1125_v8 = vpop.f32.mrf.mxu1 }
 0x190   : > { %v1301_v7 = vpop.f32.mrf.mxu3  ;;  %v1126_v16 = vadd.f32 %v1125_v8, %v2762_v27 }
 0x191   : > { %v1302_v21 = vadd.f32 %v1301_v7, %v1213_v12 }
 0x193   : > { %v1457_v23 = vadd.f32 %v2820_v31, %v1302_v21 }
 0x194   : > { %v1566_v13 = vpop.f32.mrf.mxu0 }
 0x195   : > { %v1567_v62 = vadd.f32 %v2888_v60, %v1566_v13  ;;  %v1214_v19 = vpop.f32.mrf.mxu2 }
 0x196   : > { %v1215_v3 = vadd.f32 %v1214_v19, %v1126_v16 }
 0x197   : > { %1645 = vst [vmem:[%s2895_s7 + $0x8] sm:$0xff] %v1567_v62  ;;  %v1128_v22 = vpop.f32.mrf.mxu1 }
 0x198   : > { %v1303_v14 = vpop.f32.mrf.mxu3  ;;  %v1129_v30 = vadd.f32 %v1128_v22, %v2771_v34 }
 0x199   : > { %v1304_v32 = vadd.f32 %v1303_v14, %v1215_v3 }
 0x19b   : > { %v1458_v24 = vadd.f32 %v2820_v31, %v1304_v32 }
 0x19c   : > { %v1569_v17 = vpop.f32.mrf.mxu0 }
 0x19d   : > { %v1570_v36 = vadd.f32 %v2888_v60, %v1569_v17  ;;  %v1480_v25 = vpack.c.bf16 %v1458_v24, %v1457_v23  ;;  %v1217_v26 = vpop.f32.mrf.mxu2 }
 0x19e   : > { %v1218_v33 = vadd.f32 %v1217_v26, %v1129_v30 }
 0x19f   : > { %1646 = vst [vmem:[%s2895_s7 + $0x10] sm:$0xff] %v1570_v36  ;;  %1608 = vmatmul.bf16.gmra.mxu0 %v1480_v25  ;;  %v1130_v29 = vpop.f32.mrf.mxu1 }
 0x1a0   : > { %v1306_v27 = vpop.f32.mrf.mxu3  ;;  %v1131_v38 = vadd.f32 %v1130_v29, %v2786_v44 }
 0x1a1   : > { %v1307_v41 = vadd.f32 %v1306_v27, %v1218_v33 }
 0x1a3   : > { %v1459_v49 = vadd.f32 %v2820_v31, %v1307_v41 }
 0x1a4   : > { %v1571_v37 = vpop.f32.mrf.mxu0 }
 0x1a5   : > { %v1572_v39 = vadd.f32 %v2888_v60, %v1571_v37  ;;  %v1219_v40 = vpop.f32.mrf.mxu2 }
 0x1a6   : > { %v1220_v42 = vadd.f32 %v1219_v40, %v1131_v38 }
 0x1a7   : > { %1647 = vst [vmem:[%s2895_s7 + $0x18] sm:$0xff] %v1572_v39  ;;  %v1133_v46 = vpop.f32.mrf.mxu1 }
 0x1a8   : > { %v1308_v43 = vpop.f32.mrf.mxu3  ;;  %v1134_v55 = vadd.f32 %v1133_v46, %v2795_v51 }
 0x1a9   : > { %v1309_v47 = vadd.f32 %v1308_v43, %v1220_v42 }
 0x1ab   : > { %v1460_v50 = vadd.f32 %v2820_v31, %v1309_v47 }
 0x1ac   : > { %v1574_v34 = vpop.f32.mrf.mxu0 }
 0x1ad   : > { %v1575_v15 = vadd.f32 %v2888_v60, %v1574_v34  ;;  %v1481_v48 = vpack.c.bf16 %v1460_v50, %v1459_v49  ;;  %v1222_v54 = vpop.f32.mrf.mxu2 }
 0x1ae   : > { %v1223_v20 = vadd.f32 %v1222_v54, %v1134_v55 }
 0x1af   : > { %1648 = vst [vmem:[%s2895_s7 + $0x20] sm:$0xff] %v1575_v15  ;;  %1613 = vmatmul.bf16.gmra.mxu0 %v1481_v48  ;;  %v1135_v52 = vpop.f32.mrf.mxu1 }
 0x1b0   : > { %v1311_v44 = vpop.f32.mrf.mxu3  ;;  %v1136_v57 = vadd.f32 %v1135_v52, %v2807_v61 }
 0x1b1   : > { %v1312_v2 = vadd.f32 %v1311_v44, %v1223_v20 }
 0x1b3   : > { %v1461_v6 = vadd.f32 %v2820_v31, %v1312_v2 }
 0x1b4   : > { %v1576_v56 = vpop.f32.mrf.mxu0 }
 0x1b5   : > { %v1577_v58 = vadd.f32 %v2888_v60, %v1576_v56  ;;  %v1224_v59 = vpop.f32.mrf.mxu2 }
 0x1b6   : > { %v1225_v0 = vadd.f32 %v1224_v59, %v1136_v57 }
 0x1b7   : > { %1649 = vst [vmem:[%s2895_s7 + $0x28] sm:$0xff] %v1577_v58  ;;  %v1138_v4 = vpop.f32.mrf.mxu1 }
 0x1b8   : > { %v1313_v10 = vpop.f32.mrf.mxu3  ;;  %v1139_v16 = vadd.f32 %v1138_v4, %v2725_v1 }
 0x1b9   : > { %v1314_v5 = vadd.f32 %v1313_v10, %v1225_v0 }
 0x1bb   : > { %v1462_v7 = vadd.f32 %v2820_v31, %v1314_v5 }
 0x1bc   : > { %v1579_v51 = vpop.f32.mrf.mxu0 }
 0x1bd   : > { %v1580_v8 = vadd.f32 %v2888_v60, %v1579_v51  ;;  %v1482_v9 = vpack.c.bf16 %v1462_v7, %v1461_v6  ;;  %v1227_v12 = vpop.f32.mrf.mxu2 }
 0x1be   : > { %v1228_v62 = vadd.f32 %v1227_v12, %v1139_v16 }
 0x1bf   : > { %1650 = vst [vmem:[%s2895_s7 + $0x30] sm:$0xff] %v1580_v8  ;;  %1618 = vmatmul.bf16.gmra.mxu0 %v1482_v9  ;;  %v1140_v13 = vpop.f32.mrf.mxu1 }
 0x1c0   : > { %v1316_v61 = vpop.f32.mrf.mxu3  ;;  %v1141_v21 = vadd.f32 %v1140_v13, %v2740_v11 }
 0x1c1   : > { %v1317_v22 = vadd.f32 %v1316_v61, %v1228_v62 }
 0x1c3   : > { %v1463_v36 = vadd.f32 %v2820_v31, %v1317_v22 }
 0x1c4   : > { %v1581_v19 = vpop.f32.mrf.mxu0 }
 0x1c5   : > { %v1582_v3 = vadd.f32 %v2888_v60, %v1581_v19  ;;  %v1229_v14 = vpop.f32.mrf.mxu2 }
 0x1c6   : > { %v1230_v32 = vadd.f32 %v1229_v14, %v1141_v21 }
 0x1c7   : > { %1651 = vst [vmem:[%s2895_s7 + $0x38] sm:$0xff] %v1582_v3  ;;  %v1143_v24 = vpop.f32.mrf.mxu1 }
 0x1c8   : > { %v1318_v23 = vpop.f32.mrf.mxu3  ;;  %v1144_v33 = vadd.f32 %v1143_v24, %v2749_v18 }
 0x1c9   : > { %v1319_v17 = vadd.f32 %v1318_v23, %v1230_v32 }
 0x1cb   : > { %v1464_v25 = vadd.f32 %v2820_v31, %v1319_v17 }
 0x1cc   : > { %v1584_v1 = vpop.f32.mrf.mxu0 }
 0x1cd   : > { %v1585_v26 = vadd.f32 %v2888_v60, %v1584_v1  ;;  %v1483_v27 = vpack.c.bf16 %v1464_v25, %v1463_v36  ;;  %v1232_v29 = vpop.f32.mrf.mxu2 }
 0x1ce   : > { %v1233_v37 = vadd.f32 %v1232_v29, %v1144_v33 }
 0x1cf   : > { %1652 = vst [vmem:[%s2895_s7 + $0x40] sm:$0xff] %v1585_v26  ;;  %1623 = vmatmul.bf16.gmra.mxu0 %v1483_v27  ;;  %v1145_v30 = vpop.f32.mrf.mxu1 }
 0x1d0   : > { %v1321_v11 = vpop.f32.mrf.mxu3  ;;  %v1146_v39 = vadd.f32 %v1145_v30, %v2764_v28 }
 0x1d1   : > { %v1322_v42 = vadd.f32 %v1321_v11, %v1233_v37 }
 0x1d3   : > { %v1465_v50 = vadd.f32 %v2820_v31, %v1322_v42 }
 0x1d4   : > { %v1586_v38 = vpop.f32.mrf.mxu0 }
 0x1d5   : > { %v1587_v40 = vadd.f32 %v2888_v60, %v1586_v38  ;;  %v1234_v41 = vpop.f32.mrf.mxu2 }
 0x1d6   : > { %v1235_v43 = vadd.f32 %v1234_v41, %v1146_v39 }
 0x1d7   : > { %1653 = vst [vmem:[%s2895_s7 + $0x48] sm:$0xff] %v1587_v40  ;;  %v1148_v47 = vpop.f32.mrf.mxu1 }
 0x1d8   : > { %v1323_v46 = vpop.f32.mrf.mxu3  ;;  %v1149_v52 = vadd.f32 %v1148_v47, %v2773_v35 }
 0x1d9   : > { %v1324_v49 = vadd.f32 %v1323_v46, %v1235_v43 }
 0x1db   : > { %v1466_v34 = vadd.f32 %v2820_v31, %v1324_v49 }
 0x1dc   : > { %v1589_v18 = vpop.f32.mrf.mxu0 }
 0x1dd   : > { %v1590_v15 = vadd.f32 %v2888_v60, %v1589_v18  ;;  %v1484_v48 = vpack.c.bf16 %v1466_v34, %v1465_v50  ;;  %v1237_v54 = vpop.f32.mrf.mxu2 }
 0x1de   : > { %v1238_v55 = vadd.f32 %v1237_v54, %v1149_v52 }
 0x1df   : > { %1654 = vst [vmem:[%s2895_s7 + $0x50] sm:$0xff] %v1590_v15  ;;  %1628 = vmatmul.bf16.gmra.mxu0 %v1484_v48  ;;  %v1150_v44 = vpop.f32.mrf.mxu1 }
 0x1e0   : > { %v1326_v28 = vpop.f32.mrf.mxu3  ;;  %v1151_v56 = vadd.f32 %v1150_v44, %v2788_v45 }
 0x1e1   : > { %v1327_v59 = vadd.f32 %v1326_v28, %v1238_v55 }
 0x1e3   : > { %v1467_v5 = vadd.f32 %v2820_v31, %v1327_v59 }
 0x1e4   : > { %v1591_v20 = vpop.f32.mrf.mxu0 }
 0x1e5   : > { %v1592_v57 = vadd.f32 %v2888_v60, %v1591_v20  ;;  %v1239_v58 = vpop.f32.mrf.mxu2 }
 0x1e6   : > { %v1240_v2 = vadd.f32 %v1239_v58, %v1151_v56 }
 0x1e7   : > { %1655 = vst [vmem:[%s2895_s7 + $0x58] sm:$0xff] %v1592_v57  ;;  %v1153_v10 = vpop.f32.mrf.mxu1 }
 0x1e8   : > { %v1328_v0 = vpop.f32.mrf.mxu3  ;;  %v1154_v9 = vadd.f32 %v1153_v10, %v2797_v53 }
 0x1e9   : > { %v1329_v4 = vadd.f32 %v1328_v0, %v1240_v2 }
 0x1eb   : > { %v1468_v6 = vadd.f32 %v2820_v31, %v1329_v4 }
 0x1ec   : > { %v1594_v35 = vpop.f32.mrf.mxu0 }
 0x1ed   : > { %v1595_v7 = vadd.f32 %v2888_v60, %v1594_v35  ;;  %v1485_v51 = vpack.c.bf16 %v1468_v6, %v1467_v5  ;;  %v1242_v8 = vpop.f32.mrf.mxu2 }
 0x1ee   : > { %v1243_v61 = vadd.f32 %v1242_v8, %v1154_v9 }
 0x1ef   : > { %1656 = vst [vmem:[%s2895_s7 + $0x60] sm:$0xff] %v1595_v7  ;;  %1633 = vmatmul.bf16.gmra.mxu0 %v1485_v51  ;;  %v1155_v12 = vpop.f32.mrf.mxu1 }
 0x1f0   : > { %v1331_v45 = vpop.f32.mrf.mxu3  ;;  %v1156_v16 = vadd.f32 %v1155_v12, %v2809_v63 }
 0x1f1   : > { %v1332_v21 = vadd.f32 %v1331_v45, %v1243_v61 }
 0x1f3   : > { %v1469_v32 = vadd.f32 %v2820_v31, %v1332_v21 }
 0x1f4   : > { %v1596_v13 = vpop.f32.mrf.mxu0 }
 0x1f5   : > { %v1597_v62 = vadd.f32 %v2888_v60, %v1596_v13  ;;  %v1244_v19 = vpop.f32.mrf.mxu2 }
 0x1f6   : > { %v1245_v3 = vadd.f32 %v1244_v19, %v1156_v16 }
 0x1f7   : > { %1657 = vst [vmem:[%s2895_s7 + $0x68] sm:$0xff] %v1597_v62 }
 0x1f8   : > { %v1333_v14 = vpop.f32.mrf.mxu3 }
 0x1f9   : > { %v1334_v22 = vadd.f32 %v1333_v14, %v1245_v3 }
 0x1fb   : > { %v1470_v53 = vadd.f32 %v2820_v31, %v1334_v22 }
 0x1fc   : > { %v1599_v23 = vpop.f32.mrf.mxu0 }
 0x1fd   : > { %v1600_v24 = vadd.f32 %v2888_v60, %v1599_v23  ;;  %v1486_v63 = vpack.c.bf16 %v1470_v53, %v1469_v32 }
 0x1ff   : > { %1658 = vst [vmem:[%s2895_s7 + $0x70] sm:$0xff] %v1600_v24  ;;  %1638 = vmatmul.bf16.gmra.mxu0 %v1486_v63 }
 0x204   : > { %v1601_v17 = vpop.f32.mrf.mxu0 }
 0x205   : > { %v1602_v36 = vadd.f32 %v2888_v60, %v1601_v17 }
 0x207   : > { %1659 = vst [vmem:[%s2895_s7 + $0x78] sm:$0xff] %v1602_v36 }
 0x20c   : > { %v1604_v25 = vpop.f32.mrf.mxu0 }
 0x20d   : > { %v1605_v1 = vadd.f32 %v2888_v60, %v1604_v25 }
 0x20f   : > { %1660 = vst [vmem:[%s2895_s7 + $0x80] sm:$0xff] %v1605_v1 }
 0x214   : > { %v1606_v26 = vpop.f32.mrf.mxu0 }
 0x215   : > { %v1607_v31 = vadd.f32 %v2888_v60, %v1606_v26 }
 0x217   : > { %1661 = vst [vmem:[%s2895_s7 + $0x88] sm:$0xff] %v1607_v31 }
 0x21c   : > { %v1609_v27 = vpop.f32.mrf.mxu0 }
 0x21d   : > { %v1610_v29 = vadd.f32 %v2888_v60, %v1609_v27 }
 0x21f   : > { %1662 = vst [vmem:[%s2895_s7 + $0x90] sm:$0xff] %v1610_v29 }
 0x224   : > { %v1611_v11 = vpop.f32.mrf.mxu0 }
 0x225   : > { %v1612_v30 = vadd.f32 %v2888_v60, %v1611_v11 }
 0x227   : > { %1663 = vst [vmem:[%s2895_s7 + $0x98] sm:$0xff] %v1612_v30 }
 0x22c   : > { %v1614_v33 = vpop.f32.mrf.mxu0 }
 0x22d   : > { %v1615_v37 = vadd.f32 %v2888_v60, %v1614_v33 }
 0x22f   : > { %1664 = vst [vmem:[%s2895_s7 + $0xa0] sm:$0xff] %v1615_v37 }
 0x234   : > { %v1616_v38 = vpop.f32.mrf.mxu0 }
 0x235   : > { %v1617_v39 = vadd.f32 %v2888_v60, %v1616_v38 }
 0x237   : > { %1665 = vst [vmem:[%s2895_s7 + $0xa8] sm:$0xff] %v1617_v39 }
 0x23c   : > { %v1619_v40 = vpop.f32.mrf.mxu0 }
 0x23d   : > { %v1620_v41 = vadd.f32 %v2888_v60, %v1619_v40 }
 0x23f   : > { %1666 = vst [vmem:[%s2895_s7 + $0xb0] sm:$0xff] %v1620_v41 }
 0x244   : > { %v1621_v42 = vpop.f32.mrf.mxu0 }
 0x245   : > { %v1622_v43 = vadd.f32 %v2888_v60, %v1621_v42 }
 0x247   : > { %1667 = vst [vmem:[%s2895_s7 + $0xb8] sm:$0xff] %v1622_v43 }
 0x24c   : > { %v1624_v46 = vpop.f32.mrf.mxu0 }
 0x24d   : > { %v1625_v47 = vadd.f32 %v2888_v60, %v1624_v46 }
 0x24f   : > { %1668 = vst [vmem:[%s2895_s7 + $0xc0] sm:$0xff] %v1625_v47 }
 0x254   : > { %v1626_v49 = vpop.f32.mrf.mxu0 }
 0x255   : > { %v1627_v50 = vadd.f32 %v2888_v60, %v1626_v49 }
 0x257   : > { %1669 = vst [vmem:[%s2895_s7 + $0xc8] sm:$0xff] %v1627_v50 }
 0x25c   : > { %v1629_v34 = vpop.f32.mrf.mxu0 }
 0x25d   : > { %v1630_v18 = vadd.f32 %v2888_v60, %v1629_v34 }
 0x25f   : > { %1670 = vst [vmem:[%s2895_s7 + $0xd0] sm:$0xff] %v1630_v18 }
 0x264   : > { %v1631_v15 = vpop.f32.mrf.mxu0 }
 0x265   : > { %v1632_v48 = vadd.f32 %v2888_v60, %v1631_v15 }
 0x267   : > { %1671 = vst [vmem:[%s2895_s7 + $0xd8] sm:$0xff] %v1632_v48 }
 0x26c   : > { %v1634_v54 = vpop.f32.mrf.mxu0 }
 0x26d   : > { %v1635_v28 = vadd.f32 %v2888_v60, %v1634_v54 }
 0x26f   : > { %1672 = vst [vmem:[%s2895_s7 + $0xe0] sm:$0xff] %v1635_v28 }
 0x274   : > { %v1636_v44 = vpop.f32.mrf.mxu0 }
 0x275   : > { %v1637_v52 = vadd.f32 %v2888_v60, %v1636_v44 }
 0x277   : > { %1673 = vst [vmem:[%s2895_s7 + $0xe8] sm:$0xff] %v1637_v52 }
 0x27c   : > { %v1639_v55 = vpop.f32.mrf.mxu0 }
 0x27d   : > { %v1640_v20 = vadd.f32 %v2888_v60, %v1639_v55 }
 0x27f   : > { %1674 = vst [vmem:[%s2895_s7 + $0xf0] sm:$0xff] %v1640_v20 }
 0x284   : > { %v1641_v56 = vpop.f32.mrf.mxu0 }
 0x285   : > { %v1642_v57 = vadd.f32 %v2888_v60, %v1641_v56 }
 0x287   : > { %1675 = vst [vmem:[%s2895_s7 + $0xf8] sm:$0xff] %v1642_v57 }
 0x288 PF: > { %s18_s23 = sadd.s32 1, %s2456_s23   ;;  %s3015_s18 = smov %s2440_s19 }
 0x289   : > { %p15_p0 = scmp.ge.s32.totalorder %s18_s23, 4   ;;  %s3016_s19 = smov %s2444_s20 }
 0x28a   : > { %s3017_s20 = smov %s2539_s30  ;;  %s3018_s21 = smov %s2452_s22 }
 0x28b   : > { %s3019_s22 = smov %s3021_s25  ;;  %17 = sbr.rel (!%p15_p0) target bundleno = 4 (0x4), region = 89 }
 0x290   :  { %1698 = vsyncpa [#allocation4], 1 }
 0x291   :  { %1700 = vsyncpa [#allocation4 + $0x1], 1 }

// kernel: gcn_encoder_forward.4
= control target key start
LH: loop header
LB: loop body
LE: loop exit
PB: predicated region body
PF: predicated region fallthrough
CT: control target
= control target key end

     0   :  { %10 = vsyncpa [#allocation4], 0  ;;  %s3150_s0 = inlined_call_operand.hbm [shape: bf16[512,512], index: 0, kind: input, shape index: {}]   ;;  %s3151_s1 = inlined_call_operand.vmem [shape: bf16[512,128], index: 1, kind: input, shape index: {}]   ;;  %s3152_s2 = inlined_call_operand.vmem [shape: f32[1,128], index: 2, kind: input, shape index: {}]   ;;  %s3153_s3 = inlined_call_operand.vmem [shape: bf16[128,128], index: 3, kind: input, shape index: {}]   ;;  %s3154_s4 = inlined_call_operand.vmem [shape: f32[1,128], index: 4, kind: input, shape index: {}]   ;;  %s3155_s5 = inlined_call_operand.vmem [shape: bf16[512,128], index: 5, kind: output, shape index: {}]  }
   0x1   :  { %12 = vsyncpa [#allocation4 + $0x1], 0  ;;  %s2649_s18 = smov 0   ;;  %s2651_s19 = smov 0  }
   0x2   :  { %s2653_s20 = smov 0   ;;  %s2655_s21 = smov 0  }
   0x3   :  { %s2657_s22 = smov 0   ;;  %s2659_s23 = smov 0  }
   0x4 LB: > { %s1821_s24 = sadd.s32 4294967295, %s2615_s23   ;;  %s30_s25 = sadd.s32 1, %s2611_s22  ;;  %s2615_s23 = sphi %s2659_s23, %s18_s23   ;;  %s2611_s22 = sphi %s2657_s22, %s3162_s22   ;;  %s2607_s21 = sphi %s2655_s21, %s3161_s21   ;;  %s2603_s20 = sphi %s2653_s20, %s3160_s20   ;;  %s2599_s19 = sphi %s2651_s19, %s3159_s19   ;;  %s2595_s18 = sphi %s2649_s18, %s3158_s18  }
   0x5   : > { %p32_p0 = scmp.ge.s32.totalorder %s30_s25, 2  ;;  %s39_s26 = sadd.s32 1, %s2603_s20 }
   0x6   : > { %p46_p1 = scmp.ne.s32.totalorder %s2603_s20, %s2599_s19  ;;  %p47_p2 = scmp.eq.s32.totalorder %s2615_s23, 0 }
   0x7   : > { %s3164_s25 = smov (%p32_p0, %s30_s25), 0  ;;  %p52_p4 = scmp.ne.s32.totalorder %s2599_s19, %s2595_s18 }
   0x8   : > { %p2685_p3 = por %p47_p2, %p46_p1  ;;  %s34_s28 = ssub.s32 %s2611_s22, %s3164_s25 }
   0x9   : > { %p53_p5 = scmp.eq.s32.totalorder %s1821_s24, 0  ;;  %p37_p6 = scmp.eq.s32.totalorder %s34_s28, 0 }
   0xa   : > { %p2482_p8 = scmp.lt.s32.totalorder %s2615_s23, 2  ;;  %s198_s6 = sand.u32 1, %s2603_s20  }
   0xb   : > { %p2692_p7 = por %p53_p5, %p52_p4  ;;  %s2252_s7 = sshll.u32 %s2611_s22, 9 }
   0xc   : > { %s2698_s30 = scalar_select %p37_p6, %s2603_s20, %s39_s26  }
   0xd   : > { %s1825_s8 = sshll.u32 %s198_s6, 9  ;;  %s210_s11 = scalar_lea.hbm %s3150_s0, %s2252_s7 }
   0xe   : > { %s211_s12 = sshll.u32 %s210_s11, 4  ;;  %s202_s13 = scalar_lea.vmem [#allocation3], %s1825_s8  ;;  %s212_s12 = int_to_ptr.hbm [resolvable:$true] %s211_s12 }
   0xf   : > { %s213_s14 = sshll.u32 %s202_s13, 4  ;;  %p2479_p9 = pnand %p2482_p8, %p2685_p3  ;;  %s214_s14 = int_to_ptr.vmem [resolvable:$true] %s213_s14 }
  0x10   : > { %p1829_p10 = scmp.ge.s32.totalorder %s2615_s23, 1  ;;  %p221_p11 = scmp.lt.s32.totalorder %s2615_s23, 3 }
  0x11   : > { %s199_s15 = scalar_lea.sflag [#allocation4], %s198_s6  ;;  %s2617_s16 = smov 256  }
  0x12   : > { %s2618_s17 = smov 16   ;;  %p222_p12 = pnand %p1829_p10, %p221_p11 }
  0x13   : > { %2481 = dma.hbm_to_vmem [thread:$0]  (!%p2479_p9), %s212_s12, 8192, %s214_s14, %s199_s15, %s2617_s16, %s2617_s16, %s2618_s17  }
  0x14   : > { %225 = sbr.rel (%p222_p12) target bundleno = 652 (0x28c), region = 40  ;;  %s227_s18 = sand.u32 (!%p222_p12), 1, %s2599_s19  }
  0x15   : > { %s1830_s24 = sshll.u32 (!%p222_p12), %s227_s18, 9  ;;  %s228_s26 = scalar_lea.sflag (!%p222_p12), [#allocation4], %s227_s18 }
  0x16   : > { %s2710_s28 = scalar_lea.vmem (!%p222_p12), [#allocation3], %s1830_s24 }
  0x19   : > { %2590 = dma.done.wait (%p2692_p7), %s228_s26, 8192  }
  0x1a   : > { %2592 = vsyncadd (%p2692_p7), %s228_s26, 4294959104  ;;  %v2260_v0 = vld [vmem:[%s3151_s1 + $0x38] sm:$0xff]  ;;  %v2259_v1 = vld [vmem:[%s3151_s1 + $0x30] sm:$0xff] }
  0x1b   : > { %2452 = vmatpush.bf16.msra.mxu1 %v2260_v0  ;;  %2453 = vmatpush.bf16.msra.mxu2 %v2260_v0  ;;  %v2258_v2 = vld [vmem:[%s3151_s1 + $0x28] sm:$0xff]  ;;  %v2257_v3 = vld [vmem:[%s3151_s1 + $0x20] sm:$0xff]  ;;  %v2256_v4 = vld [vmem:[%s3151_s1 + $0x18] sm:$0xff] }
  0x1c   : > { %2454 = vmatpush.bf16.msra.mxu3 %v2260_v0  ;;  %980 = vmatpush.bf16.msra.mxu0 %v2260_v0  ;;  %v2255_v5 = vld [vmem:[%s3151_s1 + $0x10] sm:$0xff]  ;;  %v2254_v6 = vld [vmem:[%s3151_s1 + $0x8] sm:$0xff]  ;;  %v2253_v7 = vld [vmem:[%s3151_s1] sm:$0xff] }
  0x1d   : > { %v1899_v8 = vld [vmem:[%s2710_s28 + $0x80] sm:$0xf]  ;;  %v2303_v9 = vld [vmem:[%s2710_s28 + $0x8c] sm:$0xf0]  ;;  %v2276_v14 = vld [vmem:[%s3151_s1 + $0xb8] sm:$0xff] }
  0x1e   : > { %v1963_v10 = vld [vmem:[%s2710_s28 + $0x100] sm:$0xf]  ;;  %v2319_v11 = vld [vmem:[%s2710_s28 + $0x10c] sm:$0xf0]  ;;  %v2284_v15 = vld [vmem:[%s3151_s1 + $0xf8] sm:$0xff]  ;;  %v1900_v17 = vor.u32 %v2303_v9, %v1899_v8 }
  0x1f   : > { %2455 = vmatpush.bf16.msra.mxu1 %v2259_v1  ;;  %2456 = vmatpush.bf16.msra.mxu2 %v2259_v1  ;;  %v2027_v12 = vld [vmem:[%s2710_s28 + $0x180] sm:$0xf]  ;;  %v2335_v13 = vld [vmem:[%s2710_s28 + $0x18c] sm:$0xf0]  ;;  %v2268_v16 = vld [vmem:[%s3151_s1 + $0x78] sm:$0xff]  ;;  %v1964_v18 = vor.u32 %v2319_v11, %v1963_v10 }
  0x20   : > { %2457 = vmatpush.bf16.msra.mxu3 %v2259_v1  ;;  %981 = vmatpush.bf16.msra.mxu0 %v2259_v1  ;;  %v2028_v19 = vor.u32 %v2335_v13, %v2027_v12  ;;  %v2275_v20 = vld [vmem:[%s3151_s1 + $0xb0] sm:$0xff]  ;;  %v2274_v23 = vld [vmem:[%s3151_s1 + $0xa8] sm:$0xff]  ;;  %v2273_v26 = vld [vmem:[%s3151_s1 + $0xa0] sm:$0xff] }
  0x21   : > { %v2283_v21 = vld [vmem:[%s3151_s1 + $0xf0] sm:$0xff]  ;;  %v2282_v24 = vld [vmem:[%s3151_s1 + $0xe8] sm:$0xff]  ;;  %v2281_v27 = vld [vmem:[%s3151_s1 + $0xe0] sm:$0xff] }
  0x22   : > { %v2267_v22 = vld [vmem:[%s3151_s1 + $0x70] sm:$0xff]  ;;  %v2266_v25 = vld [vmem:[%s3151_s1 + $0x68] sm:$0xff]  ;;  %v2265_v28 = vld [vmem:[%s3151_s1 + $0x60] sm:$0xff] }
  0x23   : > { %2458 = vmatpush.bf16.msra.mxu1 %v2258_v2  ;;  %2459 = vmatpush.bf16.msra.mxu2 %v2258_v2  ;;  %v1915_v29 = vld [vmem:[%s2710_s28 + $0xa0] sm:$0xf]  ;;  %v2307_v30 = vld [vmem:[%s2710_s28 + $0xac] sm:$0xf0]  ;;  %v2272_v35 = vld [vmem:[%s3151_s1 + $0x98] sm:$0xff] }
  0x24   : > { %2460 = vmatpush.bf16.msra.mxu3 %v2258_v2  ;;  %982 = vmatpush.bf16.msra.mxu0 %v2258_v2  ;;  %v1979_v31 = vld [vmem:[%s2710_s28 + $0x120] sm:$0xf]  ;;  %v2323_v32 = vld [vmem:[%s2710_s28 + $0x12c] sm:$0xf0]  ;;  %v2280_v36 = vld [vmem:[%s3151_s1 + $0xd8] sm:$0xff]  ;;  %v1916_v38 = vor.u32 %v2307_v30, %v1915_v29 }
  0x25   : > { %v2043_v33 = vld [vmem:[%s2710_s28 + $0x1a0] sm:$0xf]  ;;  %v2339_v34 = vld [vmem:[%s2710_s28 + $0x1ac] sm:$0xf0]  ;;  %v2264_v37 = vld [vmem:[%s3151_s1 + $0x58] sm:$0xff]  ;;  %v1980_v39 = vor.u32 %v2323_v32, %v1979_v31 }
  0x26   : > { %v2044_v40 = vor.u32 %v2339_v34, %v2043_v33  ;;  %v2271_v41 = vld [vmem:[%s3151_s1 + $0x90] sm:$0xff]  ;;  %v2270_v44 = vld [vmem:[%s3151_s1 + $0x88] sm:$0xff]  ;;  %v1835_v45 = vld [vmem:[%s2710_s28] sm:$0xf] }
  0x27   : > { %2461 = vmatpush.bf16.msra.mxu1 %v2257_v3  ;;  %2462 = vmatpush.bf16.msra.mxu2 %v2257_v3  ;;  %v2279_v42 = vld [vmem:[%s3151_s1 + $0xd0] sm:$0xff]  ;;  %v2278_v46 = vld [vmem:[%s3151_s1 + $0xc8] sm:$0xff]  ;;  %v2269_v50 = vld [vmem:[%s3151_s1 + $0x80] sm:$0xff] }
  0x28   : > { %2463 = vmatpush.bf16.msra.mxu3 %v2257_v3  ;;  %983 = vmatpush.bf16.msra.mxu0 %v2257_v3  ;;  %v2263_v43 = vld [vmem:[%s3151_s1 + $0x50] sm:$0xff]  ;;  %v2262_v47 = vld [vmem:[%s3151_s1 + $0x48] sm:$0xff]  ;;  %v2277_v51 = vld [vmem:[%s3151_s1 + $0xc0] sm:$0xff] }
  0x29   : > { %v2287_v48 = vld [vmem:[%s2710_s28 + $0xc] sm:$0xf0]  ;;  %v2261_v52 = vld [vmem:[%s3151_s1 + $0x40] sm:$0xff]  ;;  %v2290_v29 = vld [vmem:[%s2710_s28 + $0x2c] sm:$0xf] }
  0x2a   : > { %v1836_v49 = vor.u32 %v2287_v48, %v1835_v45  ;;  %v1931_v53 = vld [vmem:[%s2710_s28 + $0xc0] sm:$0xf]  ;;  %v2311_v54 = vld [vmem:[%s2710_s28 + $0xcc] sm:$0xf0]  ;;  %v2285_v13 = vld [vmem:[%s2710_s28 + $0x4] sm:$0xf] }
  0x2b   : > { %2464 = vmatpush.bf16.msra.mxu1 %v2256_v4  ;;  %2465 = vmatpush.bf16.msra.mxu2 %v2256_v4  ;;  %v1995_v55 = vld [vmem:[%s2710_s28 + $0x140] sm:$0xf]  ;;  %v2327_v56 = vld [vmem:[%s2710_s28 + $0x14c] sm:$0xf0]  ;;  %v1932_v59 = vor.u32 %v2311_v54, %v1931_v53  ;;  %v1861_v30 = vld [vmem:[%s2710_s28 + $0x38] sm:$0xf0] }
  0x2c   : > { %2466 = vmatpush.bf16.msra.mxu3 %v2256_v4  ;;  %984 = vmatpush.bf16.msra.mxu0 %v2256_v4  ;;  %v2059_v57 = vld [vmem:[%s2710_s28 + $0x1c0] sm:$0xf]  ;;  %v2343_v58 = vld [vmem:[%s2710_s28 + $0x1cc] sm:$0xf0]  ;;  %v1996_v60 = vor.u32 %v2327_v56, %v1995_v55  ;;  %v1864_v33 = vor.u32 %v2290_v29, %v1861_v30  ;;  %v2293_v34 = vld [vmem:[%s2710_s28 + $0x44] sm:$0xf] }
  0x2d   : > { %v2060_v61 = vor.u32 %v2343_v58, %v2059_v57  ;;  %v1851_v62 = vld [vmem:[%s2710_s28 + $0x20] sm:$0xf]  ;;  %v2291_v63 = vld [vmem:[%s2710_s28 + $0x2c] sm:$0xf0]  ;;  %v1891_v45 = vld [vmem:[%s2710_s28 + $0x68] sm:$0xf] }
  0x2e   : > { %v1852_v0 = vor.u32 %v2291_v63, %v1851_v62  ;;  %v1947_v1 = vld [vmem:[%s2710_s28 + $0xe0] sm:$0xf]  ;;  %v2315_v2 = vld [vmem:[%s2710_s28 + $0xec] sm:$0xf0]  ;;  %v1893_v48 = vld [vmem:[%s2710_s28 + $0x78] sm:$0xf0] }
  0x2f   : > { %2467 = vmatpush.bf16.msra.mxu1 %v2255_v5  ;;  %2468 = vmatpush.bf16.msra.mxu2 %v2255_v5  ;;  %v2011_v3 = vld [vmem:[%s2710_s28 + $0x160] sm:$0xf]  ;;  %v2331_v4 = vld [vmem:[%s2710_s28 + $0x16c] sm:$0xf0]  ;;  %v2301_v53 = vld [vmem:[%s2710_s28 + $0x84] sm:$0xf] }
  0x30   : > { %2469 = vmatpush.bf16.msra.mxu3 %v2255_v5  ;;  %985 = vmatpush.bf16.msra.mxu0 %v2255_v5  ;;  %v2075_v5 = vld [vmem:[%s2710_s28 + $0x1e0] sm:$0xf]  ;;  %v2012_v8 = vor.u32 %v2331_v4, %v2011_v3  ;;  %v2295_v11 = vld [vmem:[%s2710_s28 + $0x4c] sm:$0xf0]  ;;  %v1901_v54 = vld [vmem:[%s2710_s28 + $0x90] sm:$0xf0] }
  0x31   : > { %v1867_v10 = vld [vmem:[%s2710_s28 + $0x40] sm:$0xf]  ;;  %v1907_v55 = vld [vmem:[%s2710_s28 + $0x88] sm:$0xf]  ;;  %v2304_v56 = vld [vmem:[%s2710_s28 + $0x94] sm:$0xf0] }
  0x32   : > { %v1868_v12 = vor.u32 %v2295_v11, %v1867_v10  ;;  %v2302_v57 = vld [vmem:[%s2710_s28 + $0x8c] sm:$0xf]  ;;  %v1909_v58 = vld [vmem:[%s2710_s28 + $0x98] sm:$0xf0]  ;;  %v2355_v63 = vld [vmem:[%s3153_s3 + $0x30] sm:$0xff] }
  0x33   : > { %2470 = vmatpush.bf16.msra.mxu1 %v2254_v6  ;;  %2471 = vmatpush.bf16.msra.mxu2 %v2254_v6  ;;  %v1912_v62 = vor.u32 %v2302_v57, %v1909_v58  ;;  %v2354_v3 = vld [vmem:[%s3153_s3 + $0x28] sm:$0xff]  ;;  %v2305_v4 = vld [vmem:[%s2710_s28 + $0xa4] sm:$0xf]  ;;  %v2320_v58 = vld [vmem:[%s2710_s28 + $0x114] sm:$0xf0] }
  0x34   : > { %2472 = vmatpush.bf16.msra.mxu3 %v2254_v6  ;;  %986 = vmatpush.bf16.msra.mxu0 %v2254_v6  ;;  %v2347_v6 = vld [vmem:[%s2710_s28 + $0x1ec] sm:$0xf0]  ;;  %v1971_v57 = vld [vmem:[%s2710_s28 + $0x108] sm:$0xf] }
  0x35   : > { %v2076_v9 = vor.u32 %v2347_v6, %v2075_v5  ;;  %v1917_v5 = vld [vmem:[%s2710_s28 + $0xb0] sm:$0xf0]  ;;  %v1923_v6 = vld [vmem:[%s2710_s28 + $0xa8] sm:$0xf] }
  0x37   : > { %2473 = vmatpush.bf16.msra.mxu1 %v2253_v7  ;;  %2474 = vmatpush.bf16.msra.mxu2 %v2253_v7 }
  0x38   : > { %2475 = vmatpush.bf16.msra.mxu3 %v2253_v7  ;;  %987 = vmatpush.bf16.msra.mxu0 %v2253_v7  ;;  %v1948_v7 = vor.u32 %v2315_v2, %v1947_v1 }
  0x3a   : > { %1008 = vmatmul.bf16.vlgmr.msra.gmra.mxu1 %v1900_v17  ;;  %1028 = vmatmul.bf16.vlgmr.msra.gmra.mxu2 %v1964_v18  ;;  %v2286_v17 = vld [vmem:[%s2710_s28 + $0xc] sm:$0xf]  ;;  %v1845_v18 = vld [vmem:[%s2710_s28 + $0x18] sm:$0xf0] }
  0x3b   : > { %1158 = vmatpush.bf16.msrb.mxu2 %v2276_v14  ;;  %1069 = vmatpush.bf16.msrb.mxu1 %v2268_v16  ;;  %v1837_v14 = vld [vmem:[%s2710_s28 + $0x10] sm:$0xf0]  ;;  %v2288_v16 = vld [vmem:[%s2710_s28 + $0x14] sm:$0xf0] }
  0x3c   : > { %1247 = vmatpush.bf16.msrb.mxu3 %v2284_v15  ;;  %988 = vmatmul.bf16.vlgmr.msra.gmra.mxu0 %v1836_v49  ;;  %v1843_v15 = vld [vmem:[%s2710_s28 + $0x8] sm:$0xf] }
  0x3d   : > { %1048 = vmatmul.bf16.vlgmr.msra.gmra.mxu3 %v2028_v19  ;;  %v1840_v19 = vor.u32 %v2285_v13, %v1837_v14 }
  0x3f   : > { %1159 = vmatpush.bf16.msrb.mxu2 %v2275_v20  ;;  %1070 = vmatpush.bf16.msrb.mxu1 %v2267_v22  ;;  %v1844_v20 = vor.u32 %v2288_v16, %v1843_v15  ;;  %v1883_v22 = vld [vmem:[%s2710_s28 + $0x60] sm:$0xf] }
  0x40   : > { %1248 = vmatpush.bf16.msrb.mxu3 %v2283_v21  ;;  %v1848_v21 = vor.u32 %v2286_v17, %v1845_v18  ;;  %v2353_v16 = vld [vmem:[%s3153_s3 + $0x20] sm:$0xff] }
  0x43   : > { %1160 = vmatpush.bf16.msrb.mxu2 %v2274_v23  ;;  %1071 = vmatpush.bf16.msrb.mxu1 %v2266_v25  ;;  %v2299_v23 = vld [vmem:[%s2710_s28 + $0x6c] sm:$0xf0]  ;;  %v2289_v25 = vld [vmem:[%s2710_s28 + $0x24] sm:$0xf] }
  0x44   : > { %1249 = vmatpush.bf16.msrb.mxu3 %v2282_v24  ;;  %v1884_v24 = vor.u32 %v2299_v23, %v1883_v22  ;;  %v1933_v22 = vld [vmem:[%s2710_s28 + $0xd0] sm:$0xf0]  ;;  %v1939_v23 = vld [vmem:[%s2710_s28 + $0xc8] sm:$0xf] }
  0x47   : > { %1161 = vmatpush.bf16.msrb.mxu2 %v2273_v26  ;;  %1072 = vmatpush.bf16.msrb.mxu1 %v2265_v28  ;;  %v1853_v26 = vld [vmem:[%s2710_s28 + $0x30] sm:$0xf0]  ;;  %v2292_v28 = vld [vmem:[%s2710_s28 + $0x34] sm:$0xf0] }
  0x48   : > { %1250 = vmatpush.bf16.msrb.mxu3 %v2281_v27  ;;  %v1859_v27 = vld [vmem:[%s2710_s28 + $0x28] sm:$0xf]  ;;  %v1856_v31 = vor.u32 %v2289_v25, %v1853_v26  ;;  %v2310_v25 = vld [vmem:[%s2710_s28 + $0xcc] sm:$0xf]  ;;  %v1941_v26 = vld [vmem:[%s2710_s28 + $0xd8] sm:$0xf0] }
  0x49   : > { %v1860_v32 = vor.u32 %v2292_v28, %v1859_v27 }
  0x4a   : > { %1013 = vmatmul.bf16.gmra.mxu1 %v1916_v38  ;;  %1033 = vmatmul.bf16.gmra.mxu2 %v1980_v39  ;;  %v2294_v38 = vld [vmem:[%s2710_s28 + $0x4c] sm:$0xf]  ;;  %v1877_v39 = vld [vmem:[%s2710_s28 + $0x58] sm:$0xf0] }
  0x4b   : > { %1162 = vmatpush.bf16.msrb.mxu2 %v2272_v35  ;;  %1073 = vmatpush.bf16.msrb.mxu1 %v2264_v37  ;;  %v1869_v35 = vld [vmem:[%s2710_s28 + $0x50] sm:$0xf0]  ;;  %v2296_v37 = vld [vmem:[%s2710_s28 + $0x54] sm:$0xf0] }
  0x4c   : > { %1251 = vmatpush.bf16.msrb.mxu3 %v2280_v36  ;;  %993 = vmatmul.bf16.gmra.mxu0 %v1852_v0  ;;  %v1875_v36 = vld [vmem:[%s2710_s28 + $0x48] sm:$0xf] }
  0x4d   : > { %1053 = vmatmul.bf16.gmra.mxu3 %v2044_v40  ;;  %v1872_v40 = vor.u32 %v2293_v34, %v1869_v35 }
  0x4f   : > { %1163 = vmatpush.bf16.msrb.mxu2 %v2271_v41  ;;  %1074 = vmatpush.bf16.msrb.mxu1 %v2263_v43  ;;  %v1876_v41 = vor.u32 %v2296_v37, %v1875_v36  ;;  %v2297_v43 = vld [vmem:[%s2710_s28 + $0x64] sm:$0xf] }
  0x50   : > { %1252 = vmatpush.bf16.msrb.mxu3 %v2279_v42  ;;  %v1880_v42 = vor.u32 %v2294_v38, %v1877_v39  ;;  %v2313_v37 = vld [vmem:[%s2710_s28 + $0xe4] sm:$0xf]  ;;  %v1949_v38 = vld [vmem:[%s2710_s28 + $0xf0] sm:$0xf0]  ;;  %v1955_v39 = vld [vmem:[%s2710_s28 + $0xe8] sm:$0xf] }
  0x53   : > { %1164 = vmatpush.bf16.msrb.mxu2 %v2270_v44  ;;  %1075 = vmatpush.bf16.msrb.mxu1 %v2262_v47  ;;  %v1885_v44 = vld [vmem:[%s2710_s28 + $0x70] sm:$0xf0]  ;;  %v2298_v47 = vld [vmem:[%s2710_s28 + $0x6c] sm:$0xf] }
  0x54   : > { %1253 = vmatpush.bf16.msrb.mxu3 %v2278_v46  ;;  %v2300_v46 = vld [vmem:[%s2710_s28 + $0x74] sm:$0xf0]  ;;  %v1888_v49 = vor.u32 %v2297_v43, %v1885_v44  ;;  %v2350_v43 = vld [vmem:[%s3153_s3 + $0x8] sm:$0xff] }
  0x57   : > { %1165 = vmatpush.bf16.msrb.mxu2 %v2269_v50  ;;  %1076 = vmatpush.bf16.msrb.mxu1 %v2261_v52  ;;  %v1892_v50 = vor.u32 %v2300_v46, %v1891_v45  ;;  %v2356_v52 = vld [vmem:[%s3153_s3 + $0x38] sm:$0xff]  ;;  %v1952_v46 = vor.u32 %v2313_v37, %v1949_v38 }
  0x58   : > { %1254 = vmatpush.bf16.msrb.mxu3 %v2277_v51  ;;  %v1896_v51 = vor.u32 %v2298_v47, %v1893_v48  ;;  %1587 = vmatpush.bf16.msrb.mxu0 %v2356_v52 }
  0x5a   : > { %1018 = vmatmul.bf16.gmra.mxu1 %v1932_v59  ;;  %1038 = vmatmul.bf16.gmra.mxu2 %v1996_v60  ;;  %v1904_v59 = vor.u32 %v2301_v53, %v1901_v54  ;;  %v1908_v60 = vor.u32 %v2304_v56, %v1907_v55  ;;  %v2317_v55 = vld [vmem:[%s2710_s28 + $0x104] sm:$0xf]  ;;  %v1965_v56 = vld [vmem:[%s2710_s28 + $0x110] sm:$0xf0] }
  0x5c   : > { %998 = vmatmul.bf16.gmra.mxu0 %v1868_v12  ;;  %v1920_v12 = vor.u32 %v2305_v4, %v1917_v5  ;;  %v1972_v4 = vor.u32 %v2320_v58, %v1971_v57 }
  0x5d   : > { %1058 = vmatmul.bf16.gmra.mxu3 %v2060_v61  ;;  %1588 = vmatpush.bf16.msrb.mxu0 %v2355_v63 }
  0x61   : > { %1589 = vmatpush.bf16.msrb.mxu0 %v2354_v3  ;;  %v1968_v3 = vor.u32 %v2317_v55, %v1965_v56 }
  0x65   : > { %1590 = vmatpush.bf16.msrb.mxu0 %v2353_v16 }
  0x6a   : > { %1023 = vmatmul.bf16.gmra.mxu1 %v1948_v7  ;;  %1043 = vmatmul.bf16.gmra.mxu2 %v2012_v8  ;;  %v2308_v7 = vld [vmem:[%s2710_s28 + $0xb4] sm:$0xf0]  ;;  %v2306_v8 = vld [vmem:[%s2710_s28 + $0xac] sm:$0xf] }
  0x6b   : > { %v1924_v13 = vor.u32 %v2308_v7, %v1923_v6 }
  0x6c   : > { %1003 = vmatmul.bf16.gmra.mxu0 %v1884_v24  ;;  %v2312_v24 = vld [vmem:[%s2710_s28 + $0xd4] sm:$0xf0] }
  0x6d   : > { %1063 = vmatmul.bf16.gmra.mxu3 %v2076_v9  ;;  %v1925_v9 = vld [vmem:[%s2710_s28 + $0xb8] sm:$0xf0]  ;;  %v1940_v30 = vor.u32 %v2312_v24, %v1939_v23  ;;  %v2324_v23 = vld [vmem:[%s2710_s28 + $0x134] sm:$0xf0] }
  0x6e   : > { %v1928_v15 = vor.u32 %v2306_v8, %v1925_v9 }
  0x7a   : > { %1077 = vmatmul.bf16.vlgmr.msrb.gmra.mxu1 %v1840_v19  ;;  %1166 = vmatmul.bf16.vlgmr.msrb.gmra.mxu2 %v1844_v20  ;;  %v2352_v20 = vld [vmem:[%s3153_s3 + $0x18] sm:$0xff] }
  0x7b   : > { %1591 = vmatpush.bf16.msrb.mxu0 %v2352_v20  ;;  %v2321_v20 = vld [vmem:[%s2710_s28 + $0x124] sm:$0xf] }
  0x7d   : > { %1255 = vmatmul.bf16.vlgmr.msrb.gmra.mxu3 %v1848_v21  ;;  %v2309_v21 = vld [vmem:[%s2710_s28 + $0xc4] sm:$0xf] }
  0x7e   : > { %v1936_v29 = vor.u32 %v2309_v21, %v1933_v22  ;;  %v1981_v21 = vld [vmem:[%s2710_s28 + $0x130] sm:$0xf0]  ;;  %v1987_v22 = vld [vmem:[%s2710_s28 + $0x128] sm:$0xf] }
  0x7f   : > { %v1984_v38 = vor.u32 %v2321_v20, %v1981_v21 }
  0x8a   : > { %1082 = vmatmul.bf16.gmra.mxu1 %v1856_v31  ;;  %1171 = vmatmul.bf16.gmra.mxu2 %v1860_v32  ;;  %v1944_v32 = vor.u32 %v2310_v25, %v1941_v26  ;;  %v2977_v25 = vld [vmem:[%s3152_s2] ss:$0 sm:$0xff] }
  0x8d   : > { %1260 = vmatmul.bf16.gmra.mxu3 %v1864_v33  ;;  %v2351_v33 = vld [vmem:[%s3153_s3 + $0x10] sm:$0xff] }
  0x8e   : > { %1592 = vmatpush.bf16.msrb.mxu0 %v2351_v33 }
  0x92   : > { %1593 = vmatpush.bf16.msrb.mxu0 %v2350_v43 }
  0x9a   : > { %1087 = vmatmul.bf16.gmra.mxu1 %v1872_v40  ;;  %1176 = vmatmul.bf16.gmra.mxu2 %v1876_v41  ;;  %v2316_v40 = vld [vmem:[%s2710_s28 + $0xf4] sm:$0xf0]  ;;  %v2314_v41 = vld [vmem:[%s2710_s28 + $0xec] sm:$0xf] }
  0x9b   : > { %v1956_v47 = vor.u32 %v2316_v40, %v1955_v39  ;;  %v1988_v39 = vor.u32 %v2324_v23, %v1987_v22 }
  0x9d   : > { %1265 = vmatmul.bf16.gmra.mxu3 %v1880_v42  ;;  %v1957_v42 = vld [vmem:[%s2710_s28 + $0xf8] sm:$0xf0] }
  0xaa   : > { %1092 = vmatmul.bf16.gmra.mxu1 %v1888_v49  ;;  %1181 = vmatmul.bf16.gmra.mxu2 %v1892_v50  ;;  %v1960_v49 = vor.u32 %v2314_v41, %v1957_v42  ;;  %v2349_v50 = vld [vmem:[%s3153_s3] sm:$0xff] }
  0xab   : > { %1594 = vmatpush.bf16.msrb.mxu0 %v2349_v50 }
  0xad   : > { %1270 = vmatmul.bf16.gmra.mxu3 %v1896_v51 }
  0xb7   : > { %v2877_v61 = vpop.f32.mrf.mxu1 }
  0xb9   : > { %v989_v52 = vpop.f32.mrf.mxu0 }
  0xba   : > { %1097 = vmatmul.bf16.gmra.mxu1 %v1904_v59  ;;  %1186 = vmatmul.bf16.gmra.mxu2 %v1908_v60  ;;  %v2318_v59 = vld [vmem:[%s2710_s28 + $0x10c] sm:$0xf]  ;;  %v1973_v60 = vld [vmem:[%s2710_s28 + $0x118] sm:$0xf0] }
  0xbb   : > { %v1976_v6 = vor.u32 %v2318_v59, %v1973_v60  ;;  %v2325_v60 = vld [vmem:[%s2710_s28 + $0x144] sm:$0xf] }
  0xbd   : > { %1275 = vmatmul.bf16.gmra.mxu3 %v1912_v62  ;;  %v2882_v0 = vpop.f32.mrf.mxu2 }
  0xbf   : > { %v2886_v2 = vpop.f32.mrf.mxu1 }
  0xc0   : > { %v2884_v1 = vpop.f32.mrf.mxu3 }
  0xc1   : > { %v991_v7 = vpop.f32.mrf.mxu0 }
  0xc5   : > { %v2897_v10 = vpop.f32.mrf.mxu2 }
  0xc7   : > { %v2901_v14 = vpop.f32.mrf.mxu1 }
  0xc8   : > { %v2899_v11 = vpop.f32.mrf.mxu3 }
  0xc9   : > { %v994_v16 = vpop.f32.mrf.mxu0 }
  0xca   : > { %1102 = vmatmul.bf16.gmra.mxu1 %v1920_v12  ;;  %1191 = vmatmul.bf16.gmra.mxu2 %v1924_v13 }
  0xcd   : > { %1280 = vmatmul.bf16.gmra.mxu3 %v1928_v15  ;;  %v2906_v17 = vpop.f32.mrf.mxu2 }
  0xcf   : > { %v2910_v19 = vpop.f32.mrf.mxu1 }
  0xd0   : > { %v2908_v18 = vpop.f32.mrf.mxu3 }
  0xd5   : > { %v2921_v27 = vpop.f32.mrf.mxu2 }
  0xd7   : > { %v2925_v31 = vpop.f32.mrf.mxu1 }
  0xd8   : > { %v2923_v28 = vpop.f32.mrf.mxu3 }
  0xda   : > { %1107 = vmatmul.bf16.gmra.mxu1 %v1936_v29  ;;  %1196 = vmatmul.bf16.gmra.mxu2 %v1940_v30  ;;  %v2322_v29 = vld [vmem:[%s2710_s28 + $0x12c] sm:$0xf]  ;;  %v1989_v30 = vld [vmem:[%s2710_s28 + $0x138] sm:$0xf0] }
  0xdb   : > { %v1992_v41 = vor.u32 %v2322_v29, %v1989_v30 }
  0xdd   : > { %1285 = vmatmul.bf16.gmra.mxu3 %v1944_v32  ;;  %v2930_v34 = vpop.f32.mrf.mxu2 }
  0xdf   : > { %v2934_v36 = vpop.f32.mrf.mxu1 }
  0xe0   : > { %v2932_v35 = vpop.f32.mrf.mxu3 }
  0xe5   : > { %v2945_v44 = vpop.f32.mrf.mxu2 }
  0xe7   : > { %v2949_v48 = vpop.f32.mrf.mxu1 }
  0xe8   : > { %v2947_v45 = vpop.f32.mrf.mxu3 }
  0xea   : > { %1112 = vmatmul.bf16.gmra.mxu1 %v1952_v46  ;;  %1201 = vmatmul.bf16.gmra.mxu2 %v1956_v47  ;;  %v996_v47 = vpop.f32.mrf.mxu0 }
  0xed   : > { %1290 = vmatmul.bf16.gmra.mxu3 %v1960_v49  ;;  %v2954_v51 = vpop.f32.mrf.mxu2 }
  0xef   : > { %v2958_v54 = vpop.f32.mrf.mxu1 }
  0xf0   : > { %v2956_v53 = vpop.f32.mrf.mxu3 }
  0xf5   : > { %v2966_v62 = vpop.f32.mrf.mxu2 }
  0xf7   : > { %v1078_v5 = vpop.f32.mrf.mxu1 }
  0xf8   : > { %v2968_v63 = vpop.f32.mrf.mxu3  ;;  %v1079_v8 = vadd.f32 %v1078_v5, %v989_v52  ;;  %v2328_v5 = vld [vmem:[%s2710_s28 + $0x154] sm:$0xf0] }
  0xfa   : > { %1117 = vmatmul.bf16.gmra.mxu1 %v1968_v3  ;;  %1206 = vmatmul.bf16.gmra.mxu2 %v1972_v4  ;;  %v1997_v3 = vld [vmem:[%s2710_s28 + $0x150] sm:$0xf0]  ;;  %v2003_v4 = vld [vmem:[%s2710_s28 + $0x148] sm:$0xf] }
  0xfb   : > { %v2000_v21 = vor.u32 %v2325_v60, %v1997_v3 }
  0xfd   : > { %1295 = vmatmul.bf16.gmra.mxu3 %v1976_v6  ;;  %v1167_v9 = vpop.f32.mrf.mxu2 }
  0xfe   : > { %v1168_v15 = vadd.f32 %v1167_v9, %v1079_v8  ;;  %v2326_v8 = vld [vmem:[%s2710_s28 + $0x14c] sm:$0xf]  ;;  %v2005_v9 = vld [vmem:[%s2710_s28 + $0x158] sm:$0xf0] }
  0xff   : > { %v1080_v13 = vpop.f32.mrf.mxu1  ;;  %v2008_v23 = vor.u32 %v2326_v8, %v2005_v9 }
 0x100   : > { %v1256_v12 = vpop.f32.mrf.mxu3  ;;  %v1081_v26 = vadd.f32 %v1080_v13, %v991_v7 }
 0x101   : > { %v1257_v24 = vadd.f32 %v1256_v12, %v1168_v15  ;;  %v999_v12 = vpop.f32.mrf.mxu0 }
 0x103   : > { %v1439_v42 = vadd.f32 %v2977_v25, %v1257_v24 }
 0x105   : > { %v1169_v32 = vpop.f32.mrf.mxu2  ;;  %v1471_v49 = vmax.f32 %v1439_v42, 0.0 }
 0x106   : > { %v1170_v33 = vadd.f32 %v1169_v32, %v1081_v26 }
 0x107   : > { %v1083_v40 = vpop.f32.mrf.mxu1 }
 0x108   : > { %v1258_v37 = vpop.f32.mrf.mxu3  ;;  %v1084_v52 = vadd.f32 %v1083_v40, %v994_v16  ;;  %v2004_v16 = vor.u32 %v2328_v5, %v2003_v4 }
 0x109   : > { %v1259_v43 = vadd.f32 %v1258_v37, %v1170_v33  ;;  %v1001_v40 = vpop.f32.mrf.mxu0 }
 0x10a   : > { %1122 = vmatmul.bf16.gmra.mxu1 %v1984_v38  ;;  %1211 = vmatmul.bf16.gmra.mxu2 %v1988_v39 }
 0x10b   : > { %v1440_v46 = vadd.f32 %v2977_v25, %v1259_v43  ;;  %v2329_v43 = vld [vmem:[%s2710_s28 + $0x164] sm:$0xf] }
 0x10d   : > { %1300 = vmatmul.bf16.gmra.mxu3 %v1992_v41  ;;  %v1472_v50 = vmax.f32 %v1440_v46, 0.0  ;;  %v1172_v55 = vpop.f32.mrf.mxu2  ;;  %v2013_v46 = vld [vmem:[%s2710_s28 + $0x170] sm:$0xf0] }
 0x10e   : > { %v1173_v59 = vadd.f32 %v1172_v55, %v1084_v52  ;;  %v2330_v55 = vld [vmem:[%s2710_s28 + $0x16c] sm:$0xf]  ;;  %v2016_v60 = vor.u32 %v2329_v43, %v2013_v46 }
 0x10f   : > { %v1503_v57 = vpack.c.bf16 %v1472_v50, %v1471_v49  ;;  %v1085_v58 = vpop.f32.mrf.mxu1  ;;  %v2332_v49 = vld [vmem:[%s2710_s28 + $0x174] sm:$0xf0] }
 0x110   : > { %v1261_v56 = vpop.f32.mrf.mxu3  ;;  %v1086_v7 = vadd.f32 %v1085_v58, %v996_v47  ;;  %v2019_v47 = vld [vmem:[%s2710_s28 + $0x168] sm:$0xf] }
 0x111   : > { %1595 = vmatmul.bf16.vlgmr.msrb.gmra.mxu0 %v1503_v57  ;;  %v1262_v6 = vadd.f32 %v1261_v56, %v1173_v59  ;;  %v2021_v56 = vld [vmem:[%s2710_s28 + $0x178] sm:$0xf0]  ;;  %v2020_v3 = vor.u32 %v2332_v49, %v2019_v47  ;;  %v1004_v8 = vpop.f32.mrf.mxu0 }
 0x112   : > { %v2024_v5 = vor.u32 %v2330_v55, %v2021_v56 }
 0x113   : > { %v1441_v24 = vadd.f32 %v2977_v25, %v1262_v6 }
 0x115   : > { %v1174_v13 = vpop.f32.mrf.mxu2  ;;  %v1473_v30 = vmax.f32 %v1441_v24, 0.0  ;;  %v2333_v24 = vld [vmem:[%s2710_s28 + $0x184] sm:$0xf] }
 0x116   : > { %v1175_v15 = vadd.f32 %v1174_v13, %v1086_v7 }
 0x117   : > { %v1088_v22 = vpop.f32.mrf.mxu1 }
 0x118   : > { %v1263_v20 = vpop.f32.mrf.mxu3  ;;  %v1089_v32 = vadd.f32 %v1088_v22, %v999_v12 }
 0x119   : > { %v1264_v26 = vadd.f32 %v1263_v20, %v1175_v15 }
 0x11a   : > { %1127 = vmatmul.bf16.gmra.mxu1 %v2000_v21  ;;  %1216 = vmatmul.bf16.gmra.mxu2 %v2004_v16 }
 0x11b   : > { %v1442_v29 = vadd.f32 %v2977_v25, %v1264_v26  ;;  %v1006_v26 = vpop.f32.mrf.mxu0 }
 0x11d   : > { %1305 = vmatmul.bf16.gmra.mxu3 %v2008_v23  ;;  %v1474_v33 = vmax.f32 %v1442_v29, 0.0  ;;  %v1177_v37 = vpop.f32.mrf.mxu2  ;;  %v2029_v29 = vld [vmem:[%s2710_s28 + $0x190] sm:$0xf0] }
 0x11e   : > { %v1178_v42 = vadd.f32 %v1177_v37, %v1089_v32  ;;  %v2336_v32 = vld [vmem:[%s2710_s28 + $0x194] sm:$0xf0]  ;;  %v2032_v43 = vor.u32 %v2333_v24, %v2029_v29 }
 0x11f   : > { %v1504_v39 = vpack.c.bf16 %v1474_v33, %v1473_v30  ;;  %v1090_v41 = vpop.f32.mrf.mxu1  ;;  %v2035_v30 = vld [vmem:[%s2710_s28 + $0x188] sm:$0xf] }
 0x120   : > { %v1266_v38 = vpop.f32.mrf.mxu3  ;;  %v1091_v52 = vadd.f32 %v1090_v41, %v1001_v40  ;;  %v2036_v46 = vor.u32 %v2336_v32, %v2035_v30 }
 0x121   : > { %1600 = vmatmul.bf16.gmra.mxu0 %v1504_v39  ;;  %v1267_v50 = vadd.f32 %v1266_v38, %v1178_v42  ;;  %v2334_v38 = vld [vmem:[%s2710_s28 + $0x18c] sm:$0xf]  ;;  %v2037_v39 = vld [vmem:[%s2710_s28 + $0x198] sm:$0xf0] }
 0x122   : > { %v2040_v49 = vor.u32 %v2334_v38, %v2037_v39 }
 0x123   : > { %v1443_v6 = vadd.f32 %v2977_v25, %v1267_v50 }
 0x125   : > { %v1179_v57 = vpop.f32.mrf.mxu2  ;;  %v1475_v12 = vmax.f32 %v1443_v6, 0.0  ;;  %v2337_v6 = vld [vmem:[%s2710_s28 + $0x1a4] sm:$0xf] }
 0x126   : > { %v1180_v58 = vadd.f32 %v1179_v57, %v1091_v52 }
 0x127   : > { %v1093_v4 = vpop.f32.mrf.mxu1 }
 0x128   : > { %v1268_v59 = vpop.f32.mrf.mxu3  ;;  %v1094_v13 = vadd.f32 %v1093_v4, %v1004_v8  ;;  %v2051_v8 = vld [vmem:[%s2710_s28 + $0x1a8] sm:$0xf] }
 0x129   : > { %v1269_v7 = vadd.f32 %v1268_v59, %v1180_v58 }
 0x12a   : > { %1132 = vmatmul.bf16.gmra.mxu1 %v2016_v60  ;;  %1221 = vmatmul.bf16.gmra.mxu2 %v2020_v3 }
 0x12b   : > { %v1444_v9 = vadd.f32 %v2977_v25, %v1269_v7  ;;  %v2045_v7 = vld [vmem:[%s2710_s28 + $0x1b0] sm:$0xf0] }
 0x12d   : > { %1310 = vmatmul.bf16.gmra.mxu3 %v2024_v5  ;;  %v1476_v15 = vmax.f32 %v1444_v9, 0.0  ;;  %v1182_v20 = vpop.f32.mrf.mxu2  ;;  %v2340_v9 = vld [vmem:[%s2710_s28 + $0x1b4] sm:$0xf0] }
 0x12e   : > { %v1183_v23 = vadd.f32 %v1182_v20, %v1094_v13  ;;  %v2053_v20 = vld [vmem:[%s2710_s28 + $0x1b8] sm:$0xf0]  ;;  %v2052_v24 = vor.u32 %v2340_v9, %v2051_v8 }
 0x12f   : > { %v1505_v16 = vpack.c.bf16 %v1476_v15, %v1475_v12  ;;  %v1095_v22 = vpop.f32.mrf.mxu1  ;;  %v2338_v15 = vld [vmem:[%s2710_s28 + $0x1ac] sm:$0xf] }
 0x130   : > { %v1271_v21 = vpop.f32.mrf.mxu3  ;;  %v1096_v37 = vadd.f32 %v1095_v22, %v1006_v26  ;;  %v2056_v26 = vor.u32 %v2338_v15, %v2053_v20 }
 0x131   : > { %1605 = vmatmul.bf16.gmra.mxu0 %v1505_v16  ;;  %v1272_v33 = vadd.f32 %v1271_v21, %v1183_v23  ;;  %v2048_v23 = vor.u32 %v2337_v6, %v2045_v7 }
 0x133   : > { %v1445_v50 = vadd.f32 %v2977_v25, %v1272_v33 }
 0x135   : > { %v1184_v40 = vpop.f32.mrf.mxu2  ;;  %v1477_v56 = vmax.f32 %v1445_v50, 0.0 }
 0x136   : > { %v1185_v41 = vadd.f32 %v1184_v40, %v1096_v37 }
 0x137   : > { %v1098_v47 = vpop.f32.mrf.mxu1 }
 0x138   : > { %v1273_v42 = vpop.f32.mrf.mxu3  ;;  %v1099_v59 = vadd.f32 %v1098_v47, %v2877_v61  ;;  %v2067_v47 = vld [vmem:[%s2710_s28 + $0x1c8] sm:$0xf] }
 0x139   : > { %v1274_v52 = vadd.f32 %v1273_v42, %v1185_v41 }
 0x13a   : > { %1137 = vmatmul.bf16.gmra.mxu1 %v2032_v43  ;;  %1226 = vmatmul.bf16.gmra.mxu2 %v2036_v46  ;;  %v2341_v43 = vld [vmem:[%s2710_s28 + $0x1c4] sm:$0xf]  ;;  %v2061_v46 = vld [vmem:[%s2710_s28 + $0x1d0] sm:$0xf0] }
 0x13b   : > { %v1446_v55 = vadd.f32 %v2977_v25, %v1274_v52 }
 0x13d   : > { %1315 = vmatmul.bf16.gmra.mxu3 %v2040_v49  ;;  %v1478_v57 = vmax.f32 %v1446_v55, 0.0  ;;  %v1187_v58 = vpop.f32.mrf.mxu2  ;;  %v2344_v49 = vld [vmem:[%s2710_s28 + $0x1d4] sm:$0xf0]  ;;  %v2342_v55 = vld [vmem:[%s2710_s28 + $0x1cc] sm:$0xf] }
 0x13e   : > { %v1188_v5 = vadd.f32 %v1187_v58, %v1099_v59 }
 0x13f   : > { %v1506_v3 = vpack.c.bf16 %v1478_v57, %v1477_v56  ;;  %v1100_v4 = vpop.f32.mrf.mxu1  ;;  %v2069_v56 = vld [vmem:[%s2710_s28 + $0x1d8] sm:$0xf0] }
 0x140   : > { %v1276_v60 = vpop.f32.mrf.mxu3  ;;  %v1101_v13 = vadd.f32 %v1100_v4, %v2886_v2  ;;  %v2072_v4 = vor.u32 %v2342_v55, %v2069_v56 }
 0x141   : > { %1610 = vmatmul.bf16.gmra.mxu0 %v1506_v3  ;;  %v1277_v12 = vadd.f32 %v1276_v60, %v1188_v5  ;;  %v2064_v60 = vor.u32 %v2341_v43, %v2061_v46  ;;  %v2068_v3 = vor.u32 %v2344_v49, %v2067_v47 }
 0x143   : > { %v1447_v29 = vadd.f32 %v2977_v25, %v1277_v12 }
 0x145   : > { %v1189_v21 = vpop.f32.mrf.mxu2  ;;  %v1479_v2 = vmax.f32 %v1447_v29, 0.0  ;;  %v2346_v29 = vld [vmem:[%s2710_s28 + $0x1ec] sm:$0xf] }
 0x146   : > { %v1190_v16 = vadd.f32 %v1189_v21, %v1101_v13 }
 0x147   : > { %v1103_v61 = vpop.f32.mrf.mxu1 }
 0x148   : > { %v1278_v22 = vpop.f32.mrf.mxu3  ;;  %v1104_v38 = vadd.f32 %v1103_v61, %v2901_v14 }
 0x149   : > { %v1279_v30 = vadd.f32 %v1278_v22, %v1190_v16  ;;  %v2345_v16 = vld [vmem:[%s2710_s28 + $0x1e4] sm:$0xf]  ;;  %v2077_v22 = vld [vmem:[%s2710_s28 + $0x1f0] sm:$0xf0] }
 0x14a   : > { %1142 = vmatmul.bf16.gmra.mxu1 %v2048_v23  ;;  %1231 = vmatmul.bf16.gmra.mxu2 %v2052_v24  ;;  %v2083_v23 = vld [vmem:[%s2710_s28 + $0x1e8] sm:$0xf]  ;;  %v2348_v24 = vld [vmem:[%s2710_s28 + $0x1f4] sm:$0xf0] }
 0x14b   : > { %v1448_v32 = vadd.f32 %v2977_v25, %v1279_v30  ;;  %v2085_v30 = vld [vmem:[%s2710_s28 + $0x1f8] sm:$0xf0]  ;;  %s1831_s28 = sshll.u32 %s2607_s21, 5 }
 0x14c   : > { %p262_p13 = scmp.lt.s32.totalorder %s1831_s28, 63 }
 0x14d   : > { %1320 = vmatmul.bf16.gmra.mxu3 %v2056_v26  ;;  %v1480_v33 = vmax.f32 %v1448_v32, 0.0  ;;  %v1192_v37 = vpop.f32.mrf.mxu2 }
 0x14e   : > { %v1193_v42 = vadd.f32 %v1192_v37, %v1104_v38  ;;  %v2080_v37 = vor.u32 %v2345_v16, %v2077_v22  ;;  %v2084_v38 = vor.u32 %v2348_v24, %v2083_v23  ;;  %s3166_s28 = smov (!%p262_p13, %s1831_s28), 63 }
 0x14f   : > { %v1507_v40 = vpack.c.bf16 %v1480_v33, %v1479_v2  ;;  %v1105_v41 = vpop.f32.mrf.mxu1  ;;  %s1832_s21 = sshll.u32 %s3166_s28, 2 }
 0x150   : > { %v1281_v39 = vpop.f32.mrf.mxu3  ;;  %v1106_v52 = vadd.f32 %v1105_v41, %v2910_v19  ;;  %s3058_s7 = scalar_lea.vmem %s3155_s5, %s1832_s21 }
 0x151   : > { %1615 = vmatmul.bf16.gmra.mxu0 %v1507_v40  ;;  %v1282_v50 = vadd.f32 %v1281_v39, %v1193_v42  ;;  %v2088_v39 = vor.u32 %v2346_v29, %v2085_v30 }
 0x153   : > { %v1449_v5 = vadd.f32 %v2977_v25, %v1282_v50 }
 0x155   : > { %v1194_v57 = vpop.f32.mrf.mxu2  ;;  %v1481_v19 = vmax.f32 %v1449_v5, 0.0 }
 0x156   : > { %v1195_v58 = vadd.f32 %v1194_v57, %v1106_v52 }
 0x157   : > { %v1108_v14 = vpop.f32.mrf.mxu1 }
 0x158   : > { %v1283_v59 = vpop.f32.mrf.mxu3  ;;  %v1109_v12 = vadd.f32 %v1108_v14, %v2925_v31 }
 0x159   : > { %v1284_v6 = vadd.f32 %v1283_v59, %v1195_v58 }
 0x15a   : > { %1147 = vmatmul.bf16.gmra.mxu1 %v2064_v60  ;;  %1236 = vmatmul.bf16.gmra.mxu2 %v2068_v3 }
 0x15b   : > { %v1450_v7 = vadd.f32 %v2977_v25, %v1284_v6 }
 0x15d   : > { %1325 = vmatmul.bf16.gmra.mxu3 %v2072_v4  ;;  %v1482_v8 = vmax.f32 %v1450_v7, 0.0  ;;  %v1197_v9 = vpop.f32.mrf.mxu2 }
 0x15e   : > { %v1198_v21 = vadd.f32 %v1197_v9, %v1109_v12 }
 0x15f   : > { %v1508_v15 = vpack.c.bf16 %v1482_v8, %v1481_v19  ;;  %v1110_v20 = vpop.f32.mrf.mxu1 }
 0x160   : > { %v1286_v13 = vpop.f32.mrf.mxu3  ;;  %v1111_v26 = vadd.f32 %v1110_v20, %v2934_v36 }
 0x161   : > { %1620 = vmatmul.bf16.gmra.mxu0 %v1508_v15  ;;  %v1287_v61 = vadd.f32 %v1286_v13, %v1198_v21 }
 0x163   : > { %v1451_v40 = vadd.f32 %v2977_v25, %v1287_v61 }
 0x165   : > { %v1199_v32 = vpop.f32.mrf.mxu2  ;;  %v1483_v43 = vmax.f32 %v1451_v40, 0.0 }
 0x166   : > { %v1200_v2 = vadd.f32 %v1199_v32, %v1111_v26 }
 0x167   : > { %v1113_v31 = vpop.f32.mrf.mxu1 }
 0x168   : > { %v1288_v33 = vpop.f32.mrf.mxu3  ;;  %v1114_v47 = vadd.f32 %v1113_v31, %v2949_v48 }
 0x169   : > { %v1289_v41 = vadd.f32 %v1288_v33, %v1200_v2 }
 0x16a   : > { %1152 = vmatmul.bf16.gmra.mxu1 %v2080_v37  ;;  %1241 = vmatmul.bf16.gmra.mxu2 %v2084_v38  ;;  %v3050_v38 = vld [vmem:[%s3154_s4] ss:$0 sm:$0xff] }
 0x16b   : > { %v1452_v42 = vadd.f32 %v2977_v25, %v1289_v41 }
 0x16d   : > { %1330 = vmatmul.bf16.gmra.mxu3 %v2088_v39  ;;  %v1484_v46 = vmax.f32 %v1452_v42, 0.0  ;;  %v1202_v36 = vpop.f32.mrf.mxu2 }
 0x16e   : > { %v1203_v55 = vadd.f32 %v1202_v36, %v1114_v47 }
 0x16f   : > { %v1509_v50 = vpack.c.bf16 %v1484_v46, %v1483_v43  ;;  %v1115_v52 = vpop.f32.mrf.mxu1 }
 0x170   : > { %v1291_v49 = vpop.f32.mrf.mxu3  ;;  %v1116_v57 = vadd.f32 %v1115_v52, %v2958_v54 }
 0x171   : > { %1625 = vmatmul.bf16.gmra.mxu0 %v1509_v50  ;;  %v1292_v56 = vadd.f32 %v1291_v49, %v1203_v55 }
 0x173   : > { %v1453_v14 = vadd.f32 %v2977_v25, %v1292_v56 }
 0x175   : > { %v1204_v58 = vpop.f32.mrf.mxu2  ;;  %v1485_v6 = vmax.f32 %v1453_v14, 0.0 }
 0x176   : > { %v1205_v59 = vadd.f32 %v1204_v58, %v1116_v57 }
 0x177   : > { %v1118_v3 = vpop.f32.mrf.mxu1 }
 0x178   : > { %v1293_v60 = vpop.f32.mrf.mxu3  ;;  %v1119_v19 = vadd.f32 %v1118_v3, %v2882_v0 }
 0x179   : > { %v1294_v4 = vadd.f32 %v1293_v60, %v1205_v59 }
 0x17b   : > { %v1454_v5 = vadd.f32 %v2977_v25, %v1294_v4 }
 0x17d   : > { %v1486_v7 = vmax.f32 %v1454_v5, 0.0  ;;  %v1207_v48 = vpop.f32.mrf.mxu2 }
 0x17e   : > { %v1208_v13 = vadd.f32 %v1207_v48, %v1119_v19 }
 0x17f   : > { %v1510_v9 = vpack.c.bf16 %v1486_v7, %v1485_v6  ;;  %v1120_v12 = vpop.f32.mrf.mxu1 }
 0x180   : > { %v1296_v8 = vpop.f32.mrf.mxu3  ;;  %v1121_v15 = vadd.f32 %v1120_v12, %v2897_v10 }
 0x181   : > { %1630 = vmatmul.bf16.gmra.mxu0 %v1510_v9  ;;  %v1297_v54 = vadd.f32 %v1296_v8, %v1208_v13 }
 0x183   : > { %v1455_v23 = vadd.f32 %v2977_v25, %v1297_v54 }
 0x185   : > { %v1209_v20 = vpop.f32.mrf.mxu2  ;;  %v1487_v26 = vmax.f32 %v1455_v23, 0.0 }
 0x186   : > { %v1210_v21 = vadd.f32 %v1209_v20, %v1121_v15 }
 0x187   : > { %v1123_v22 = vpop.f32.mrf.mxu1 }
 0x188   : > { %v1298_v16 = vpop.f32.mrf.mxu3  ;;  %v1124_v32 = vadd.f32 %v1123_v22, %v2906_v17 }
 0x189   : > { %v1299_v24 = vadd.f32 %v1298_v16, %v1210_v21 }
 0x18b   : > { %v1456_v61 = vadd.f32 %v2977_v25, %v1299_v24 }
 0x18d   : > { %v1488_v0 = vmax.f32 %v1456_v61, 0.0  ;;  %v1212_v29 = vpop.f32.mrf.mxu2 }
 0x18e   : > { %v1596_v30 = vpop.f32.mrf.mxu0  ;;  %v1213_v37 = vadd.f32 %v1212_v29, %v1124_v32 }
 0x18f   : > { %v1511_v33 = vpack.c.bf16 %v1488_v0, %v1487_v26  ;;  %v1125_v10 = vpop.f32.mrf.mxu1  ;;  %v1597_v42 = vadd.f32 %v3050_v38, %v1596_v30 }
 0x190   : > { %v1301_v2 = vpop.f32.mrf.mxu3  ;;  %v1126_v39 = vadd.f32 %v1125_v10, %v2921_v27 }
 0x191   : > { %1635 = vmatmul.bf16.gmra.mxu0 %v1511_v33  ;;  %v1302_v31 = vadd.f32 %v1301_v2, %v1213_v37 }
 0x193   : > { %v1457_v47 = vadd.f32 %v2977_v25, %v1302_v31 }
 0x195   : > { %v1214_v40 = vpop.f32.mrf.mxu2  ;;  %v1489_v52 = vmax.f32 %v1457_v47, 0.0 }
 0x196   : > { %v1598_v41 = vpop.f32.mrf.mxu0  ;;  %v1215_v17 = vadd.f32 %v1214_v40, %v1126_v39 }
 0x197   : > { %v1599_v46 = vadd.f32 %v3050_v38, %v1598_v41  ;;  %v1128_v36 = vpop.f32.mrf.mxu1 }
 0x198   : > { %v1303_v43 = vpop.f32.mrf.mxu3  ;;  %v1129_v58 = vadd.f32 %v1128_v36, %v2930_v34 }
 0x199   : > { %v1304_v49 = vadd.f32 %v1303_v43, %v1215_v17  ;;  %v2360_v27 = vpack.c.bf16 %v1599_v46, %v1597_v42 }
 0x19b   : > { %v1458_v50 = vadd.f32 %v2977_v25, %v1304_v49  ;;  %2361 = vst [vmem:[%s3058_s7] sm:$0xff] %v2360_v27  }
 0x19d   : > { %v1490_v55 = vmax.f32 %v1458_v50, 0.0  ;;  %v1217_v56 = vpop.f32.mrf.mxu2 }
 0x19e   : > { %v1601_v57 = vpop.f32.mrf.mxu0  ;;  %v1218_v14 = vadd.f32 %v1217_v56, %v1129_v58 }
 0x19f   : > { %v1512_v60 = vpack.c.bf16 %v1490_v55, %v1489_v52  ;;  %v1130_v3 = vpop.f32.mrf.mxu1  ;;  %v1602_v48 = vadd.f32 %v3050_v38, %v1601_v57 }
 0x1a0   : > { %v1306_v59 = vpop.f32.mrf.mxu3  ;;  %v1131_v5 = vadd.f32 %v1130_v3, %v2945_v44 }
 0x1a1   : > { %1640 = vmatmul.bf16.gmra.mxu0 %v1512_v60  ;;  %v1307_v4 = vadd.f32 %v1306_v59, %v1218_v14 }
 0x1a3   : > { %v1459_v34 = vadd.f32 %v2977_v25, %v1307_v4 }
 0x1a5   : > { %v1219_v6 = vpop.f32.mrf.mxu2  ;;  %v1491_v20 = vmax.f32 %v1459_v34, 0.0 }
 0x1a6   : > { %v1603_v7 = vpop.f32.mrf.mxu0  ;;  %v1220_v19 = vadd.f32 %v1219_v6, %v1131_v5 }
 0x1a7   : > { %v1604_v9 = vadd.f32 %v3050_v38, %v1603_v7  ;;  %v1133_v12 = vpop.f32.mrf.mxu1 }
 0x1a8   : > { %v1308_v8 = vpop.f32.mrf.mxu3  ;;  %v1134_v22 = vadd.f32 %v1133_v12, %v2954_v51 }
 0x1a9   : > { %v1309_v13 = vadd.f32 %v1308_v8, %v1220_v19  ;;  %v2365_v54 = vpack.c.bf16 %v1604_v9, %v1602_v48 }
 0x1ab   : > { %v1460_v15 = vadd.f32 %v2977_v25, %v1309_v13  ;;  %2437 = vst [vmem:[%s3058_s7 + $0x8] sm:$0xff] %v2365_v54  }
 0x1ad   : > { %v1492_v21 = vmax.f32 %v1460_v15, 0.0  ;;  %v1222_v16 = vpop.f32.mrf.mxu2 }
 0x1ae   : > { %v1606_v44 = vpop.f32.mrf.mxu0  ;;  %v1223_v26 = vadd.f32 %v1222_v16, %v1134_v22 }
 0x1af   : > { %v1513_v24 = vpack.c.bf16 %v1492_v21, %v1491_v20  ;;  %v1135_v61 = vpop.f32.mrf.mxu1  ;;  %v1607_v2 = vadd.f32 %v3050_v38, %v1606_v44 }
 0x1b0   : > { %v1311_v23 = vpop.f32.mrf.mxu3  ;;  %v1136_v29 = vadd.f32 %v1135_v61, %v2966_v62 }
 0x1b1   : > { %1645 = vmatmul.bf16.gmra.mxu0 %v1513_v24  ;;  %v1312_v0 = vadd.f32 %v1311_v23, %v1223_v26 }
 0x1b3   : > { %v1461_v51 = vadd.f32 %v2977_v25, %v1312_v0 }
 0x1b5   : > { %v1224_v30 = vpop.f32.mrf.mxu2  ;;  %v1493_v42 = vmax.f32 %v1461_v51, 0.0 }
 0x1b6   : > { %v1608_v32 = vpop.f32.mrf.mxu0  ;;  %v1225_v33 = vadd.f32 %v1224_v30, %v1136_v29 }
 0x1b7   : > { %v1609_v37 = vadd.f32 %v3050_v38, %v1608_v32  ;;  %v1138_v31 = vpop.f32.mrf.mxu1 }
 0x1b8   : > { %v1313_v10 = vpop.f32.mrf.mxu3  ;;  %v1139_v46 = vadd.f32 %v1138_v31, %v2884_v1 }
 0x1b9   : > { %v1314_v39 = vadd.f32 %v1313_v10, %v1225_v33  ;;  %v2370_v40 = vpack.c.bf16 %v1609_v37, %v1607_v2 }
 0x1bb   : > { %v1462_v41 = vadd.f32 %v2977_v25, %v1314_v39  ;;  %2438 = vst [vmem:[%s3058_s7 + $0x10] sm:$0xff] %v2370_v40  }
 0x1bd   : > { %v1494_v17 = vmax.f32 %v1462_v41, 0.0  ;;  %v1227_v43 = vpop.f32.mrf.mxu2 }
 0x1be   : > { %v1611_v62 = vpop.f32.mrf.mxu0  ;;  %v1228_v27 = vadd.f32 %v1227_v43, %v1139_v46 }
 0x1bf   : > { %v1514_v47 = vpack.c.bf16 %v1494_v17, %v1493_v42  ;;  %v1140_v49 = vpop.f32.mrf.mxu1  ;;  %v1612_v57 = vadd.f32 %v3050_v38, %v1611_v62 }
 0x1c0   : > { %v1316_v36 = vpop.f32.mrf.mxu3  ;;  %v1141_v52 = vadd.f32 %v1140_v49, %v2899_v11 }
 0x1c1   : > { %1650 = vmatmul.bf16.gmra.mxu0 %v1514_v47  ;;  %v1317_v50 = vadd.f32 %v1316_v36, %v1228_v27 }
 0x1c3   : > { %v1463_v1 = vadd.f32 %v2977_v25, %v1317_v50 }
 0x1c5   : > { %v1229_v55 = vpop.f32.mrf.mxu2  ;;  %v1495_v6 = vmax.f32 %v1463_v1, 0.0 }
 0x1c6   : > { %v1613_v56 = vpop.f32.mrf.mxu0  ;;  %v1230_v58 = vadd.f32 %v1229_v55, %v1141_v52 }
 0x1c7   : > { %v1614_v60 = vadd.f32 %v3050_v38, %v1613_v56  ;;  %v1143_v3 = vpop.f32.mrf.mxu1 }
 0x1c8   : > { %v1318_v59 = vpop.f32.mrf.mxu3  ;;  %v1144_v19 = vadd.f32 %v1143_v3, %v2908_v18 }
 0x1c9   : > { %v1319_v14 = vadd.f32 %v1318_v59, %v1230_v58  ;;  %v2375_v4 = vpack.c.bf16 %v1614_v60, %v1612_v57 }
 0x1cb   : > { %v1464_v5 = vadd.f32 %v2977_v25, %v1319_v14  ;;  %2439 = vst [vmem:[%s3058_s7 + $0x18] sm:$0xff] %v2375_v4  }
 0x1cd   : > { %v1496_v7 = vmax.f32 %v1464_v5, 0.0  ;;  %v1232_v48 = vpop.f32.mrf.mxu2 }
 0x1ce   : > { %v1616_v11 = vpop.f32.mrf.mxu0  ;;  %v1233_v34 = vadd.f32 %v1232_v48, %v1144_v19 }
 0x1cf   : > { %v1515_v9 = vpack.c.bf16 %v1496_v7, %v1495_v6  ;;  %v1145_v12 = vpop.f32.mrf.mxu1  ;;  %v1617_v21 = vadd.f32 %v3050_v38, %v1616_v11 }
 0x1d0   : > { %v1321_v8 = vpop.f32.mrf.mxu3  ;;  %v1146_v54 = vadd.f32 %v1145_v12, %v2923_v28 }
 0x1d1   : > { %1655 = vmatmul.bf16.gmra.mxu0 %v1515_v9  ;;  %v1322_v13 = vadd.f32 %v1321_v8, %v1233_v34 }
 0x1d3   : > { %v1465_v18 = vadd.f32 %v2977_v25, %v1322_v13 }
 0x1d5   : > { %v1234_v15 = vpop.f32.mrf.mxu2  ;;  %v1497_v0 = vmax.f32 %v1465_v18, 0.0 }
 0x1d6   : > { %v1618_v20 = vpop.f32.mrf.mxu0  ;;  %v1235_v16 = vadd.f32 %v1234_v15, %v1146_v54 }
 0x1d7   : > { %v1619_v22 = vadd.f32 %v3050_v38, %v1618_v20  ;;  %v1148_v23 = vpop.f32.mrf.mxu1 }
 0x1d8   : > { %v1323_v44 = vpop.f32.mrf.mxu3  ;;  %v1149_v32 = vadd.f32 %v1148_v23, %v2932_v35 }
 0x1d9   : > { %v1324_v24 = vadd.f32 %v1323_v44, %v1235_v16  ;;  %v2380_v61 = vpack.c.bf16 %v1619_v22, %v1617_v21 }
 0x1db   : > { %v1466_v26 = vadd.f32 %v2977_v25, %v1324_v24  ;;  %2440 = vst [vmem:[%s3058_s7 + $0x20] sm:$0xff] %v2380_v61  }
 0x1dd   : > { %v1498_v29 = vmax.f32 %v1466_v26, 0.0  ;;  %v1237_v30 = vpop.f32.mrf.mxu2 }
 0x1de   : > { %v1621_v28 = vpop.f32.mrf.mxu0  ;;  %v1238_v37 = vadd.f32 %v1237_v30, %v1149_v32 }
 0x1df   : > { %v1516_v33 = vpack.c.bf16 %v1498_v29, %v1497_v0  ;;  %v1150_v10 = vpop.f32.mrf.mxu1  ;;  %v1622_v41 = vadd.f32 %v3050_v38, %v1621_v28 }
 0x1e0   : > { %v1326_v2 = vpop.f32.mrf.mxu3  ;;  %v1151_v51 = vadd.f32 %v1150_v10, %v2947_v45 }
 0x1e1   : > { %1660 = vmatmul.bf16.gmra.mxu0 %v1516_v33  ;;  %v1327_v31 = vadd.f32 %v1326_v2, %v1238_v37 }
 0x1e3   : > { %v1467_v35 = vadd.f32 %v2977_v25, %v1327_v31 }
 0x1e5   : > { %v1239_v39 = vpop.f32.mrf.mxu2  ;;  %v1499_v49 = vmax.f32 %v1467_v35, 0.0 }
 0x1e6   : > { %v1623_v40 = vpop.f32.mrf.mxu0  ;;  %v1240_v42 = vadd.f32 %v1239_v39, %v1151_v51 }
 0x1e7   : > { %v1624_v43 = vadd.f32 %v3050_v38, %v1623_v40  ;;  %v1153_v62 = vpop.f32.mrf.mxu1 }
 0x1e8   : > { %v1328_v17 = vpop.f32.mrf.mxu3  ;;  %v1154_v52 = vadd.f32 %v1153_v62, %v2956_v53 }
 0x1e9   : > { %v1329_v46 = vadd.f32 %v1328_v17, %v1240_v42  ;;  %v2385_v36 = vpack.c.bf16 %v1624_v43, %v1622_v41 }
 0x1eb   : > { %v1468_v47 = vadd.f32 %v2977_v25, %v1329_v46  ;;  %2441 = vst [vmem:[%s3058_s7 + $0x28] sm:$0xff] %v2385_v36  }
 0x1ed   : > { %v1500_v27 = vmax.f32 %v1468_v47, 0.0  ;;  %v1242_v50 = vpop.f32.mrf.mxu2 }
 0x1ee   : > { %v1626_v45 = vpop.f32.mrf.mxu0  ;;  %v1243_v57 = vadd.f32 %v1242_v50, %v1154_v52 }
 0x1ef   : > { %v1517_v56 = vpack.c.bf16 %v1500_v27, %v1499_v49  ;;  %v1155_v58 = vpop.f32.mrf.mxu1  ;;  %v1627_v14 = vadd.f32 %v3050_v38, %v1626_v45 }
 0x1f0   : > { %v1331_v55 = vpop.f32.mrf.mxu3  ;;  %v1156_v60 = vadd.f32 %v1155_v58, %v2968_v63 }
 0x1f1   : > { %1665 = vmatmul.bf16.gmra.mxu0 %v1517_v56  ;;  %v1332_v59 = vadd.f32 %v1331_v55, %v1243_v57 }
 0x1f3   : > { %v1469_v53 = vadd.f32 %v2977_v25, %v1332_v59 }
 0x1f5   : > { %v1244_v3 = vpop.f32.mrf.mxu2  ;;  %v1501_v19 = vmax.f32 %v1469_v53, 0.0 }
 0x1f6   : > { %v1628_v1 = vpop.f32.mrf.mxu0  ;;  %v1245_v4 = vadd.f32 %v1244_v3, %v1156_v60 }
 0x1f7   : > { %v1629_v5 = vadd.f32 %v3050_v38, %v1628_v1 }
 0x1f8   : > { %v1333_v6 = vpop.f32.mrf.mxu3 }
 0x1f9   : > { %v1334_v7 = vadd.f32 %v1333_v6, %v1245_v4  ;;  %v2390_v48 = vpack.c.bf16 %v1629_v5, %v1627_v14 }
 0x1fb   : > { %v1470_v11 = vadd.f32 %v2977_v25, %v1334_v7  ;;  %2442 = vst [vmem:[%s3058_s7 + $0x30] sm:$0xff] %v2390_v48  }
 0x1fd   : > { %v1502_v8 = vmax.f32 %v1470_v11, 0.0 }
 0x1fe   : > { %v1631_v63 = vpop.f32.mrf.mxu0 }
 0x1ff   : > { %v1518_v9 = vpack.c.bf16 %v1502_v8, %v1501_v19  ;;  %v1632_v34 = vadd.f32 %v3050_v38, %v1631_v63 }
 0x201   : > { %1670 = vmatmul.bf16.gmra.mxu0 %v1518_v9 }
 0x206   : > { %v1633_v12 = vpop.f32.mrf.mxu0 }
 0x207   : > { %v1634_v13 = vadd.f32 %v3050_v38, %v1633_v12 }
 0x209   : > { %v2395_v54 = vpack.c.bf16 %v1634_v13, %v1632_v34 }
 0x20b   : > { %2443 = vst [vmem:[%s3058_s7 + $0x38] sm:$0xff] %v2395_v54  }
 0x20e   : > { %v1636_v15 = vpop.f32.mrf.mxu0 }
 0x20f   : > { %v1637_v25 = vadd.f32 %v3050_v38, %v1636_v15 }
 0x216   : > { %v1638_v20 = vpop.f32.mrf.mxu0 }
 0x217   : > { %v1639_v21 = vadd.f32 %v3050_v38, %v1638_v20 }
 0x219   : > { %v2400_v16 = vpack.c.bf16 %v1639_v21, %v1637_v25 }
 0x21b   : > { %2444 = vst [vmem:[%s3058_s7 + $0x40] sm:$0xff] %v2400_v16  }
 0x21e   : > { %v1641_v44 = vpop.f32.mrf.mxu0 }
 0x21f   : > { %v1642_v23 = vadd.f32 %v3050_v38, %v1641_v44 }
 0x226   : > { %v1643_v22 = vpop.f32.mrf.mxu0 }
 0x227   : > { %v1644_v18 = vadd.f32 %v3050_v38, %v1643_v22 }
 0x229   : > { %v2405_v24 = vpack.c.bf16 %v1644_v18, %v1642_v23 }
 0x22b   : > { %2445 = vst [vmem:[%s3058_s7 + $0x48] sm:$0xff] %v2405_v24  }
 0x22e   : > { %v1646_v61 = vpop.f32.mrf.mxu0 }
 0x22f   : > { %v1647_v0 = vadd.f32 %v3050_v38, %v1646_v61 }
 0x236   : > { %v1648_v26 = vpop.f32.mrf.mxu0 }
 0x237   : > { %v1649_v29 = vadd.f32 %v3050_v38, %v1648_v26 }
 0x239   : > { %v2410_v30 = vpack.c.bf16 %v1649_v29, %v1647_v0 }
 0x23b   : > { %2446 = vst [vmem:[%s3058_s7 + $0x50] sm:$0xff] %v2410_v30  }
 0x23e   : > { %v1651_v28 = vpop.f32.mrf.mxu0 }
 0x23f   : > { %v1652_v2 = vadd.f32 %v3050_v38, %v1651_v28 }
 0x246   : > { %v1653_v32 = vpop.f32.mrf.mxu0 }
 0x247   : > { %v1654_v33 = vadd.f32 %v3050_v38, %v1653_v32 }
 0x249   : > { %v2415_v10 = vpack.c.bf16 %v1654_v33, %v1652_v2 }
 0x24b   : > { %2447 = vst [vmem:[%s3058_s7 + $0x58] sm:$0xff] %v2415_v10  }
 0x24e   : > { %v1656_v37 = vpop.f32.mrf.mxu0 }
 0x24f   : > { %v1657_v51 = vadd.f32 %v3050_v38, %v1656_v37 }
 0x256   : > { %v1658_v31 = vpop.f32.mrf.mxu0 }
 0x257   : > { %v1659_v39 = vadd.f32 %v3050_v38, %v1658_v31 }
 0x259   : > { %v2420_v40 = vpack.c.bf16 %v1659_v39, %v1657_v51 }
 0x25b   : > { %2448 = vst [vmem:[%s3058_s7 + $0x60] sm:$0xff] %v2420_v40  }
 0x25e   : > { %v1661_v41 = vpop.f32.mrf.mxu0 }
 0x25f   : > { %v1662_v17 = vadd.f32 %v3050_v38, %v1661_v41 }
 0x266   : > { %v1663_v42 = vpop.f32.mrf.mxu0 }
 0x267   : > { %v1664_v43 = vadd.f32 %v3050_v38, %v1663_v42 }
 0x269   : > { %v2425_v62 = vpack.c.bf16 %v1664_v43, %v1662_v17 }
 0x26b   : > { %2449 = vst [vmem:[%s3058_s7 + $0x68] sm:$0xff] %v2425_v62  }
 0x26e   : > { %v1666_v35 = vpop.f32.mrf.mxu0 }
 0x26f   : > { %v1667_v36 = vadd.f32 %v3050_v38, %v1666_v35 }
 0x276   : > { %v1668_v46 = vpop.f32.mrf.mxu0 }
 0x277   : > { %v1669_v47 = vadd.f32 %v3050_v38, %v1668_v46 }
 0x279   : > { %v2430_v49 = vpack.c.bf16 %v1669_v47, %v1667_v36 }
 0x27b   : > { %2450 = vst [vmem:[%s3058_s7 + $0x70] sm:$0xff] %v2430_v49  }
 0x27e   : > { %v1671_v27 = vpop.f32.mrf.mxu0 }
 0x27f   : > { %v1672_v45 = vadd.f32 %v3050_v38, %v1671_v27 }
 0x286   : > { %v1673_v50 = vpop.f32.mrf.mxu0 }
 0x287   : > { %v1674_v52 = vadd.f32 %v3050_v38, %v1673_v50 }
 0x289   : > { %v2435_v55 = vpack.c.bf16 %v1674_v52, %v1672_v45 }
 0x28b   : > { %2451 = vst [vmem:[%s3058_s7 + $0x78] sm:$0xff] %v2435_v55  }
 0x28c PF: > { %s18_s23 = sadd.s32 1, %s2615_s23   ;;  %s3158_s18 = smov %s2599_s19 }
 0x28d   : > { %p15_p0 = scmp.ge.s32.totalorder %s18_s23, 4   ;;  %s3159_s19 = smov %s2603_s20 }
 0x28e   : > { %s3160_s20 = smov %s2698_s30  ;;  %s3161_s21 = smov %s2611_s22 }
 0x28f   : > { %s3162_s22 = smov %s3164_s25  ;;  %17 = sbr.rel (!%p15_p0) target bundleno = 4 (0x4), region = 89 }
 0x294   :  { %1762 = vsyncpa [#allocation4], 1 }
 0x295   :  { %1764 = vsyncpa [#allocation4 + $0x1], 1 }

</bundles_post_ra>
